<compile_context>
chip_gen: v7x
topology: tpu7x:2x2x1
jax: 0.10.0
libtpu: 0.0.40
codegen_flags: <defaults>
</compile_context>

<pallas_src>
import jax
import jax.numpy as jnp
import numpy as np
from jax import lax
from jax.experimental import pallas as pl
from jax.experimental.pallas import tpu as pltpu

L1 = 512
L2 = 16
L3 = 32
COUNT = 8
ACC_W = 2 * (L1 + COUNT)          # 1040 accumulator columns
N1 = COUNT * L2                   # 128  l1 outputs (all buckets)
N2 = COUNT * L3                   # 256  l2 outputs (all buckets)


def _round_up(x, m):
    return ((x + m - 1) // m) * m


def nnue_kernel(x_ref, side_ref, w1_ref, b1_ref, w2_ref, b2_ref, wo_ref,
                bo_ref, out_ref):
    tb = x_ref.shape[0]
    x = x_ref[...]                                    # [tb, 1040] f32 (or bf16)
    side = side_ref[...]                              # [tb, 8] f32 (packed)
    ls_i = side[:, 0:1].astype(jnp.int32)             # layer-stack bucket (0..7)
    pq_i = side[:, 1:2].astype(jnp.int32)             # psqt bucket (0..7)
    us = side[:, 2:3].astype(jnp.float32)             # side-to-move

    # ----- l1: bf16 MXU matmul over the raw accumulator layout; the psqt
    # columns (512:520, 1032:1040) hit all-zero weight rows. -----
    xb = x.astype(jnp.bfloat16)
    l1s = jnp.dot(xb, w1_ref[...], preferred_element_type=jnp.float32)   # [tb,128]
    l1y = jnp.clip(l1s + b1_ref[...], 0.0, 1.0)

    # ----- l2 / output: block-diagonal weights keep the 8 buckets fully
    # independent, so no per-lane bucket masking is needed here. -----
    l2s = jnp.dot(l1y.astype(jnp.bfloat16), w2_ref[...],
                  preferred_element_type=jnp.float32)                    # [tb,256]
    l2y = jnp.clip(l2s + b2_ref[...], 0.0, 1.0)

    l3s = jnp.dot(l2y.astype(jnp.bfloat16), wo_ref[...],
                  preferred_element_type=jnp.float32)                    # [tb,8]

    # ----- bucket select as an 8-lane one-hot reduce -----
    lane8 = lax.broadcasted_iota(jnp.int32, (tb, COUNT), 1)
    net = jnp.sum(jnp.where(lane8 == ls_i, l3s + bo_ref[...], 0.0),
                  axis=-1, keepdims=True)                                # [tb,1]

    # ----- psqt gather (torch.gather along dim=1) as one-hot reduce, in f32 -----
    wpsqt = x[:, L1:L1 + COUNT].astype(jnp.float32)                      # [tb,8]
    bpsqt = x[:, 2 * L1 + COUNT:2 * L1 + 2 * COUNT].astype(jnp.float32)  # [tb,8]
    psqt = jnp.sum(jnp.where(lane8 == pq_i, wpsqt - bpsqt, 0.0),
                   axis=-1, keepdims=True)                               # [tb,1]

    final = net + psqt * (us - 0.5)
    out_ref[...] = jnp.broadcast_to(final, (tb, COUNT))


def mynnue_forward(accum, params, psqt_indices=None, layer_stack_indices=None,
                   us=None, piece_count=None, tile_b=2048):
    accum = jnp.asarray(accum)
    # Accept f32 (cast to bf16 happens inside the kernel) or producer-side bf16.
    if accum.dtype != jnp.bfloat16 and accum.dtype != jnp.float32:
        accum = accum.astype(jnp.float32)
    B = accum.shape[0]

    # ---- tiny side-channel prep: pack (ls_idx, psqt_idx, us) into [B, 8] ----
    # (indices are 0..7 << 2^24, so the f32 round-trip is exact)
    if psqt_indices is None:
        if piece_count is None:
            piece_count = 32
        psqt_idx = jnp.full((B,), (piece_count - 1) // 4, jnp.int32)
    elif isinstance(psqt_indices, int):
        psqt_idx = jnp.full((B,), psqt_indices, jnp.int32)
    else:
        psqt_idx = jnp.asarray(psqt_indices, jnp.int32).reshape(B)
    if layer_stack_indices is None:
        ls_idx = jnp.zeros((B,), jnp.int32)
    else:
        ls_idx = jnp.asarray(layer_stack_indices, jnp.int32).reshape(B)
    if us is None:
        us_ = jnp.full((B,), 0.5, jnp.float32)
    else:
        us_ = jnp.asarray(us, jnp.float32).reshape(B)
    side = jnp.concatenate(
        [ls_idx.astype(jnp.float32)[:, None],
         psqt_idx.astype(jnp.float32)[:, None],
         us_[:, None],
         jnp.zeros((B, COUNT - 3), jnp.float32)], axis=1)               # [B, 8]

    # ---- one-time weight re-layout (cache these in production) ----
    w1t = jnp.asarray(params["w1"], jnp.float32).T.astype(jnp.bfloat16)  # [1024,128]
    w1_full = jnp.zeros((ACC_W, N1), jnp.bfloat16)                       # [1040,128]
    w1_full = w1_full.at[:L1].set(w1t[:L1])                              # white main
    w1_full = w1_full.at[L1 + COUNT:2 * L1 + COUNT].set(w1t[L1:])        # black main
    b1 = jnp.asarray(params["b1"], jnp.float32).reshape(1, N1)
    w2 = jnp.asarray(params["w2"], jnp.float32)                          # [256, 16]
    w2_bd = jax.scipy.linalg.block_diag(                                 # exact zeros
        *[w2[g * L3:(g + 1) * L3, :].T for g in range(COUNT)]            #  off-block
    ).astype(jnp.bfloat16)                                               # [128, 256]
    b2 = jnp.asarray(params["b2"], jnp.float32).reshape(1, N2)
    wo = jnp.asarray(params["wo"], jnp.float32)                          # [8, 32]
    wo_bd = jax.scipy.linalg.block_diag(
        *[wo[g].reshape(L3, 1) for g in range(COUNT)]).astype(jnp.bfloat16)  # [256, 8]
    bo = jnp.asarray(params["bo"], jnp.float32).reshape(1, COUNT)

    # ---- batch tiling: no padded copy, >= 2 grid steps when B allows it ----
    tile_b = min(int(tile_b), max(16, _round_up(pl.cdiv(B, 2), 16)))
    tile_b = max(16, _round_up(tile_b, 16))
    grid = (pl.cdiv(B, tile_b),)

    itemsize = int(np.dtype(accum.dtype).itemsize)
    flops = 2 * B * (ACC_W * N1 + N1 * N2 + N2 * COUNT)
    bytes_accessed = (B * (ACC_W * itemsize + COUNT * 4 + COUNT * 4)
                      + ACC_W * N1 * 2 + N1 * 4 + N1 * N2 * 2 + N2 * 4
                      + N2 * COUNT * 2 + COUNT * 4)

    out = pl.pallas_call(
        nnue_kernel,
        out_shape=jax.ShapeDtypeStruct((B, COUNT), jnp.float32),
        grid=grid,
        in_specs=[
            pl.BlockSpec((tile_b, ACC_W), lambda i: (i, 0)),   # accum tile (raw dtype)
            pl.BlockSpec((tile_b, COUNT), lambda i: (i, 0)),   # packed side info
            pl.BlockSpec((ACC_W, N1), lambda i: (0, 0)),       # resident weights:
            pl.BlockSpec((1, N1), lambda i: (0, 0)),
            pl.BlockSpec((N1, N2), lambda i: (0, 0)),
            pl.BlockSpec((1, N2), lambda i: (0, 0)),
            pl.BlockSpec((N2, COUNT), lambda i: (0, 0)),
            pl.BlockSpec((1, COUNT), lambda i: (0, 0)),
        ],
        out_specs=pl.BlockSpec((tile_b, COUNT), lambda i: (i, 0)),
        compiler_params=pltpu.CompilerParams(
            dimension_semantics=("parallel",),
            vmem_limit_bytes=48 * 1024 * 1024),
        cost_estimate=pl.CostEstimate(
            flops=flops, transcendentals=0, bytes_accessed=bytes_accessed),
    )(accum, side, w1_full, b1, w2_bd, b2, wo_bd, bo)
    return out[:, :1]


def mynnue_reference(accum, params, psqt_indices, layer_stack_indices, us,
                     match_bf16=False):
    """Pure-JAX reference mirroring the PyTorch forward.

    match_bf16=True applies the same bf16 quantization points as the kernel
    (accum + all weights at the dot inputs, f32 elsewhere, psqt kept f32);
    False is the exact f32 module math.
    """
    accum = jnp.asarray(accum, jnp.float32)
    w1 = jnp.asarray(params["w1"], jnp.float32)
    w2 = jnp.asarray(params["w2"], jnp.float32)
    wo = jnp.asarray(params["wo"], jnp.float32)
    B = accum.shape[0]
    w_side, b_side = accum[:, :L1 + COUNT], accum[:, L1 + COUNT:]
    w_main, w_psqt = w_side[:, :L1], w_side[:, L1:]
    b_main, b_psqt = b_side[:, :L1], b_side[:, L1:]
    x = jnp.concatenate([w_main, b_main], axis=1)

    def q(a):
        return a.astype(jnp.bfloat16).astype(jnp.float32) if match_bf16 else a

    ls = jnp.asarray(layer_stack_indices, jnp.int32)
    pq = jnp.asarray(psqt_indices, jnp.int32)
    rows = jnp.arange(B)
    hp = lax.Precision.HIGHEST

    l1s = jnp.dot(q(x), q(w1).T, precision=hp) + params["b1"]
    l1y = jnp.clip(l1s.reshape(B, COUNT, L2)[rows, ls], 0.0, 1.0)
    l2s = jnp.dot(q(l1y), q(w2).T, precision=hp) + params["b2"]
    l2y = jnp.clip(l2s.reshape(B, COUNT, L3)[rows, ls], 0.0, 1.0)
    l3s = jnp.dot(q(l2y), q(wo).T, precision=hp) + params["bo"]
    net_out = l3s.reshape(B, COUNT, 1)[rows, ls]

    wpsqt = w_psqt[rows, pq][:, None]   # psqt term is f32 in the kernel too
    bpsqt = b_psqt[rows, pq][:, None]
    us_ = jnp.asarray(us, jnp.float32).reshape(B, 1)
    return net_out + (wpsqt - bpsqt) * (us_ - 0.5)


def init_params(key):
    k1, k2, k3, k4, k5, k6 = jax.random.split(key, 6)

    def lin(kw, kb, fan_out, fan_in):
        bound = 1.0 / np.sqrt(fan_in)
        w = jax.random.uniform(kw, (fan_out, fan_in), jnp.float32, -bound, bound)
        b = jax.random.uniform(kb, (fan_out,), jnp.float32, -bound, bound)
        return w, b

    w1, b1 = lin(k1, k2, L2 * COUNT, 2 * L1)
    w2, b2 = lin(k3, k4, L3 * COUNT, L2)
    wo, bo = lin(k5, k6, 1 * COUNT, L3)
    return {"w1": w1, "b1": b1, "w2": w2, "b2": b2, "wo": wo, "bo": bo}


if __name__ == "__main__":
    B = 300                       # not a tile multiple -> exercises partial-block path
    key = jax.random.PRNGKey(0)
    kp, ka, kl, ku = jax.random.split(key, 4)

    params = init_params(kp)
    accum = jax.random.uniform(ka, (B, ACC_W), jnp.float32, -1.0, 1.0)
    layer_stack_indices = jax.random.randint(kl, (B,), 0, COUNT, jnp.int32)
    us = jax.random.randint(ku, (B,), 0, 2, jnp.int32).astype(jnp.float32)

    # small demo tile so the grid has several steps; default tile_b=2048 for prod
    out = mynnue_forward(accum, params, psqt_indices=None,
                         layer_stack_indices=layer_stack_indices, us=us,
                         piece_count=None, tile_b=128)
    out = jax.block_until_ready(out)
    assert out.shape == (B, 1)

    # psqt_indices=None, piece_count=None -> default bucket (32 - 1) // 4 = 7
    psqt_indices = jnp.full((B,), 7, jnp.int32)
    ref_q = mynnue_reference(accum, params, psqt_indices, layer_stack_indices,
                             us, match_bf16=True)
    ref_f = mynnue_reference(accum, params, psqt_indices, layer_stack_indices,
                             us, match_bf16=False)
    np.testing.assert_allclose(np.asarray(out), np.asarray(ref_q),
                               rtol=1e-2, atol=5e-3)
    np.testing.assert_allclose(np.asarray(out), np.asarray(ref_f),
                               rtol=3e-2, atol=3e-2)
    print("KERNEL_OK")
</pallas_src>

<mosaic_0001>
module attributes {stable_mosaic.version = 11 : i64} {
  func.func @nnue_kernel(%arg0: i32, %arg1: memref<128x1040xf32, #tpu.memory_space<vmem>>, %arg2: memref<128x8xf32, #tpu.memory_space<vmem>>, %arg3: memref<1040x128xbf16, #tpu.memory_space<vmem>>, %arg4: memref<1x128xf32, #tpu.memory_space<vmem>>, %arg5: memref<128x256xbf16, #tpu.memory_space<vmem>>, %arg6: memref<1x256xf32, #tpu.memory_space<vmem>>, %arg7: memref<256x8xbf16, #tpu.memory_space<vmem>>, %arg8: memref<1x8xf32, #tpu.memory_space<vmem>>, %arg9: memref<128x8xf32, #tpu.memory_space<vmem>>) attributes {dimension_semantics = [#tpu.dimension_semantics<parallel>], iteration_bounds = array<i64: 3>, scalar_prefetch = 0 : i64, scratch_operands = 0 : i64, tpu.core_type = #tpu.core_type<tc>, window_params = [{transform_indices = @transform_0, window_bounds = array<i64: 128, 1040>}, {transform_indices = @transform_1, window_bounds = array<i64: 128, 8>}, {pipeline_mode = #tpu.pipeline_mode<synchronous>, transform_indices = @transform_2, window_bounds = array<i64: 1040, 128>}, {pipeline_mode = #tpu.pipeline_mode<synchronous>, transform_indices = @transform_3, window_bounds = array<i64: 1, 128>}, {pipeline_mode = #tpu.pipeline_mode<synchronous>, transform_indices = @transform_4, window_bounds = array<i64: 128, 256>}, {pipeline_mode = #tpu.pipeline_mode<synchronous>, transform_indices = @transform_5, window_bounds = array<i64: 1, 256>}, {pipeline_mode = #tpu.pipeline_mode<synchronous>, transform_indices = @transform_6, window_bounds = array<i64: 256, 8>}, {pipeline_mode = #tpu.pipeline_mode<synchronous>, transform_indices = @transform_7, window_bounds = array<i64: 1, 8>}, {transform_indices = @transform_8, window_bounds = array<i64: 128, 8>}]} {
    %c0 = arith.constant 0 : index
    %c0_0 = arith.constant 0 : index
    %0 = vector.load %arg1[%c0, %c0_0] : memref<128x1040xf32, #tpu.memory_space<vmem>>, vector<128x1040xf32>
    %c0_1 = arith.constant 0 : index
    %c0_2 = arith.constant 0 : index
    %1 = vector.load %arg2[%c0_1, %c0_2] : memref<128x8xf32, #tpu.memory_space<vmem>>, vector<128x8xf32>
    %2 = vector.extract_strided_slice %1 {offsets = [0, 0], sizes = [128, 1], strides = [1, 1]} : vector<128x8xf32> to vector<128x1xf32>
    %3 = arith.fptosi %2 : vector<128x1xf32> to vector<128x1xi32>
    %4 = vector.extract_strided_slice %1 {offsets = [0, 1], sizes = [128, 1], strides = [1, 1]} : vector<128x8xf32> to vector<128x1xf32>
    %5 = arith.fptosi %4 : vector<128x1xf32> to vector<128x1xi32>
    %6 = vector.extract_strided_slice %1 {offsets = [0, 2], sizes = [128, 1], strides = [1, 1]} : vector<128x8xf32> to vector<128x1xf32>
    %7 = arith.truncf %0 : vector<128x1040xf32> to vector<128x1040xbf16>
    %c0_3 = arith.constant 0 : index
    %c0_4 = arith.constant 0 : index
    %8 = vector.load %arg3[%c0_3, %c0_4] : memref<1040x128xbf16, #tpu.memory_space<vmem>>, vector<1040x128xbf16>
    %cst = arith.constant dense<0.000000e+00> : vector<128x128xf32>
    %9 = tpu.matmul %7, %8, %cst {dimension_numbers = #tpu.dot_dimension_numbers<[1], [0], [0], [1], [0, 0, 1, 1], [], []>} : vector<128x1040xbf16>, vector<1040x128xbf16>, vector<128x128xf32> -> vector<128x128xf32>
    %c0_5 = arith.constant 0 : index
    %c0_6 = arith.constant 0 : index
    %10 = vector.load %arg4[%c0_5, %c0_6] : memref<1x128xf32, #tpu.memory_space<vmem>>, vector<1x128xf32>
    %11 = vector.broadcast %10 : vector<1x128xf32> to vector<128x128xf32>
    %12 = arith.addf %9, %11 : vector<128x128xf32>
    %cst_7 = arith.constant 0.000000e+00 : f32
    %cst_8 = arith.constant 1.000000e+00 : f32
    %13 = vector.broadcast %cst_7 : f32 to vector<128x128xf32>
    %14 = arith.maximumf %13, %12 : vector<128x128xf32>
    %15 = vector.broadcast %cst_8 : f32 to vector<128x128xf32>
    %16 = arith.minimumf %15, %14 : vector<128x128xf32>
    %17 = arith.truncf %16 : vector<128x128xf32> to vector<128x128xbf16>
    %c0_9 = arith.constant 0 : index
    %c0_10 = arith.constant 0 : index
    %18 = vector.load %arg5[%c0_9, %c0_10] : memref<128x256xbf16, #tpu.memory_space<vmem>>, vector<128x256xbf16>
    %cst_11 = arith.constant dense<0.000000e+00> : vector<128x256xf32>
    %19 = tpu.matmul %17, %18, %cst_11 {dimension_numbers = #tpu.dot_dimension_numbers<[1], [0], [0], [1], [0, 0, 1, 1], [], []>} : vector<128x128xbf16>, vector<128x256xbf16>, vector<128x256xf32> -> vector<128x256xf32>
    %c0_12 = arith.constant 0 : index
    %c0_13 = arith.constant 0 : index
    %20 = vector.load %arg6[%c0_12, %c0_13] : memref<1x256xf32, #tpu.memory_space<vmem>>, vector<1x256xf32>
    %21 = vector.broadcast %20 : vector<1x256xf32> to vector<128x256xf32>
    %22 = arith.addf %19, %21 : vector<128x256xf32>
    %cst_14 = arith.constant 0.000000e+00 : f32
    %cst_15 = arith.constant 1.000000e+00 : f32
    %23 = vector.broadcast %cst_14 : f32 to vector<128x256xf32>
    %24 = arith.maximumf %23, %22 : vector<128x256xf32>
    %25 = vector.broadcast %cst_15 : f32 to vector<128x256xf32>
    %26 = arith.minimumf %25, %24 : vector<128x256xf32>
    %27 = arith.truncf %26 : vector<128x256xf32> to vector<128x256xbf16>
    %c0_16 = arith.constant 0 : index
    %c0_17 = arith.constant 0 : index
    %28 = vector.load %arg7[%c0_16, %c0_17] : memref<256x8xbf16, #tpu.memory_space<vmem>>, vector<256x8xbf16>
    %cst_18 = arith.constant dense<0.000000e+00> : vector<128x8xf32>
    %29 = tpu.matmul %27, %28, %cst_18 {dimension_numbers = #tpu.dot_dimension_numbers<[1], [0], [0], [1], [0, 0, 1, 1], [], []>} : vector<128x256xbf16>, vector<256x8xbf16>, vector<128x8xf32> -> vector<128x8xf32>
    %30 = tpu.iota {dimensions = array<i32: 1>} : vector<128x8xi32>
    %31 = vector.broadcast %3 : vector<128x1xi32> to vector<128x8xi32>
    %32 = arith.cmpi eq, %30, %31 : vector<128x8xi32>
    %c0_19 = arith.constant 0 : index
    %c0_20 = arith.constant 0 : index
    %33 = vector.load %arg8[%c0_19, %c0_20] : memref<1x8xf32, #tpu.memory_space<vmem>>, vector<1x8xf32>
    %34 = vector.broadcast %33 : vector<1x8xf32> to vector<128x8xf32>
    %35 = arith.addf %29, %34 : vector<128x8xf32>
    %cst_21 = arith.constant 0.000000e+00 : f32
    %36 = vector.broadcast %cst_21 : f32 to vector<128x8xf32>
    %37 = arith.select %32, %35, %36 : vector<128x8xi1>, vector<128x8xf32>
    %cst_22 = arith.constant dense<0.000000e+00> : vector<128xf32>
    %38 = vector.multi_reduction <add>, %37, %cst_22 [1] : vector<128x8xf32> to vector<128xf32>
    %39 = vector.shape_cast %38 : vector<128xf32> to vector<128x1xf32>
    %40 = vector.extract_strided_slice %0 {offsets = [0, 512], sizes = [128, 8], strides = [1, 1]} : vector<128x1040xf32> to vector<128x8xf32>
    %41 = vector.extract_strided_slice %0 {offsets = [0, 1032], sizes = [128, 8], strides = [1, 1]} : vector<128x1040xf32> to vector<128x8xf32>
    %42 = vector.broadcast %5 : vector<128x1xi32> to vector<128x8xi32>
    %43 = arith.cmpi eq, %30, %42 : vector<128x8xi32>
    %44 = arith.subf %40, %41 : vector<128x8xf32>
    %cst_23 = arith.constant 0.000000e+00 : f32
    %45 = vector.broadcast %cst_23 : f32 to vector<128x8xf32>
    %46 = arith.select %43, %44, %45 : vector<128x8xi1>, vector<128x8xf32>
    %cst_24 = arith.constant dense<0.000000e+00> : vector<128xf32>
    %47 = vector.multi_reduction <add>, %46, %cst_24 [1] : vector<128x8xf32> to vector<128xf32>
    %48 = vector.shape_cast %47 : vector<128xf32> to vector<128x1xf32>
    %cst_25 = arith.constant 5.000000e-01 : f32
    %49 = vector.broadcast %cst_25 : f32 to vector<128x1xf32>
    %50 = arith.subf %6, %49 : vector<128x1xf32>
    %51 = arith.mulf %48, %50 : vector<128x1xf32>
    %52 = arith.addf %39, %51 : vector<128x1xf32>
    %53 = vector.shape_cast %52 : vector<128x1xf32> to vector<128x1xf32>
    %54 = vector.broadcast %53 : vector<128x1xf32> to vector<128x8xf32>
    %c0_26 = arith.constant 0 : index
    %c0_27 = arith.constant 0 : index
    %55 = vector.load %arg9[%c0_26, %c0_27] : memref<128x8xf32, #tpu.memory_space<vmem>>, vector<128x8xf32>
    tpu.vector_store %arg9[%c0_26, %c0_27], %54 {strides = array<i32>} : memref<128x8xf32, #tpu.memory_space<vmem>>, vector<128x8xf32>,
    return
  }
  func.func @transform_0(%arg0: i32) -> (i32, i32) {
    %c0_i32 = arith.constant 0 : i32
    %c0_i32_0 = arith.constant 0 : i32
    return %arg0, %c0_i32 : i32, i32
  }
  func.func @transform_1(%arg0: i32) -> (i32, i32) {
    %c0_i32 = arith.constant 0 : i32
    %c0_i32_0 = arith.constant 0 : i32
    return %arg0, %c0_i32 : i32, i32
  }
  func.func @transform_2(%arg0: i32) -> (i32, i32) {
    %c0_i32 = arith.constant 0 : i32
    %c0_i32_0 = arith.constant 0 : i32
    %c0_i32_1 = arith.constant 0 : i32
    return %c0_i32, %c0_i32_0 : i32, i32
  }
  func.func @transform_3(%arg0: i32) -> (i32, i32) {
    %c0_i32 = arith.constant 0 : i32
    %c0_i32_0 = arith.constant 0 : i32
    %c0_i32_1 = arith.constant 0 : i32
    return %c0_i32, %c0_i32_0 : i32, i32
  }
  func.func @transform_4(%arg0: i32) -> (i32, i32) {
    %c0_i32 = arith.constant 0 : i32
    %c0_i32_0 = arith.constant 0 : i32
    %c0_i32_1 = arith.constant 0 : i32
    return %c0_i32, %c0_i32_0 : i32, i32
  }
  func.func @transform_5(%arg0: i32) -> (i32, i32) {
    %c0_i32 = arith.constant 0 : i32
    %c0_i32_0 = arith.constant 0 : i32
    %c0_i32_1 = arith.constant 0 : i32
    return %c0_i32, %c0_i32_0 : i32, i32
  }
  func.func @transform_6(%arg0: i32) -> (i32, i32) {
    %c0_i32 = arith.constant 0 : i32
    %c0_i32_0 = arith.constant 0 : i32
    %c0_i32_1 = arith.constant 0 : i32
    return %c0_i32, %c0_i32_0 : i32, i32
  }
  func.func @transform_7(%arg0: i32) -> (i32, i32) {
    %c0_i32 = arith.constant 0 : i32
    %c0_i32_0 = arith.constant 0 : i32
    %c0_i32_1 = arith.constant 0 : i32
    return %c0_i32, %c0_i32_0 : i32, i32
  }
  func.func @transform_8(%arg0: i32) -> (i32, i32) {
    %c0_i32 = arith.constant 0 : i32
    %c0_i32_0 = arith.constant 0 : i32
    return %arg0, %c0_i32 : i32, i32
  }
}

</mosaic_0001>

<bundles_post_ra>
// kernel: tpu_custom_call.1
= control target key start
LH: loop header
LB: loop body
LE: loop exit
PB: predicated region body
PF: predicated region fallthrough
CT: control target
= control target key end

     0   :  { %s5519_s0 = inlined_call_operand.hbm [shape: f32[300,1040], index: 0, kind: input, shape index: {}]   ;;  %s5520_s1 = inlined_call_operand.vmem [shape: f32[300,8], index: 1, kind: input, shape index: {}]   ;;  %s5521_s2 = inlined_call_operand.hbm [shape: bf16[1040,128], index: 2, kind: input, shape index: {}]   ;;  %s5522_s3 = inlined_call_operand.hbm [shape: f32[1,128], index: 3, kind: input, shape index: {}]   ;;  %s5523_s4 = inlined_call_operand.hbm [shape: bf16[128,256], index: 4, kind: input, shape index: {}]   ;;  %s5524_s5 = inlined_call_operand.hbm [shape: f32[1,256], index: 5, kind: input, shape index: {}]   ;;  %s5525_s6 = inlined_call_operand.vmem [shape: bf16[256,8], index: 6, kind: input, shape index: {}]   ;;  %s5526_s7 = inlined_call_operand.hbm [shape: f32[1,8], index: 7, kind: input, shape index: {}]   ;;  %s5527_s8 = inlined_call_operand.vmem [shape: f32[300,8], index: 8, kind: output, shape index: {}]  }
   0x1   :  { %5533 = sst [smem:[#allocation19_spill]] %s5521_s2 }
   0x2   :  { %5534 = sst [smem:[#allocation20_spill]] %s5527_s8 }
   0x3   :  { %13 = vsyncpa [#allocation3], 0 }
   0x4   :  { %15 = vsyncpa [#allocation3 + $0x1], 0 }
   0x5   :  { %16 = vsyncpa [#allocation5], 0 }
   0x6   :  { %17 = vsyncpa [#allocation8], 0 }
   0x7   :  { %18 = vsyncpa [#allocation11], 0  ;;  %s4359_s27 = smov 0   ;;  %s4361_s28 = smov 0  }
   0x8   :  { %s4363_s29 = smov 0   ;;  %s4365_s30 = smov 0  }
   0x9 LB: > { %s4378_s9 = sadd.s32 4294967295, %s4264_s30   ;;  %s4381_s10 = sadd.s32 1, %s4264_s30   ;;  %s4264_s30 = sphi %s4365_s30, %s5558_s30   ;;  %s4260_s29 = sphi %s4363_s29, %s5562_s29   ;;  %s4256_s28 = sphi %s4361_s28, %s5561_s28   ;;  %s4252_s27 = sphi %s4359_s27, %s5560_s27  }
   0xa   : > { %5535 = sst [smem:[#allocation17_spill]] %s4381_s10  ;;  %s28_s11 = ssub.s32 %s4264_s30, %s4381_s10 }
   0xb   : > { %s31_s12 = sadd.s32 1, %s4260_s29  ;;  %p29_p0 = scmp.eq.s32.totalorder %s28_s11, 0 }
   0xc   : > { %p38_p1 = scmp.ne.s32.totalorder %s4260_s29, %s4256_s28  ;;  %p39_p2 = scmp.eq.s32.totalorder %s4264_s30, 0 }
   0xd   : > { %p44_p3 = scmp.ne.s32.totalorder %s4256_s28, %s4252_s27  ;;  %p5528_p5 = scmp.eq.s32.totalorder %s4378_s9, 0 }
   0xe   : > { %s4391_s13 = scalar_select %p29_p0, %s4260_s29, %s31_s12  }
   0xf   : > { %p4393_p4 = por %p39_p2, %p38_p1  ;;  %p220_p6 = scmp.eq.s32.totalorder %s4378_s9, 2 }
  0x10   : > { %5536 = sst [smem:[#allocation18_spill]] %s4391_s13  ;;  %p3137_p7 = scmp.ge.s32.totalorder %s4264_s30, 1 }
  0x11   : > { %s5537_s14 = scalar_select %p4393_p4, 1, 0 }
  0x12   : > { %p4402_p8 = por %p5528_p5, %p44_p3  ;;  %p233_p9 = scmp.lt.s32.totalorder %s4264_s30, 4 }
  0x13   : > { %p4407_p10 = por %p220_p6, %p38_p1  ;;  %s4298_s18 = smov [#allocation4]  }
  0x14   : > { %s5538_s15 = scalar_select %p4402_p8, 1, 0 }
  0x15   : > { %s5539_s16 = scalar_select %p4407_p10, 1, 0 }
  0x16   : > { %p4411_p11 = pnand %p3137_p7, %p233_p9  ;;  %s245_s19 = sshll.u32 %s4298_s18, 4  ;;  %s246_s19 = int_to_ptr.vmem [resolvable:$true] %s245_s19 }
  0x17   : > { %s4299_s21 = smov [#allocation7]   ;;  %s5542_s2 = sld [smem:[#allocation19_spill]] }
  0x18   : > { %s5540_s17 = scalar_select %p4411_p11, 1, 0 }
  0x19   : > { %p3722_p12 = pneg %p4411_p11  ;;  %s269_s22 = sshll.u32 %s4299_s21, 4  ;;  %s4423_s22 = int_to_ptr.vmem [resolvable:$true] %s269_s22 }
  0x1b   : > { %p4419_p13 = pnand %p3722_p12, %p5528_p5 }
  0x1d   : > { %s4018_s25 = scalar_lea.hbm %s5542_s2, 8320  ;;  %p4433_p1 = pneg %p4419_p13 }
  0x1e   : > { %p4019_p0 = scmp.ne.s32.totalorder %s5542_s2, %s4018_s25  ;;  %p4025_p6 = scmp.lt.u32.totalorder %s4018_s25, %s5542_s2 }
  0x20   : > { %p4021_p2 = pnand %p4433_p1, %p4019_p0 }
  0x22   : > { %p4022_p3 = pneg %p4021_p2 }
  0x24   : > { %p4027_p7 = pnand %p4025_p6, %p4022_p3 }
  0x26   : > { %4030 = shalt.err (!%p4027_p7)
}
  0x27   : > { %s4031_s21 = scalar_lea.vmem %s246_s19, 8320  ;;  %p4039_p10 = scmp.lt.s32.totalorder %s246_s19, %s246_s19 }
  0x28   : > { %p4032_p9 = scmp.ne.s32.totalorder %s246_s19, %s4031_s21  ;;  %p4040_p8 = scmp.lt.s32.totalorder %s4031_s21, %s4031_s21 }
  0x2a   : > { %p4034_p12 = pnand %p4032_p9, %p4433_p1  ;;  %p4041_p11 = por %p4040_p8, %p4039_p10 }
  0x2c   : > { %p4035_p5 = pneg %p4034_p12 }
  0x2e   : > { %p4042_p4 = pnand %p4041_p11, %p4035_p5 }
  0x30   : > { %4045 = shalt.err (!%p4042_p4)
}
  0x31   : > { %s4300_s23 = smov 64   ;;  %s4301_s24 = smov 4  }
  0x32   : > { %3725 = dma.hbm_to_vmem [thread:$0]  (!%p4419_p13), %s5542_s2, 8320, %s246_s19, [#allocation5], %s4300_s23, %s4300_s23, %s4301_s24  }
  0x33   : > { %s4046_s18 = scalar_lea.hbm %s5523_s4, 2048 }
  0x34   : > { %p4047_p0 = scmp.ne.s32.totalorder %s5523_s4, %s4046_s18  ;;  %p4053_p8 = scmp.lt.u32.totalorder %s4046_s18, %s5523_s4 }
  0x36   : > { %p4049_p5 = pnand %p4047_p0, %p4433_p1 }
  0x38   : > { %p4050_p4 = pneg %p4049_p5 }
  0x3a   : > { %p4055_p10 = pnand %p4053_p8, %p4050_p4 }
  0x3c   : > { %4058 = shalt.err (!%p4055_p10)
}
  0x3d   : > { %s4059_s19 = scalar_lea.vmem %s4423_s22, 2048  ;;  %p4067_p6 = scmp.lt.s32.totalorder %s4423_s22, %s4423_s22 }
  0x3e   : > { %p4060_p11 = scmp.ne.s32.totalorder %s4423_s22, %s4059_s19  ;;  %p4068_p7 = scmp.lt.s32.totalorder %s4059_s19, %s4059_s19 }
  0x40   : > { %p4062_p2 = pnand %p4060_p11, %p4433_p1  ;;  %p4069_p9 = por %p4068_p7, %p4067_p6 }
  0x42   : > { %p4063_p3 = pneg %p4062_p2 }
  0x44   : > { %p4070_p12 = pnand %p4069_p9, %p4063_p3 }
  0x46   : > { %4073 = shalt.err (!%p4070_p12)
}
  0x47   : > { %s4302_s10 = smov 128   ;;  %s4303_s8 = smov 8  }
  0x48   : > { %3731 = dma.hbm_to_vmem [thread:$0]  (!%p4419_p13), %s5523_s4, 2048, %s4423_s22, [#allocation8], %s4302_s10, %s4302_s10, %s4303_s8  }
  0x49   : > { %s4304_s24 = smov [#allocation6]   ;;  %s4305_s25 = smov [#allocation9]  }
  0x4a   : > { %s259_s26 = sshll.u32 %s4304_s24, 4  ;;  %s283_s27 = sshll.u32 %s4305_s25, 4  ;;  %s260_s26 = int_to_ptr.vmem [resolvable:$true] %s259_s26  ;;  %s4472_s27 = int_to_ptr.vmem [resolvable:$true] %s283_s27 }
  0x4b   : > { %s4074_s21 = scalar_lea.hbm %s5522_s3, 16 }
  0x4c   : > { %p4075_p0 = scmp.ne.s32.totalorder %s5522_s3, %s4074_s21  ;;  %p4081_p8 = scmp.lt.u32.totalorder %s4074_s21, %s5522_s3 }
  0x4e   : > { %p4077_p5 = pnand %p4075_p0, %p4433_p1 }
  0x50   : > { %p4078_p4 = pneg %p4077_p5 }
  0x52   : > { %p4083_p10 = pnand %p4081_p8, %p4078_p4 }
  0x54   : > { %4086 = shalt.err (!%p4083_p10)
}
  0x55   : > { %s4087_s10 = scalar_lea.vmem %s260_s26, 16  ;;  %s4094_s8 = scalar_lea.vmem %s260_s26, 32 }
  0x56   : > { %p4088_p11 = scmp.ne.s32.totalorder %s260_s26, %s4087_s10  ;;  %p4095_p6 = scmp.lt.s32.totalorder %s260_s26, %s260_s26 }
  0x57   : > { %p4096_p7 = scmp.lt.s32.totalorder %s4094_s8, %s4087_s10 }
  0x58   : > { %p4090_p2 = pnand %p4088_p11, %p4433_p1 }
  0x59   : > { %p4097_p9 = por %p4096_p7, %p4095_p6 }
  0x5a   : > { %p4091_p3 = pneg %p4090_p2 }
  0x5c   : > { %p4098_p12 = pnand %p4097_p9, %p4091_p3 }
  0x5e   : > { %4101 = shalt.err (!%p4098_p12)
}
  0x5f   : > { %3728 = dma.hbm_to_vmem [thread:$0]  (!%p4419_p13), %s5522_s3, 16, %s260_s26, [#allocation5]  }
  0x60   : > { %s4102_s12 = scalar_lea.hbm %s5524_s5, 32 }
  0x61   : > { %p4103_p0 = scmp.ne.s32.totalorder %s5524_s5, %s4102_s12  ;;  %p4109_p8 = scmp.lt.u32.totalorder %s4102_s12, %s5524_s5 }
  0x63   : > { %p4105_p5 = pnand %p4103_p0, %p4433_p1 }
  0x65   : > { %p4106_p4 = pneg %p4105_p5 }
  0x67   : > { %p4111_p10 = pnand %p4109_p8, %p4106_p4 }
  0x69   : > { %4114 = shalt.err (!%p4111_p10)
}
  0x6a   : > { %s4115_s26 = scalar_lea.vmem %s4472_s27, 32  ;;  %p4123_p6 = scmp.lt.s32.totalorder %s4472_s27, %s4472_s27 }
  0x6b   : > { %p4116_p11 = scmp.ne.s32.totalorder %s4472_s27, %s4115_s26  ;;  %p4124_p7 = scmp.lt.s32.totalorder %s4115_s26, %s4115_s26 }
  0x6d   : > { %p4118_p2 = pnand %p4116_p11, %p4433_p1  ;;  %p4125_p9 = por %p4124_p7, %p4123_p6 }
  0x6f   : > { %p4119_p3 = pneg %p4118_p2 }
  0x71   : > { %p4126_p12 = pnand %p4125_p9, %p4119_p3 }
  0x73   : > { %4129 = shalt.err (!%p4126_p12)
}
  0x74   : > { %3734 = dma.hbm_to_vmem [thread:$0]  (!%p4419_p13), %s5524_s5, 32, %s4472_s27, [#allocation8]  }
  0x75   : > { %s4306_s8 = smov [#allocation10]   ;;  %s4130_s25 = scalar_lea.hbm %s5526_s7, 16 }
  0x76   : > { %s297_s2 = sshll.u32 %s4306_s8, 4  ;;  %p4131_p0 = scmp.ne.s32.totalorder %s5526_s7, %s4130_s25  ;;  %s298_s2 = int_to_ptr.vmem [resolvable:$true] %s297_s2 }
  0x77   : > { %p4137_p8 = scmp.lt.u32.totalorder %s4130_s25, %s5526_s7 }
  0x78   : > { %p4133_p5 = pnand %p4131_p0, %p4433_p1 }
  0x7a   : > { %p4134_p4 = pneg %p4133_p5 }
  0x7c   : > { %p4139_p10 = pnand %p4137_p8, %p4134_p4 }
  0x7e   : > { %4142 = shalt.err (!%p4139_p10)
}
  0x7f   : > { %s4143_s27 = scalar_lea.vmem %s298_s2, 16  ;;  %s4150_s13 = scalar_lea.vmem %s298_s2, 32 }
  0x80   : > { %p4144_p11 = scmp.ne.s32.totalorder %s298_s2, %s4143_s27  ;;  %p4151_p6 = scmp.lt.s32.totalorder %s298_s2, %s298_s2 }
  0x81   : > { %p4152_p7 = scmp.lt.s32.totalorder %s4150_s13, %s4143_s27 }
  0x82   : > { %p4146_p2 = pnand %p4144_p11, %p4433_p1 }
  0x83   : > { %p4153_p9 = por %p4152_p7, %p4151_p6 }
  0x84   : > { %p4147_p3 = pneg %p4146_p2 }
  0x86   : > { %p4154_p12 = pnand %p4153_p9, %p4147_p3 }
  0x88   : > { %4157 = shalt.err (!%p4154_p12)
}
  0x89   : > { %3737 = dma.hbm_to_vmem [thread:$0]  (!%p4419_p13), %s5526_s7, 16, %s298_s2, [#allocation11]  }
  0x8a   : > { %p3143_p0 = scmp.ge.s32.totalorder %s4264_s30, 3 }
  0x8b   : > { %p5544_p5 = scmp.ne.s32.totalorder (!%p3143_p0), %s5537_s14, 0 }
  0x8c   : > { %304 = sbr.rel (%p3143_p0) target bundleno = 183 (0xb7), region = 40 }
  0x93   : > { %307 = sbr.rel (!%p5544_p5) target bundleno = 183 (0xb7), region = 44  ;;  %s308_s11 = sand.u32 (%p5544_p5), 1, %s4260_s29  }
  0x94   : > { %s3144_s10 = sshll.u32 (%p5544_p5), %s4264_s30, 4  ;;  %s3666_s8 = smul.u32 (%p5544_p5), 1152, %s308_s11 }
  0x95   : > { %s314_s23 = ssub.s32 (%p5544_p5), 38, %s3144_s10  ;;  %s4541_s25 = scalar_lea.sflag (%p5544_p5), [#allocation3], %s308_s11 }
  0x96   : > { %p315_p1 = scmp.lt.s32.totalorder (%p5544_p5), %s314_s23, 16  ;;  %s312_s2 = scalar_lea.vmem (%p5544_p5), [#allocation2], %s3666_s8 }
  0x9a   : > { %s5564_s23 = smov (!%p315_p1, %s314_s23), 16 }
  0x9b   : > { %s4538_s24 = smul.u32 1152, %s5564_s23 }
  0x9d   : > { %s320_s20 = ssub.s32 18432, %s4538_s24 }
  0x9e   : > { %321 = vsyncadd %s4541_s25, %s320_s20  ;;  %p3147_p13 = scmp.ne.s32.totalorder %s4538_s24, 0  ;;  %s3667_s14 = smul.u32 18432, %s4264_s30 }
  0x9f   : > { %s327_s12 = sshll.u32 %s312_s2, 4  ;;  %s4162_s30 = scalar_lea.hbm %s5519_s0, 43776  ;;  %s4551_s12 = int_to_ptr.vmem [resolvable:$true] %s327_s12 }
  0xa0   : > { %s4549_s19 = scalar_lea.hbm %s5519_s0, %s3667_s14 }
  0xa1   : > { %s4158_s27 = scalar_lea.hbm %s4549_s19, %s4538_s24  ;;  %p4163_p11 = scmp.lt.u32.totalorder %s4549_s19, %s5519_s0 }
  0xa2   : > { %p4159_p4 = scmp.ne.s32.totalorder %s4549_s19, %s4158_s27  ;;  %p4164_p2 = scmp.lt.u32.totalorder %s4162_s30, %s4158_s27 }
  0xa3   : > { %p4166_p6 = scmp.lt.u32.totalorder %s4158_s27, %s4549_s19 }
  0xa4   : > { %p4160_p8 = pnand %p4159_p4, %p3147_p13  ;;  %p4165_p3 = por %p4164_p2, %p4163_p11 }
  0xa6   : > { %p4161_p10 = pneg %p4160_p8  ;;  %p4167_p7 = por %p4166_p6, %p4165_p3 }
  0xa8   : > { %p4168_p9 = pnand %p4167_p7, %p4161_p10 }
  0xaa   : > { %4171 = shalt.err (!%p4168_p9)
}
  0xab   : > { %s4172_s10 = scalar_lea.vmem %s4551_s12, %s4538_s24  ;;  %s4307_s8 = smov [#allocation2]  }
  0xac   : > { %p4173_p12 = scmp.ne.s32.totalorder %s4551_s12, %s4172_s10  ;;  %s4176_s23 = sshll.u32 %s4307_s8, 4  ;;  %s4177_s23 = int_to_ptr.vmem [resolvable:$false] %s4176_s23 }
  0xad   : > { %s4178_s20 = scalar_lea.vmem %s4177_s23, 36864  ;;  %p4179_p1 = scmp.lt.s32.totalorder %s4551_s12, %s4177_s23 }
  0xae   : > { %p4174_p0 = pnand %p4173_p12, %p3147_p13  ;;  %p4180_p4 = scmp.lt.s32.totalorder %s4178_s20, %s4172_s10 }
  0xb0   : > { %p4175_p5 = pneg %p4174_p0  ;;  %p4181_p8 = por %p4180_p4, %p4179_p1 }
  0xb2   : > { %p4182_p11 = pnand %p4181_p8, %p4175_p5 }
  0xb4   : > { %4185 = shalt.err (!%p4182_p11)
}
  0xb5   : > { %s4308_s2 = smov 1152   ;;  %s4309_s14 = smov 72  }
  0xb6   : > { %333 = dma.hbm_to_vmem [thread:$0]  (%p3147_p13), %s4549_s19, %s4538_s24, %s4551_s12, %s4541_s25, %s4308_s2, %s4308_s2, %s4309_s14  }
  0xb7 PF: > { %p5545_p10 = scmp.ne.s32.totalorder %s5540_s17, 0 }
  0xb8   : > { %s4581_s18 = sand.u32 (!%p5545_p10), 1, %s4256_s28   ;;  %p5546_p2 = scmp.ne.s32.totalorder (!%p5545_p10), %s5538_s15, 0 }
  0xb9   : > { %356 = sbr.rel (%p5545_p10) target bundleno = 1416 (0x588), region = 52  ;;  %s359_s27 = scalar_lea.sflag (!%p5545_p10), [#allocation3], %s4581_s18 }
  0xba   : > { %s3668_s21 = smul.u32 (!%p5545_p10), 1152, %s4581_s18 }
  0xbc   : > { %s4585_s13 = scalar_lea.vmem (!%p5545_p10), [#allocation2], %s3668_s21 }
  0xc0   : > { %4235 = dma.done.wait (%p5546_p2), %s359_s27, 18432  }
  0xc1   : > { %4237 = vsyncadd (%p5546_p2), %s359_s27, 4294948864  ;;  %p5547_p13 = scmp.eq.s32.totalorder %s4378_s9, 0 }
  0xc3   : > { %4239 = dma.done.wait (%p5547_p13), [#allocation5], 8336   ;;  %p5548_p3 = pmov %p5547_p13 }
  0xc5   : > { %4241 = vsyncadd (%p5548_p3), [#allocation5], 4294958960  ;;  %p5549_p6 = pmov %p5548_p3 }
  0xc6   : > { %p5550_p7 = pmov %p5548_p3 }
  0xc7   : > { %4243 = dma.done.wait (%p5549_p6), [#allocation8], 2080  }
  0xc8   : > { %4245 = vsyncadd (%p5550_p7), [#allocation8], 4294965216  ;;  %p5551_p9 = pmov %p5548_p3 }
  0xc9   : > { %p5552_p12 = pmov %p5548_p3 }
  0xca   : > { %4247 = dma.done.wait (%p5551_p9), [#allocation11], 16  }
  0xcb   : > { %4249 = vsyncadd (%p5552_p12), [#allocation11], 4294967280  ;;  %v3865_v0 = vld [vmem:[#allocation4 + $0x40] sm:$0xff]   ;;  %v3869_v4 = vld [vmem:[#allocation4 + $0x48] sm:$0xff]   ;;  %vm1224_vm0 = vcmask 130048   ;;  %s4810_s15 = sshll.u32 %s4378_s9, 4 }
  0xcc   : > { %v3866_v1 = vld [vmem:[#allocation4] sm:$0xff]   ;;  %3303 = vmatprep.subr.bf16.mxu0 %v3865_v0  ;;  %v3870_v5 = vld [vmem:[#allocation4 + $0x8] sm:$0xff]   ;;  %v3873_v8 = vld [vmem:[#allocation4 + $0x50] sm:$0xff]   ;;  %p434_p0 = scmp.lt.s32.totalorder %s4810_s15, 37  ;;  %s4312_s19 = smov 120   ;;  %vm2389_vm3 = vcmask 64512  }
  0xcd   : > { %v3867_v2 = vld [vmem:[#allocation4 + $0xc0] sm:$0xff]   ;;  %3304 = vmatpush3.bf16.msra.mxu0 %v3866_v1  ;;  %v3871_v6 = vld [vmem:[#allocation4 + $0xc8] sm:$0xff]   ;;  %v3874_v9 = vld [vmem:[#allocation4 + $0x10] sm:$0xff]   ;;  %p5553_p5 = scmp.ne.s32.totalorder %s5539_s16, 0 }
  0xce   : > { %v3868_v3 = vld [vmem:[#allocation4 + $0x80] sm:$0xff]   ;;  %3367 = vmatprep.subr.bf16.mxu1 %v3867_v2  ;;  %3305 = vmatprep.subr.bf16.mxu0 %v3869_v4  ;;  %v3872_v7 = vld [vmem:[#allocation4 + $0x88] sm:$0xff]   ;;  %v3875_v10 = vld [vmem:[#allocation4 + $0xd0] sm:$0xff]   ;;  %s435_s30 = scalar_select %p434_p0, %s4810_s15, 37 }
  0xcf   : > { %3368 = vmatpush3.bf16.msra.mxu1 %v3868_v3  ;;  %v3876_v11 = vld [vmem:[#allocation4 + $0x90] sm:$0xff]   ;;  %v3877_v12 = vld [vmem:[#allocation4 + $0x58] sm:$0xff]   ;;  %v3881_v16 = vld [vmem:[#allocation4 + $0x60] sm:$0xff]   ;;  %s5554_s11 = sld [smem:[#allocation20_spill]] (%p5553_p5) }
  0xd0   : > { %3369 = vmatprep.subr.bf16.mxu1 %v3871_v6  ;;  %v3878_v13 = vld [vmem:[#allocation4 + $0x18] sm:$0xff]   ;;  %v3882_v17 = vld [vmem:[#allocation4 + $0x20] sm:$0xff]   ;;  %v3885_v20 = vld [vmem:[#allocation4 + $0x68] sm:$0xff]   ;;  %s3159_s23 = sshll.u32 %s435_s30, 3 }
  0xd1   : > { %3306 = vmatpush3.bf16.msra.mxu0 %v3870_v5  ;;  %v3879_v14 = vld [vmem:[#allocation4 + $0xd8] sm:$0xff]   ;;  %v3883_v18 = vld [vmem:[#allocation4 + $0xe0] sm:$0xff]   ;;  %v3886_v21 = vld [vmem:[#allocation4 + $0x28] sm:$0xff]   ;;  %s4847_s14 = scalar_lea.vmem %s5520_s1, %s3159_s23 }
  0xd2   : > { %3307 = vmatprep.subr.bf16.mxu0 %v3873_v8  ;;  %v3880_v15 = vld [vmem:[#allocation4 + $0x98] sm:$0xff]   ;;  %v3884_v19 = vld [vmem:[#allocation4 + $0xa0] sm:$0xff]   ;;  %v3887_v22 = vld [vmem:[#allocation4 + $0xe8] sm:$0xff]  }
  0xd3   : > { %3370 = vmatpush3.bf16.msra.mxu1 %v3872_v7  ;;  %v3888_v23 = vld [vmem:[#allocation4 + $0xa8] sm:$0xff]   ;;  %v3889_v24 = vld [vmem:[#allocation4 + $0x70] sm:$0xff]   ;;  %v3893_v28 = vld [vmem:[#allocation4 + $0x78] sm:$0xff]  }
  0xd4   : > { %3371 = vmatprep.subr.bf16.mxu1 %v3875_v10  ;;  %v3890_v25 = vld [vmem:[#allocation4 + $0x30] sm:$0xff]   ;;  %v3894_v29 = vld [vmem:[#allocation4 + $0x38] sm:$0xff]   ;;  %v450_v31 = vld [vmem:[%s4585_s13 + $0x8] sm:$0xff] }
  0xd5   : > { %3308 = vmatpush3.bf16.msra.mxu0 %v3874_v9  ;;  %v3891_v26 = vld [vmem:[#allocation4 + $0xf0] sm:$0xff]   ;;  %v3895_v30 = vld [vmem:[#allocation4 + $0xf8] sm:$0xff]   ;;  %v449_v35 = vld [vmem:[%s4585_s13] sm:$0xff] }
  0xd6   : > { %3309 = vmatprep.subr.bf16.mxu0 %v3877_v12  ;;  %v3892_v27 = vld [vmem:[#allocation4 + $0xb0] sm:$0xff]   ;;  %v3896_v34 = vld [vmem:[#allocation4 + $0xb8] sm:$0xff]   ;;  %v458_v36 = vld [vmem:[%s4585_s13 + $0x48] sm:$0xff] }
  0xd7   : > { %3372 = vmatpush3.bf16.msra.mxu1 %v3876_v11  ;;  %v459_v32 = vld [vmem:[%s4585_s13 + $0x50] sm:$0xff]  ;;  %v625_v37 = vpack.c.bf16 %v458_v36, %v449_v35  ;;  %v3897_v38 = vld [vmem:[#allocation4 + $0x140] sm:$0xff]   ;;  %v452_v39 = vld [vmem:[%s4585_s13 + $0x18] sm:$0xff] }
  0xd8   : > { %3373 = vmatprep.subr.bf16.mxu1 %v3879_v14  ;;  %v626_v33 = vpack.c.bf16 %v459_v32, %v450_v31  ;;  %v461_v40 = vld [vmem:[%s4585_s13 + $0x60] sm:$0xff]  ;;  %v451_v43 = vld [vmem:[%s4585_s13 + $0x10] sm:$0xff]  ;;  %v460_v44 = vld [vmem:[%s4585_s13 + $0x58] sm:$0xff] }
  0xd9   : > { %3310 = vmatpush3.bf16.msra.mxu0 %v3878_v13  ;;  %v628_v41 = vpack.c.bf16 %v461_v40, %v452_v39  ;;  %v3898_v42 = vld [vmem:[#allocation4 + $0x100] sm:$0xff]   ;;  %v468_v45 = vld [vmem:[%s4585_s13 + $0x98] sm:$0xff]  ;;  %v627_v46 = vpack.c.bf16 %v460_v44, %v451_v43  ;;  %v467_v48 = vld [vmem:[%s4585_s13 + $0x90] sm:$0xff] }
  0xda   : > { %3311 = vmatprep.subr.bf16.mxu0 %v3881_v16  ;;  %1281 = vmatprep.mubr.bf16.mxu0 %v626_v33  ;;  %v477_v47 = vld [vmem:[%s4585_s13 + $0xe0] sm:$0xff]  ;;  %v476_v49 = vld [vmem:[%s4585_s13 + $0xd8] sm:$0xff]  ;;  %v3899_v51 = vld [vmem:[#allocation4 + $0x148] sm:$0xff]  }
  0xdb   : > { %3374 = vmatpush3.bf16.msra.mxu1 %v3880_v15  ;;  %1378 = vmatprep.mubr.bf16.mxu1 %v628_v41  ;;  %v635_v50 = vpack.c.bf16 %v477_v47, %v468_v45  ;;  %v470_v52 = vld [vmem:[%s4585_s13 + $0xa8] sm:$0xff]  ;;  %v479_v53 = vld [vmem:[%s4585_s13 + $0xf0] sm:$0xff]  ;;  %v634_v54 = vpack.c.bf16 %v476_v49, %v467_v48  ;;  %v469_v57 = vld [vmem:[%s4585_s13 + $0xa0] sm:$0xff] }
  0xdc   : > { %3375 = vmatprep.subr.bf16.mxu1 %v3883_v18  ;;  %v637_v55 = vpack.c.bf16 %v479_v53, %v470_v52  ;;  %v3900_v56 = vld [vmem:[#allocation4 + $0x108] sm:$0xff]   ;;  %v495_v60 = vld [vmem:[%s4585_s13 + $0x170] sm:$0xff]  ;;  %v488_v0 = vld [vmem:[%s4585_s13 + $0x138] sm:$0xff] }
  0xdd   : > { %3312 = vmatpush3.bf16.msra.mxu0 %v3882_v17  ;;  %v478_v58 = vld [vmem:[%s4585_s13 + $0xe8] sm:$0xff]  ;;  %v3901_v63 = vld [vmem:[#allocation4 + $0x150] sm:$0xff]   ;;  %v497_v1 = vld [vmem:[%s4585_s13 + $0x180] sm:$0xff] }
  0xde   : > { %3313 = vmatprep.subr.bf16.mxu0 %v3885_v20  ;;  %v486_v59 = vld [vmem:[%s4585_s13 + $0x128] sm:$0xff]  ;;  %v636_v62 = vpack.c.bf16 %v478_v58, %v469_v57  ;;  %v485_v2 = vld [vmem:[%s4585_s13 + $0x120] sm:$0xff]  ;;  %v646_v4 = vpack.c.bf16 %v497_v1, %v488_v0  ;;  %v3902_v5 = vld [vmem:[#allocation4 + $0x110] sm:$0xff]  }
  0xdf   : > { %3376 = vmatpush3.bf16.msra.mxu1 %v3884_v19  ;;  %v644_v61 = vpack.c.bf16 %v495_v60, %v486_v59  ;;  %v494_v3 = vld [vmem:[%s4585_s13 + $0x168] sm:$0xff]  ;;  %v487_v6 = vld [vmem:[%s4585_s13 + $0x130] sm:$0xff]  ;;  %v504_v7 = vld [vmem:[%s4585_s13 + $0x1b8] sm:$0xff] }
  0xe0   : > { %3377 = vmatprep.subr.bf16.mxu1 %v3887_v22  ;;  %v513_v8 = vld [vmem:[%s4585_s13 + $0x200] sm:$0xff]  ;;  %v496_v9 = vld [vmem:[%s4585_s13 + $0x178] sm:$0xff]  ;;  %v643_v10 = vpack.c.bf16 %v494_v3, %v485_v2  ;;  %v506_v12 = vld [vmem:[%s4585_s13 + $0x1c8] sm:$0xff] }
  0xe1   : > { %3314 = vmatpush3.bf16.msra.mxu0 %v3886_v21  ;;  %v3903_v11 = vld [vmem:[#allocation4 + $0x158] sm:$0xff]   ;;  %v515_v13 = vld [vmem:[%s4585_s13 + $0x210] sm:$0xff]  ;;  %v653_v14 = vpack.c.bf16 %v513_v8, %v504_v7  ;;  %v645_v16 = vpack.c.bf16 %v496_v9, %v487_v6  ;;  %v3905_v19 = vld [vmem:[#allocation4 + $0x160] sm:$0xff]  }
  0xe2   : > { %3315 = vmatprep.subr.bf16.mxu0 %v3889_v24  ;;  %v3904_v15 = vld [vmem:[#allocation4 + $0x118] sm:$0xff]   ;;  %v503_v17 = vld [vmem:[%s4585_s13 + $0x1b0] sm:$0xff]  ;;  %v655_v18 = vpack.c.bf16 %v515_v13, %v506_v12  ;;  %v522_v21 = vld [vmem:[%s4585_s13 + $0x248] sm:$0xff] }
  0xe3   : > { %3378 = vmatpush3.bf16.msra.mxu1 %v3888_v23  ;;  %v512_v20 = vld [vmem:[%s4585_s13 + $0x1f8] sm:$0xff]  ;;  %v505_v22 = vld [vmem:[%s4585_s13 + $0x1c0] sm:$0xff]  ;;  %v514_v23 = vld [vmem:[%s4585_s13 + $0x208] sm:$0xff] }
  0xe4   : > { %3379 = vmatprep.subr.bf16.mxu1 %v3891_v26  ;;  %v531_v24 = vld [vmem:[%s4585_s13 + $0x290] sm:$0xff]  ;;  %v524_v26 = vld [vmem:[%s4585_s13 + $0x258] sm:$0xff]  ;;  %v3908_v31 = vld [vmem:[#allocation4 + $0x180] sm:$0xff]   ;;  %v654_v33 = vpack.c.bf16 %v514_v23, %v505_v22 }
  0xe5   : > { %3316 = vmatpush3.bf16.msra.mxu0 %v3890_v25  ;;  %v3906_v25 = vld [vmem:[#allocation4 + $0x120] sm:$0xff]   ;;  %v3909_v32 = vld [vmem:[#allocation4 + $0x1c8] sm:$0xff]   ;;  %v523_v40 = vld [vmem:[%s4585_s13 + $0x250] sm:$0xff] }
  0xe6   : > { %3317 = vmatprep.subr.bf16.mxu0 %v3893_v28  ;;  %v652_v28 = vpack.c.bf16 %v512_v20, %v503_v17  ;;  %v530_v35 = vld [vmem:[%s4585_s13 + $0x288] sm:$0xff]  ;;  %v532_v41 = vld [vmem:[%s4585_s13 + $0x298] sm:$0xff]  ;;  %v551_v44 = vld [vmem:[%s4585_s13 + $0x330] sm:$0xff] }
  0xe7   : > { %3380 = vmatpush3.bf16.msra.mxu1 %v3892_v27  ;;  %v533_v27 = vld [vmem:[%s4585_s13 + $0x2a0] sm:$0xff]  ;;  %v3911_v39 = vld [vmem:[#allocation4 + $0x168] sm:$0xff]   ;;  %v3913_v47 = vld [vmem:[#allocation4 + $0x1d0] sm:$0xff]  }
  0xe8   : > { %3381 = vmatprep.subr.bf16.mxu1 %v3895_v30  ;;  %v662_v30 = vpack.c.bf16 %v531_v24, %v522_v21  ;;  %v664_v36 = vpack.c.bf16 %v533_v27, %v524_v26  ;;  %v542_v43 = vld [vmem:[%s4585_s13 + $0x2e8] sm:$0xff]  ;;  %v3914_v49 = vld [vmem:[#allocation4 + $0x190] sm:$0xff]   ;;  %v569_v0 = vld [vmem:[%s4585_s13 + $0x3c0] sm:$0xff] }
  0xe9   : > { %3318 = vmatpush3.bf16.msra.mxu0 %v3894_v29  ;;  %v3907_v29 = vld [vmem:[#allocation4 + $0x1c0] sm:$0xff]   ;;  %v3912_v45 = vld [vmem:[#allocation4 + $0x128] sm:$0xff]   ;;  %v539_v52 = vld [vmem:[%s4585_s13 + $0x2d0] sm:$0xff]  ;;  %v673_v53 = vpack.c.bf16 %v551_v44, %v542_v43 }
  0xea   : > { %3431 = vmatprep.subr.bf16.mxu0 %v3897_v38  ;;  %v540_v38 = vld [vmem:[%s4585_s13 + $0x2d8] sm:$0xff]  ;;  %v550_v57 = vld [vmem:[%s4585_s13 + $0x328] sm:$0xff]  ;;  %v567_v59 = vld [vmem:[%s4585_s13 + $0x3b0] sm:$0xff] }
  0xeb   : > { %3382 = vmatpush3.bf16.msra.mxu1 %v3896_v34  ;;  %v521_v34 = vld [vmem:[%s4585_s13 + $0x240] sm:$0xff]  ;;  %v558_v58 = vld [vmem:[%s4585_s13 + $0x368] sm:$0xff]  ;;  %v3917_v60 = vld [vmem:[#allocation4 + $0x170] sm:$0xff]  }
  0xec   : > { %1282 = vmatmul.mubr.bf16.vlgmr.msra.gmra.mrb[0].mxu0 %v625_v37  ;;  %3495 = vmatprep.subr.bf16.mxu1 %v3907_v29  ;;  %v3910_v37 = vld [vmem:[#allocation4 + $0x188] sm:$0xff]   ;;  %v680_v1 = vpack.c.bf16 %v567_v59, %v558_v58  ;;  %v3919_v2 = vld [vmem:[#allocation4 + $0x1e0] sm:$0xff]   ;;  %v576_v9 = vld [vmem:[%s4585_s13 + $0x3f8] sm:$0xff] }
  0xed   : > { %3432 = vmatpush3.bf16.msra.mxu0 %v3898_v42  ;;  %1289 = vmatprep.mubr.bf16.mxu0 %v635_v50  ;;  %v549_v42 = vld [vmem:[%s4585_s13 + $0x320] sm:$0xff]  ;;  %v3915_v50 = vld [vmem:[#allocation4 + $0x1d8] sm:$0xff]   ;;  %v3921_v6 = vld [vmem:[#allocation4 + $0x1e8] sm:$0xff]  }
  0xee   : > { %1379 = vmatmul.mubr.bf16.vlgmr.msra.gmra.mrb[0].mxu1 %v627_v46  ;;  %3433 = vmatprep.subr.bf16.mxu0 %v3899_v51  ;;  %v661_v46 = vpack.c.bf16 %v530_v35, %v521_v34  ;;  %v671_v48 = vpack.c.bf16 %v549_v42, %v540_v38  ;;  %v663_v51 = vpack.c.bf16 %v532_v41, %v523_v40  ;;  %v3920_v3 = vld [vmem:[#allocation4 + $0x1a0] sm:$0xff]   ;;  %v566_v7 = vld [vmem:[%s4585_s13 + $0x3a8] sm:$0xff]  ;;  %v3923_v12 = vld [vmem:[#allocation4 + $0x178] sm:$0xff]  }
  0xef   : > { %1386 = vmatprep.mubr.bf16.mxu1 %v637_v55  ;;  %3496 = vmatpush3.bf16.msra.mxu1 %v3908_v31  ;;  %v548_v55 = vld [vmem:[%s4585_s13 + $0x318] sm:$0xff]  ;;  %v559_v13 = vld [vmem:[%s4585_s13 + $0x370] sm:$0xff]  ;;  %v462_v40 = vld [vmem:[%s4585_s13 + $0x68] sm:$0xff] }
  0xf0   : > { %3497 = vmatprep.subr.bf16.mxu1 %v3909_v32  ;;  %v3924_v17 = vld [vmem:[#allocation4 + $0x138] sm:$0xff]   ;;  %v3925_v20 = vld [vmem:[#allocation4 + $0x1f0] sm:$0xff]   ;;  %v577_v32 = vld [vmem:[%s4585_s13 + $0x400] sm:$0xff] }
  0xf1   : > { %3434 = vmatpush3.bf16.msra.mxu0 %v3900_v56  ;;  %v541_v56 = vld [vmem:[%s4585_s13 + $0x2e0] sm:$0xff]  ;;  %v3926_v22 = vld [vmem:[#allocation4 + $0x1b0] sm:$0xff]   ;;  %v584_v24 = vld [vmem:[%s4585_s13 + $0x438] sm:$0xff] }
  0xf2   : > { %3435 = vmatprep.subr.bf16.mxu0 %v3901_v63  ;;  %v560_v63 = vld [vmem:[%s4585_s13 + $0x378] sm:$0xff]  ;;  %v575_v23 = vld [vmem:[%s4585_s13 + $0x3f0] sm:$0xff]  ;;  %v481_v42 = vld [vmem:[%s4585_s13 + $0x100] sm:$0xff] }
  0xf3   : > { %3498 = vmatpush3.bf16.msra.mxu1 %v3910_v37  ;;  %v682_v8 = vpack.c.bf16 %v569_v0, %v560_v63  ;;  %v3927_v26 = vld [vmem:[#allocation4 + $0x1f8] sm:$0xff]   ;;  %v463_v29 = vld [vmem:[%s4585_s13 + $0x70] sm:$0xff]  ;;  %v688_v31 = vpack.c.bf16 %v584_v24, %v575_v23  ;;  %v489_v63 = vld [vmem:[%s4585_s13 + $0x140] sm:$0xff] }
  0xf4   : > { %1290 = vmatmul.mubr.bf16.gmra.mrb[4].mxu0 %v634_v54  ;;  %3499 = vmatprep.subr.bf16.mxu1 %v3913_v47  ;;  %v3916_v54 = vld [vmem:[#allocation4 + $0x198] sm:$0xff]   ;;  %v455_v44 = vld [vmem:[%s4585_s13 + $0x30] sm:$0xff]  ;;  %v474_v47 = vld [vmem:[%s4585_s13 + $0xc8] sm:$0xff] }
  0xf5   : > { %1297 = vmatprep.mubr.bf16.mxu0 %v644_v61  ;;  %3436 = vmatpush3.bf16.msra.mxu0 %v3902_v5  ;;  %v3918_v61 = vld [vmem:[#allocation4 + $0x130] sm:$0xff]   ;;  %v557_v5 = vld [vmem:[%s4585_s13 + $0x360] sm:$0xff]  ;;  %v3928_v27 = vld [vmem:[#allocation4 + $0x1b8] sm:$0xff]  }
  0xf6   : > { %1387 = vmatmul.mubr.bf16.gmra.mrb[4].mxu1 %v636_v62  ;;  %3437 = vmatprep.subr.bf16.mxu0 %v3903_v11  ;;  %v670_v62 = vpack.c.bf16 %v548_v55, %v539_v52  ;;  %v3922_v11 = vld [vmem:[#allocation4 + $0x1a8] sm:$0xff]   ;;  %v456_v35 = vld [vmem:[%s4585_s13 + $0x38] sm:$0xff] }
  0xf7   : > { %1394 = vmatprep.mubr.bf16.mxu1 %v646_v4  ;;  %3500 = vmatpush3.bf16.msra.mxu1 %v3914_v49  ;;  %v672_v4 = vpack.c.bf16 %v550_v57, %v541_v56  ;;  %v472_v41 = vld [vmem:[%s4585_s13 + $0xb8] sm:$0xff]  ;;  %v473_v56 = vld [vmem:[%s4585_s13 + $0xc0] sm:$0xff]  ;;  %v482_v57 = vld [vmem:[%s4585_s13 + $0x108] sm:$0xff] }
  0xf8   : > { %3501 = vmatprep.subr.bf16.mxu1 %v3915_v50  ;;  %v480_v52 = vld [vmem:[%s4585_s13 + $0xf8] sm:$0xff]  ;;  %v498_v0 = vld [vmem:[%s4585_s13 + $0x188] sm:$0xff] }
  0xf9   : > { %3438 = vmatpush3.bf16.msra.mxu0 %v3904_v15  ;;  %v679_v15 = vpack.c.bf16 %v566_v7, %v557_v5  ;;  %v492_v59 = vld [vmem:[%s4585_s13 + $0x158] sm:$0xff]  ;;  %v519_v7 = vld [vmem:[%s4585_s13 + $0x230] sm:$0xff]  ;;  %v534_v23 = vld [vmem:[%s4585_s13 + $0x2a8] sm:$0xff] }
  0xfa   : > { %3439 = vmatprep.subr.bf16.mxu0 %v3905_v19  ;;  %v587_v19 = vld [vmem:[%s4585_s13 + $0x450] sm:$0xff]  ;;  %v500_v5 = vld [vmem:[%s4585_s13 + $0x198] sm:$0xff] }
  0xfb   : > { %3502 = vmatpush3.bf16.msra.mxu1 %v3916_v54  ;;  %v499_v54 = vld [vmem:[%s4585_s13 + $0x190] sm:$0xff] }
  0xfc   : > { %1298 = vmatmul.mubr.bf16.gmra.mrb[8].mxu0 %v643_v10  ;;  %3503 = vmatprep.subr.bf16.mxu1 %v3919_v2  ;;  %v585_v10 = vld [vmem:[%s4585_s13 + $0x440] sm:$0xff] }
  0xfd   : > { %1305 = vmatprep.mubr.bf16.mxu0 %v653_v14  ;;  %3440 = vmatpush3.bf16.msra.mxu0 %v3906_v25  ;;  %v568_v14 = vld [vmem:[%s4585_s13 + $0x3b8] sm:$0xff]  ;;  %v517_v2 = vld [vmem:[%s4585_s13 + $0x220] sm:$0xff] }
  0xfe   : > { %1395 = vmatmul.mubr.bf16.gmra.mrb[8].mxu1 %v645_v16  ;;  %3441 = vmatprep.subr.bf16.mxu0 %v3911_v39  ;;  %v578_v16 = vld [vmem:[%s4585_s13 + $0x408] sm:$0xff]  ;;  %v681_v21 = vpack.c.bf16 %v568_v14, %v559_v13  ;;  %v453_v39 = vld [vmem:[%s4585_s13 + $0x20] sm:$0xff]  ;;  %v535_v14 = vld [vmem:[%s4585_s13 + $0x2b0] sm:$0xff] }
  0xff   : > { %1402 = vmatprep.mubr.bf16.mxu1 %v655_v18  ;;  %3504 = vmatpush3.bf16.msra.mxu1 %v3920_v3  ;;  %v689_v18 = vpack.c.bf16 %v585_v10, %v576_v9  ;;  %v691_v25 = vpack.c.bf16 %v587_v19, %v578_v16  ;;  %v629_v43 = vpack.c.bf16 %v462_v40, %v453_v39  ;;  %v491_v3 = vld [vmem:[%s4585_s13 + $0x150] sm:$0xff]  ;;  %v526_v13 = vld [vmem:[%s4585_s13 + $0x268] sm:$0xff]  ;;  %v545_v40 = vld [vmem:[%s4585_s13 + $0x300] sm:$0xff] }
 0x100   : > { %3505 = vmatprep.subr.bf16.mxu1 %v3921_v6  ;;  %v510_v6 = vld [vmem:[%s4585_s13 + $0x1e8] sm:$0xff]  ;;  %v649_v9 = vpack.c.bf16 %v500_v5, %v491_v3  ;;  %v507_v10 = vld [vmem:[%s4585_s13 + $0x1d0] sm:$0xff]  ;;  %v484_v5 = vld [vmem:[%s4585_s13 + $0x118] sm:$0xff] }
 0x101   : > { %3442 = vmatpush3.bf16.msra.mxu0 %v3912_v45  ;;  %v464_v45 = vld [vmem:[%s4585_s13 + $0x78] sm:$0xff]  ;;  %v518_v16 = vld [vmem:[%s4585_s13 + $0x228] sm:$0xff] }
 0x102   : > { %3443 = vmatprep.subr.bf16.mxu0 %v3917_v60  ;;  %v631_v49 = vpack.c.bf16 %v464_v45, %v455_v44  ;;  %v501_v60 = vld [vmem:[%s4585_s13 + $0x1a0] sm:$0xff] }
 0x103   : > { %3506 = vmatpush3.bf16.msra.mxu1 %v3922_v11  ;;  %v516_v11 = vld [vmem:[%s4585_s13 + $0x218] sm:$0xff]  ;;  %v573_v44 = vld [vmem:[%s4585_s13 + $0x3e0] sm:$0xff] }
 0x104   : > { %1306 = vmatmul.mubr.bf16.gmra.mrb[12].mxu0 %v652_v28  ;;  %3507 = vmatprep.subr.bf16.mxu1 %v3925_v20  ;;  %v454_v28 = vld [vmem:[%s4585_s13 + $0x28] sm:$0xff]  ;;  %v656_v19 = vpack.c.bf16 %v516_v11, %v507_v10  ;;  %v666_v20 = vpack.c.bf16 %v535_v14, %v526_v13  ;;  %v511_v10 = vld [vmem:[%s4585_s13 + $0x1f0] sm:$0xff]  ;;  %v520_v11 = vld [vmem:[%s4585_s13 + $0x238] sm:$0xff] }
 0x105   : > { %1313 = vmatprep.mubr.bf16.mxu0 %v662_v30  ;;  %3444 = vmatpush3.bf16.msra.mxu0 %v3918_v61  ;;  %v3929_v30 = vld [vmem:[#allocation4 + $0x200] sm:$0xff]   ;;  %v630_v34 = vpack.c.bf16 %v463_v29, %v454_v28  ;;  %v640_v61 = vpack.c.bf16 %v482_v57, %v473_v56  ;;  %v536_v28 = vld [vmem:[%s4585_s13 + $0x2b8] sm:$0xff]  ;;  %v591_v56 = vld [vmem:[%s4585_s13 + $0x470] sm:$0xff]  ;;  %v660_v14 = vpack.c.bf16 %v520_v11, %v511_v10 }
 0x106   : > { %1403 = vmatmul.mubr.bf16.gmra.mrb[12].mxu1 %v654_v33  ;;  %3445 = vmatprep.subr.bf16.mxu0 %v3923_v12  ;;  %v586_v33 = vld [vmem:[%s4585_s13 + $0x448] sm:$0xff]  ;;  %v659_v12 = vpack.c.bf16 %v519_v7, %v510_v6  ;;  %v493_v6 = vld [vmem:[%s4585_s13 + $0x160] sm:$0xff] }
 0x107   : > { %1410 = vmatprep.mubr.bf16.mxu1 %v664_v36  ;;  %3508 = vmatpush3.bf16.msra.mxu1 %v3926_v22  ;;  %v465_v36 = vld [vmem:[%s4585_s13 + $0x80] sm:$0xff]  ;;  %v690_v37 = vpack.c.bf16 %v586_v33, %v577_v32  ;;  %v555_v32 = vld [vmem:[%s4585_s13 + $0x350] sm:$0xff]  ;;  %v502_v7 = vld [vmem:[%s4585_s13 + $0x1a8] sm:$0xff] }
 0x108   : > { %3509 = vmatprep.subr.bf16.mxu1 %v3927_v26  ;;  %v632_v38 = vpack.c.bf16 %v465_v36, %v456_v35  ;;  %v525_v22 = vld [vmem:[%s4585_s13 + $0x260] sm:$0xff]  ;;  %v543_v35 = vld [vmem:[%s4585_s13 + $0x2f0] sm:$0xff]  ;;  %v552_v36 = vld [vmem:[%s4585_s13 + $0x338] sm:$0xff] }
 0x109   : > { %3446 = vmatpush3.bf16.msra.mxu0 %v3924_v17  ;;  %v528_v17 = vld [vmem:[%s4585_s13 + $0x278] sm:$0xff]  ;;  %v553_v26 = vld [vmem:[%s4585_s13 + $0x340] sm:$0xff]  ;;  %v665_v29 = vpack.c.bf16 %v534_v23, %v525_v22  ;;  %v674_v39 = vpack.c.bf16 %v552_v36, %v543_v35  ;;  %v538_v13 = vld [vmem:[%s4585_s13 + $0x2c8] sm:$0xff] }
 0x10a   : > { %3632 = vmatprep.subr.bf16.mxu0 %v3929_v30  ;;  %v583_v22 = vld [vmem:[%s4585_s13 + $0x430] sm:$0xff]  ;;  %v592_v23 = vld [vmem:[%s4585_s13 + $0x478] sm:$0xff] }
 0x10b   : > { %3510 = vmatpush3.bf16.msra.mxu1 %v3928_v27  ;;  %v527_v27 = vld [vmem:[%s4585_s13 + $0x270] sm:$0xff]  ;;  %v3945_v35 = vld [vmem:[#allocation7 + $0x50] ss:$8 sps:$4 sm:$0xff]   ;;  %v3947_v36 = vld [vmem:[#allocation7 + $0x54] ss:$8 sps:$4 sm:$0xff]  }
 0x10c   : > { %1314 = vmatmul.mubr.bf16.gmra.mrb[16].mxu0 %v661_v46  ;;  %v639_v46 = vpack.c.bf16 %v481_v42, %v472_v41  ;;  %v667_v33 = vpack.c.bf16 %v536_v28, %v527_v27  ;;  %v554_v41 = vld [vmem:[%s4585_s13 + $0x348] sm:$0xff]  ;;  %v3933_v27 = vld [vmem:[#allocation7 + $0x10] ss:$8 sps:$4 sm:$0xff]  }
 0x10d   : > { %1321 = vmatprep.mubr.bf16.mxu0 %v671_v48  ;;  %v483_v48 = vld [vmem:[%s4585_s13 + $0x110] sm:$0xff]  ;;  %v676_v45 = vpack.c.bf16 %v554_v41, %v545_v40  ;;  %v3935_v28 = vld [vmem:[#allocation7 + $0x14] ss:$8 sps:$4 sm:$0xff]  }
 0x10e   : > { %1411 = vmatmul.mubr.bf16.gmra.mrb[16].mxu1 %v663_v51  ;;  %v641_v50 = vpack.c.bf16 %v483_v48, %v474_v47  ;;  %v471_v51 = vld [vmem:[%s4585_s13 + $0xb0] sm:$0xff]  ;;  %v561_v47 = vld [vmem:[%s4585_s13 + $0x380] sm:$0xff]  ;;  %v570_v48 = vld [vmem:[%s4585_s13 + $0x3c8] sm:$0xff] }
 0x10f   : > { %1418 = vmatprep.mubr.bf16.mxu1 %v673_v53  ;;  %v490_v53 = vld [vmem:[%s4585_s13 + $0x148] sm:$0xff]  ;;  %v638_v55 = vpack.c.bf16 %v480_v52, %v471_v51  ;;  %v683_v51 = vpack.c.bf16 %v570_v48, %v561_v47  ;;  %v563_v52 = vld [vmem:[%s4585_s13 + $0x390] sm:$0xff] }
 0x110   : > { %v648_v58 = vpack.c.bf16 %v499_v54, %v490_v53  ;;  %v572_v53 = vld [vmem:[%s4585_s13 + $0x3d8] sm:$0xff]  ;;  %v4755_v40 = vld [vmem:[#allocation6] ss:$0 sm:$0xff] }
 0x111   : > { %v685_v57 = vpack.c.bf16 %v572_v53, %v563_v52 }
 0x114   : > { %1322 = vmatmul.mubr.bf16.gmra.mrb[20].mxu0 %v670_v62  ;;  %v650_v62 = vpack.c.bf16 %v501_v60, %v492_v59  ;;  %v579_v59 = vld [vmem:[%s4585_s13 + $0x410] sm:$0xff]  ;;  %v588_v60 = vld [vmem:[%s4585_s13 + $0x458] sm:$0xff] }
 0x115   : > { %1329 = vmatprep.mubr.bf16.mxu0 %v680_v1  ;;  %v508_v1 = vld [vmem:[%s4585_s13 + $0x1d8] sm:$0xff] }
 0x116   : > { %1419 = vmatmul.mubr.bf16.gmra.mrb[20].mxu1 %v672_v4  ;;  %v647_v4 = vpack.c.bf16 %v498_v0, %v489_v63  ;;  %v692_v63 = vpack.c.bf16 %v588_v60, %v579_v59  ;;  %v581_v0 = vld [vmem:[%s4585_s13 + $0x420] sm:$0xff] }
 0x117   : > { %1426 = vmatprep.mubr.bf16.mxu1 %v682_v8  ;;  %v657_v8 = vpack.c.bf16 %v517_v2, %v508_v1  ;;  %v590_v1 = vld [vmem:[%s4585_s13 + $0x468] sm:$0xff] }
 0x118   : > { %v694_v3 = vpack.c.bf16 %v590_v1, %v581_v0 }
 0x11c   : > { %1330 = vmatmul.mubr.bf16.gmra.mrb[24].mxu0 %v679_v15  ;;  %v509_v15 = vld [vmem:[%s4585_s13 + $0x1e0] sm:$0xff] }
 0x11d   : > { %1337 = vmatprep.mubr.bf16.mxu0 %v689_v18  ;;  %v537_v18 = vld [vmem:[%s4585_s13 + $0x2c0] sm:$0xff] }
 0x11e   : > { %1427 = vmatmul.mubr.bf16.gmra.mrb[24].mxu1 %v681_v21  ;;  %v658_v21 = vpack.c.bf16 %v518_v16, %v509_v15  ;;  %v668_v24 = vpack.c.bf16 %v537_v18, %v528_v17  ;;  %v547_v16 = vld [vmem:[%s4585_s13 + $0x310] sm:$0xff]  ;;  %v556_v17 = vld [vmem:[%s4585_s13 + $0x358] sm:$0xff]  ;;  %v565_v18 = vld [vmem:[%s4585_s13 + $0x3a0] sm:$0xff] }
 0x11f   : > { %1434 = vmatprep.mubr.bf16.mxu1 %v691_v25  ;;  %v544_v25 = vld [vmem:[%s4585_s13 + $0x2f8] sm:$0xff] }
 0x124   : > { %1338 = vmatmul.mubr.bf16.gmra.mrb[28].mxu0 %v688_v31  ;;  %v546_v31 = vld [vmem:[%s4585_s13 + $0x308] sm:$0xff] }
 0x125   : > { %1475 = vmatprep.mubr.bf16.mxu0 %v630_v34  ;;  %v677_v34 = vpack.c.bf16 %v555_v32, %v546_v31  ;;  %v3939_v31 = vld [vmem:[#allocation7 + $0x30] ss:$8 sps:$4 sm:$0xff]   ;;  %v3941_v32 = vld [vmem:[#allocation7 + $0x34] ss:$8 sps:$4 sm:$0xff]  }
 0x126   : > { %1435 = vmatmul.mubr.bf16.gmra.mrb[28].mxu1 %v690_v37  ;;  %v562_v37 = vld [vmem:[%s4585_s13 + $0x388] sm:$0xff] }
 0x127   : > { %1572 = vmatprep.mubr.bf16.mxu1 %v632_v38  ;;  %v571_v38 = vld [vmem:[%s4585_s13 + $0x3d0] sm:$0xff] }
 0x128   : > { %v684_v42 = vpack.c.bf16 %v571_v38, %v562_v37  ;;  %v3948_v37 = vld [vmem:[#allocation7 + $0x60] ss:$8 sps:$4 sm:$0xff]   ;;  %v3950_v38 = vld [vmem:[#allocation7 + $0x64] ss:$8 sps:$4 sm:$0xff]  }
 0x12c   : > { %1476 = vmatmul.mubr.bf16.vlgmr.msra.gmra.mrb[32].mxu0 %v629_v43  ;;  %v564_v43 = vld [vmem:[%s4585_s13 + $0x398] sm:$0xff] }
 0x12d   : > { %3633 = vmatpush3.bf16.msra.mxu0 %v3929_v30  ;;  %1483 = vmatprep.mubr.bf16.mxu0 %v639_v46  ;;  %v675_v30 = vpack.c.bf16 %v553_v26, %v544_v25  ;;  %v686_v46 = vpack.c.bf16 %v573_v44, %v564_v43  ;;  %v3930_v25 = vld [vmem:[#allocation7] ss:$8 sps:$4 sm:$0xff]   ;;  %v3932_v26 = vld [vmem:[#allocation7 + $0x4] ss:$8 sps:$4 sm:$0xff]  }
 0x12e   : > { %1573 = vmatmul.mubr.bf16.vlgmr.msra.gmra.mrb[32].mxu1 %v631_v49  ;;  %v580_v49 = vld [vmem:[%s4585_s13 + $0x418] sm:$0xff]  ;;  %1882 = vmatprep.subr.bf16.mxu1 %v3932_v26 }
 0x12f   : > { %1580 = vmatprep.mubr.bf16.mxu1 %v641_v50  ;;  %v589_v50 = vld [vmem:[%s4585_s13 + $0x460] sm:$0xff]  ;;  %1883 = vmatpush1.bf16.msra.mxu1 %v3930_v25 }
 0x130   : > { %v693_v54 = vpack.c.bf16 %v589_v50, %v580_v49  ;;  %1884 = vmatprep.subr.bf16.mxu1 %v3935_v28 }
 0x133   : > { %1885 = vmatpush1.bf16.msra.mxu1 %v3933_v27 }
 0x134   : > { %1484 = vmatmul.mubr.bf16.gmra.mrb[36].mxu0 %v638_v55  ;;  %v582_v55 = vld [vmem:[%s4585_s13 + $0x428] sm:$0xff] }
 0x135   : > { %1491 = vmatprep.mubr.bf16.mxu0 %v648_v58  ;;  %v695_v58 = vpack.c.bf16 %v591_v56, %v582_v55  ;;  %v3953_v55 = vld [vmem:[#allocation7 + $0x74] ss:$8 sps:$4 sm:$0xff]  }
 0x136   : > { %1581 = vmatmul.mubr.bf16.gmra.mrb[36].mxu1 %v640_v61  ;;  %v457_v61 = vld [vmem:[%s4585_s13 + $0x40] sm:$0xff] }
 0x137   : > { %1588 = vmatprep.mubr.bf16.mxu1 %v650_v62  ;;  %v466_v62 = vld [vmem:[%s4585_s13 + $0x88] sm:$0xff] }
 0x138   : > { %v633_v2 = vpack.c.bf16 %v466_v62, %v457_v61 }
 0x13c   : > { %1492 = vmatmul.mubr.bf16.gmra.mrb[40].mxu0 %v647_v4  ;;  %v475_v4 = vld [vmem:[%s4585_s13 + $0xd0] sm:$0xff] }
 0x13d   : > { %1499 = vmatprep.mubr.bf16.mxu0 %v657_v8  ;;  %v642_v8 = vpack.c.bf16 %v484_v5, %v475_v4 }
 0x13e   : > { %1589 = vmatmul.mubr.bf16.gmra.mrb[40].mxu1 %v649_v9  ;;  %v651_v9 = vpack.c.bf16 %v502_v7, %v493_v6 }
 0x13f   : > { %1596 = vmatprep.mubr.bf16.mxu1 %v659_v12  ;;  %v529_v12 = vld [vmem:[%s4585_s13 + $0x280] sm:$0xff] }
 0x140   : > { %v669_v15 = vpack.c.bf16 %v538_v13, %v529_v12 }
 0x144   : > { %1500 = vmatmul.mubr.bf16.gmra.mrb[44].mxu0 %v656_v19  ;;  %v574_v19 = vld [vmem:[%s4585_s13 + $0x3e8] sm:$0xff] }
 0x145   : > { %1507 = vmatprep.mubr.bf16.mxu0 %v666_v20  ;;  %v678_v20 = vpack.c.bf16 %v556_v17, %v547_v16 }
 0x146   : > { %1597 = vmatmul.mubr.bf16.gmra.mrb[44].mxu1 %v658_v21  ;;  %v687_v21 = vpack.c.bf16 %v574_v19, %v565_v18 }
 0x147   : > { %1604 = vmatprep.mubr.bf16.mxu1 %v668_v24  ;;  %v696_v24 = vpack.c.bf16 %v592_v23, %v583_v22 }
 0x14c   : > { %1508 = vmatmul.mubr.bf16.gmra.mrb[48].mxu0 %v665_v29  ;;  %v3936_v29 = vld [vmem:[#allocation7 + $0x20] ss:$8 sps:$4 sm:$0xff]  }
 0x14d   : > { %1515 = vmatprep.mubr.bf16.mxu0 %v675_v30  ;;  %v3938_v30 = vld [vmem:[#allocation7 + $0x24] ss:$8 sps:$4 sm:$0xff]  }
 0x14e   : > { %1605 = vmatmul.mubr.bf16.gmra.mrb[48].mxu1 %v667_v33  ;;  %1886 = vmatprep.subr.bf16.mxu1 %v3938_v30  ;;  %v3942_v33 = vld [vmem:[#allocation7 + $0x40] ss:$8 sps:$4 sm:$0xff]  }
 0x14f   : > { %1612 = vmatprep.mubr.bf16.mxu1 %v677_v34  ;;  %1887 = vmatpush1.bf16.msra.mxu1 %v3936_v29  ;;  %v3944_v34 = vld [vmem:[#allocation7 + $0x44] ss:$8 sps:$4 sm:$0xff]  }
 0x150   : > { %1888 = vmatprep.subr.bf16.mxu1 %v3941_v32 }
 0x153   : > { %1889 = vmatpush1.bf16.msra.mxu1 %v3939_v31 }
 0x154   : > { %1516 = vmatmul.mubr.bf16.gmra.mrb[52].mxu0 %v674_v39  ;;  %1890 = vmatprep.subr.bf16.mxu1 %v3944_v34 }
 0x155   : > { %1523 = vmatprep.mubr.bf16.mxu0 %v684_v42 }
 0x156   : > { %1613 = vmatmul.mubr.bf16.gmra.mrb[52].mxu1 %v676_v45 }
 0x157   : > { %1620 = vmatprep.mubr.bf16.mxu1 %v686_v46  ;;  %1891 = vmatpush1.bf16.msra.mxu1 %v3942_v33 }
 0x158   : > { %1892 = vmatprep.subr.bf16.mxu1 %v3947_v36 }
 0x15b   : > { %1893 = vmatpush1.bf16.msra.mxu1 %v3945_v35 }
 0x15c   : > { %1524 = vmatmul.mubr.bf16.gmra.mrb[56].mxu0 %v683_v51  ;;  %1894 = vmatprep.subr.bf16.mxu1 %v3950_v38 }
 0x15d   : > { %1531 = vmatprep.mubr.bf16.mxu0 %v693_v54 }
 0x15e   : > { %1621 = vmatmul.mubr.bf16.gmra.mrb[56].mxu1 %v685_v57  ;;  %v3951_v57 = vld [vmem:[#allocation7 + $0x70] ss:$8 sps:$4 sm:$0xff]  }
 0x15f   : > { %1628 = vmatprep.mubr.bf16.mxu1 %v695_v58  ;;  %1895 = vmatpush1.bf16.msra.mxu1 %v3948_v37 }
 0x160   : > { %1896 = vmatprep.subr.bf16.mxu1 %v3953_v55 }
 0x163   : > { %1897 = vmatpush1.bf16.msra.mxu1 %v3951_v57 }
 0x164   : > { %1532 = vmatmul.mubr.bf16.gmra.mrb[60].mxu0 %v692_v63 }
 0x165   : > { %3634 = vmatprep.mubr.msk.bf16.mxu0 %vm1224_vm0, %v633_v2 }
 0x166   : > { %1629 = vmatmul.mubr.bf16.gmra.mrb[60].mxu1 %v694_v3  ;;  %v4310_v3 = vmov 0  }
 0x167   : > { %1914 = vmatprep.mubr.bf16.mxu1 %v4310_v3  ;;  %3860 = vset.pattern.permute.xlu1 %v4310_v3 }
 0x168   : > { %3859 = vset.pattern.permute.xlu0 %v4310_v3 }
 0x16c   : > { %3635 = vmatmul.mubr.msk.bf16.vlgmr.msra.gmra.mrb[64].mxu0 %vm1224_vm0, %v642_v8 }
 0x16d   : > { %3638 = vmatprep.mubr.msk.bf16.mxu0 %vm1224_vm0, %v651_v9 }
 0x174   : > { %3639 = vmatmul.mubr.msk.bf16.gmra.mrb[68].mxu0 %vm1224_vm0, %v660_v14 }
 0x175   : > { %3642 = vmatprep.mubr.msk.bf16.mxu0 %vm1224_vm0, %v669_v15 }
 0x17c   : > { %3643 = vmatmul.mubr.msk.bf16.gmra.mrb[72].mxu0 %vm1224_vm0, %v678_v20 }
 0x17d   : > { %3646 = vmatprep.mubr.msk.bf16.mxu0 %vm1224_vm0, %v687_v21 }
 0x184   : > { %3647 = vmatmul.mubr.msk.bf16.gmra.mrb[76].mxu0 %vm1224_vm0, %v696_v24 }
 0x1bf   : > { %v3319_v39 = vpop.f32.mrb[0].mxu0 }
 0x1c0   : > { %v3320_v41 = vpop.f32.mrb[1].mxu0 }
 0x1c1   : > { %v3321_v42 = vadd.f32 %v3320_v41, %v3319_v39  ;;  %v3322_v43 = vpop.f32.mrb[2].mxu0  ;;  %v3383_v44 = vpop.f32.mrb[0].mxu1 }
 0x1c2   : > { %v3323_v45 = vpop.f32.mrb[3].mxu0  ;;  %v3384_v48 = vpop.f32.mrb[1].mxu1 }
 0x1c3   : > { %v1284_v46 = vadd.f32 %v3321_v42, %v4755_v40  ;;  %v3324_v47 = vadd.f32 %v3323_v45, %v3322_v43  ;;  %v3385_v49 = vadd.f32 %v3384_v48, %v3383_v44  ;;  %v3386_v50 = vpop.f32.mrb[2].mxu1 }
 0x1c4   : > { %v3387_v52 = vpop.f32.mrb[3].mxu1 }
 0x1c5   : > { %v1287_v51 = vadd.f32 %v3324_v47, %v4755_v40  ;;  %v4759_v53 = vadd.f32 %v3385_v49, %v1284_v46  ;;  %v3388_v54 = vadd.f32 %v3387_v52, %v3386_v50 }
 0x1c7   : > { %v3325_v56 = vpop.f32.mrb[4].mxu0  ;;  %v4761_v58 = vadd.f32 %v3388_v54, %v1287_v51 }
 0x1c8   : > { %v3326_v59 = vpop.f32.mrb[5].mxu0 }
 0x1c9   : > { %v3327_v60 = vadd.f32 %v3326_v59, %v3325_v56  ;;  %v3328_v61 = vpop.f32.mrb[6].mxu0  ;;  %v3389_v62 = vpop.f32.mrb[4].mxu1 }
 0x1ca   : > { %v3329_v63 = vpop.f32.mrb[7].mxu0  ;;  %v3390_v2 = vpop.f32.mrb[5].mxu1 }
 0x1cb   : > { %v1292_v0 = vadd.f32 %v3327_v60, %v4755_v40  ;;  %v3330_v1 = vadd.f32 %v3329_v63, %v3328_v61  ;;  %v3391_v4 = vadd.f32 %v3390_v2, %v3389_v62  ;;  %v3392_v5 = vpop.f32.mrb[6].mxu1 }
 0x1cc   : > { %v3393_v7 = vpop.f32.mrb[7].mxu1 }
 0x1cd   : > { %v1295_v6 = vadd.f32 %v3330_v1, %v4755_v40  ;;  %v4768_v8 = vadd.f32 %v3391_v4, %v1292_v0  ;;  %v3394_v9 = vadd.f32 %v3393_v7, %v3392_v5 }
 0x1cf   : > { %v3331_v10 = vpop.f32.mrb[8].mxu0  ;;  %v4770_v11 = vadd.f32 %v3394_v9, %v1295_v6 }
 0x1d0   : > { %v3332_v12 = vpop.f32.mrb[9].mxu0 }
 0x1d1   : > { %v3333_v13 = vadd.f32 %v3332_v12, %v3331_v10  ;;  %v3334_v14 = vpop.f32.mrb[10].mxu0  ;;  %v3395_v15 = vpop.f32.mrb[8].mxu1 }
 0x1d2   : > { %v3335_v16 = vpop.f32.mrb[11].mxu0  ;;  %v3396_v19 = vpop.f32.mrb[9].mxu1 }
 0x1d3   : > { %v1300_v17 = vadd.f32 %v3333_v13, %v4755_v40  ;;  %v3336_v18 = vadd.f32 %v3335_v16, %v3334_v14  ;;  %v3397_v20 = vadd.f32 %v3396_v19, %v3395_v15  ;;  %v3398_v21 = vpop.f32.mrb[10].mxu1 }
 0x1d4   : > { %v3399_v23 = vpop.f32.mrb[11].mxu1 }
 0x1d5   : > { %v1303_v22 = vadd.f32 %v3336_v18, %v4755_v40  ;;  %v4774_v24 = vadd.f32 %v3397_v20, %v1300_v17  ;;  %v3400_v25 = vadd.f32 %v3399_v23, %v3398_v21 }
 0x1d7   : > { %v3337_v26 = vpop.f32.mrb[12].mxu0  ;;  %v4776_v27 = vadd.f32 %v3400_v25, %v1303_v22 }
 0x1d8   : > { %v3338_v28 = vpop.f32.mrb[13].mxu0 }
 0x1d9   : > { %v3339_v29 = vadd.f32 %v3338_v28, %v3337_v26  ;;  %v3340_v30 = vpop.f32.mrb[14].mxu0  ;;  %v3401_v31 = vpop.f32.mrb[12].mxu1 }
 0x1da   : > { %v3341_v32 = vpop.f32.mrb[15].mxu0  ;;  %v3402_v35 = vpop.f32.mrb[13].mxu1 }
 0x1db   : > { %v1308_v33 = vadd.f32 %v3339_v29, %v4755_v40  ;;  %v3342_v34 = vadd.f32 %v3341_v32, %v3340_v30  ;;  %v3403_v36 = vadd.f32 %v3402_v35, %v3401_v31  ;;  %v3404_v37 = vpop.f32.mrb[14].mxu1 }
 0x1dc   : > { %v3405_v39 = vpop.f32.mrb[15].mxu1 }
 0x1dd   : > { %v1311_v38 = vadd.f32 %v3342_v34, %v4755_v40  ;;  %v4780_v41 = vadd.f32 %v3403_v36, %v1308_v33  ;;  %v3406_v42 = vadd.f32 %v3405_v39, %v3404_v37 }
 0x1df   : > { %v3343_v43 = vpop.f32.mrb[16].mxu0  ;;  %v4782_v44 = vadd.f32 %v3406_v42, %v1311_v38 }
 0x1e0   : > { %v3344_v45 = vpop.f32.mrb[17].mxu0 }
 0x1e1   : > { %v3345_v46 = vadd.f32 %v3344_v45, %v3343_v43  ;;  %v3346_v47 = vpop.f32.mrb[18].mxu0  ;;  %v3407_v48 = vpop.f32.mrb[16].mxu1 }
 0x1e2   : > { %v3347_v49 = vpop.f32.mrb[19].mxu0  ;;  %v3408_v52 = vpop.f32.mrb[17].mxu1 }
 0x1e3   : > { %v1316_v50 = vadd.f32 %v3345_v46, %v4755_v40  ;;  %v3348_v51 = vadd.f32 %v3347_v49, %v3346_v47  ;;  %v3409_v54 = vadd.f32 %v3408_v52, %v3407_v48  ;;  %v3410_v55 = vpop.f32.mrb[18].mxu1 }
 0x1e4   : > { %v3411_v57 = vpop.f32.mrb[19].mxu1 }
 0x1e5   : > { %v1319_v56 = vadd.f32 %v3348_v51, %v4755_v40  ;;  %v4786_v59 = vadd.f32 %v3409_v54, %v1316_v50  ;;  %v3412_v60 = vadd.f32 %v3411_v57, %v3410_v55 }
 0x1e7   : > { %v3349_v61 = vpop.f32.mrb[20].mxu0  ;;  %v4788_v62 = vadd.f32 %v3412_v60, %v1319_v56 }
 0x1e8   : > { %v3350_v63 = vpop.f32.mrb[21].mxu0 }
 0x1e9   : > { %v3351_v0 = vadd.f32 %v3350_v63, %v3349_v61  ;;  %v3352_v1 = vpop.f32.mrb[22].mxu0  ;;  %v3413_v2 = vpop.f32.mrb[20].mxu1 }
 0x1ea   : > { %v3353_v4 = vpop.f32.mrb[23].mxu0  ;;  %v3414_v7 = vpop.f32.mrb[21].mxu1 }
 0x1eb   : > { %v1324_v5 = vadd.f32 %v3351_v0, %v4755_v40  ;;  %v3354_v6 = vadd.f32 %v3353_v4, %v3352_v1  ;;  %v3415_v9 = vadd.f32 %v3414_v7, %v3413_v2  ;;  %v3416_v10 = vpop.f32.mrb[22].mxu1  ;;  %v4818_v4 = vld [vmem:[%s5525_s6] sm:$0xff]  }
 0x1ec   : > { %v3417_v13 = vpop.f32.mrb[23].mxu1 }
 0x1ed   : > { %v1327_v12 = vadd.f32 %v3354_v6, %v4755_v40  ;;  %v4792_v14 = vadd.f32 %v3415_v9, %v1324_v5  ;;  %v3418_v15 = vadd.f32 %v3417_v13, %v3416_v10  ;;  %v4823_v5 = vld [vmem:[%s5525_s6 + $0x48] sm:$0xff]  }
 0x1ee   : > { %v4834_v13 = vld [vmem:[%s5525_s6 + $0x8] sm:$0xff]  }
 0x1ef   : > { %v3355_v16 = vpop.f32.mrb[24].mxu0  ;;  %v4794_v17 = vadd.f32 %v3418_v15, %v1327_v12 }
 0x1f0   : > { %v3356_v18 = vpop.f32.mrb[25].mxu0 }
 0x1f1   : > { %v3357_v19 = vadd.f32 %v3356_v18, %v3355_v16  ;;  %v3358_v20 = vpop.f32.mrb[26].mxu0  ;;  %v3419_v21 = vpop.f32.mrb[24].mxu1 }
 0x1f2   : > { %v3359_v22 = vpop.f32.mrb[27].mxu0  ;;  %v3420_v26 = vpop.f32.mrb[25].mxu1 }
 0x1f3   : > { %v1332_v23 = vadd.f32 %v3357_v19, %v4755_v40  ;;  %v3360_v25 = vadd.f32 %v3359_v22, %v3358_v20  ;;  %v3421_v28 = vadd.f32 %v3420_v26, %v3419_v21  ;;  %v3422_v29 = vpop.f32.mrb[26].mxu1  ;;  %v4855_v26 = vld [vmem:[%s5525_s6 + $0x10] sm:$0xff]  }
 0x1f4   : > { %v3423_v31 = vpop.f32.mrb[27].mxu1 }
 0x1f5   : > { %v1335_v30 = vadd.f32 %v3360_v25, %v4755_v40  ;;  %v4798_v32 = vadd.f32 %v3421_v28, %v1332_v23  ;;  %v3424_v33 = vadd.f32 %v3423_v31, %v3422_v29  ;;  %v595_v23 = vld [vmem:[%s4847_s14 + $0x10] sm:$0xff]  ;;  %v596_v25 = vld [vmem:[%s4847_s14 + $0x18] sm:$0xff] }
 0x1f6   : > { %v3673_v31 = vtrunc.f32 %v595_v23 }
 0x1f7   : > { %v3361_v34 = vpop.f32.mrb[28].mxu0  ;;  %v4800_v35 = vadd.f32 %v3424_v33, %v1335_v30  ;;  %v3675_v33 = vtrunc.f32 %v596_v25 }
 0x1f8   : > { %v3362_v36 = vpop.f32.mrb[29].mxu0 }
 0x1f9   : > { %v3363_v37 = vadd.f32 %v3362_v36, %v3361_v34  ;;  %v3364_v38 = vpop.f32.mrb[30].mxu0  ;;  %v3425_v39 = vpop.f32.mrb[28].mxu1  ;;  %v4862_v34 = vld [vmem:[%s5525_s6 + $0x58] sm:$0xff]  }
 0x1fa   : > { %v3365_v42 = vpop.f32.mrb[31].mxu0  ;;  %v3426_v46 = vpop.f32.mrb[29].mxu1 }
 0x1fb   : > { %v1340_v43 = vadd.f32 %v3363_v37, %v4755_v40  ;;  %v3366_v45 = vadd.f32 %v3365_v42, %v3364_v38  ;;  %v3427_v47 = vadd.f32 %v3426_v46, %v3425_v39  ;;  %v3428_v48 = vpop.f32.mrb[30].mxu1  ;;  %v598_v38 = vld [vmem:[%s4847_s14 + $0x28] sm:$0xff] }
 0x1fc   : > { %v3429_v50 = vpop.f32.mrb[31].mxu1 }
 0x1fd   : > { %v1343_v49 = vadd.f32 %v3366_v45, %v4755_v40  ;;  %v4804_v51 = vadd.f32 %v3427_v47, %v1340_v43  ;;  %v3430_v52 = vadd.f32 %v3429_v50, %v3428_v48  ;;  %v3954_v40 = vld [vmem:[%s5525_s6 + $0x40] sm:$0xff]   ;;  %v4866_v43 = vcvt.f32.s32 %v3673_v31  ;;  %v594_v45 = vld [vmem:[%s4847_s14 + $0x8] sm:$0xff]  ;;  %v4876_v48 = vld [vmem:[%s5525_s6 + $0x18] sm:$0xff]  }
 0x1fe   : > { %3568 = vmatprep.subr.bf16.mxu0 %v3954_v40  ;;  %3650 = vmatprep.subr.bf16.mxu1 %v3954_v40  ;;  %v3679_v50 = vtrunc.f32 %v598_v38 }
 0x1ff   : > { %v3447_v54 = vpop.f32.mrb[32].mxu0  ;;  %v4806_v55 = vadd.f32 %v3430_v52, %v1343_v49  ;;  %3569 = vmatpush3.bf16.msra.mxu0 %v4818_v4  ;;  %2116 = vperm.xlu1 %3860, %v4866_v43   ;;  %v4885_v52 = vld [vmem:[%s5525_s6 + $0x60] sm:$0xff]  }
 0x200   : > { %v3448_v56 = vpop.f32.mrb[33].mxu0  ;;  %3570 = vmatprep.subr.bf16.mxu0 %v4823_v5 }
 0x201   : > { %v3449_v57 = vadd.f32 %v3448_v56, %v3447_v54  ;;  %v3450_v60 = vpop.f32.mrb[34].mxu0  ;;  %v3511_v61 = vpop.f32.mrb[32].mxu1 }
 0x202   : > { %v3451_v63 = vpop.f32.mrb[35].mxu0  ;;  %v3512_v2 = vpop.f32.mrb[33].mxu1 }
 0x203   : > { %v1478_v0 = vadd.f32 %v3449_v57, %v4759_v53  ;;  %v3452_v1 = vadd.f32 %v3451_v63, %v3450_v60  ;;  %v3513_v53 = vadd.f32 %v3512_v2, %v3511_v61  ;;  %v3514_v6 = vpop.f32.mrb[34].mxu1  ;;  %3571 = vmatpush3.bf16.msra.mxu0 %v4834_v13  ;;  %v600_v57 = vld [vmem:[%s4847_s14 + $0x38] sm:$0xff]  ;;  %v3671_v61 = vtrunc.f32 %v594_v45 }
 0x204   : > { %v3515_v9 = vpop.f32.mrb[35].mxu1 }
 0x205   : > { %v1481_v7 = vadd.f32 %v3452_v1, %v4761_v58  ;;  %v3516_v10 = vadd.f32 %v3515_v9, %v3514_v6  ;;  %v4827_v12 = vadd.f32 %v3513_v53, %v1478_v0  ;;  %v4840_v58 = vld [vmem:[%s5525_s6 + $0x50] sm:$0xff]   ;;  %v597_v1 = vld [vmem:[%s4847_s14 + $0x20] sm:$0xff] }
 0x206   : > { %3572 = vmatprep.subr.bf16.mxu0 %v4840_v58  ;;  %v4897_v6 = vld [vmem:[%s5525_s6 + $0x20] sm:$0xff]   ;;  %v3677_v23 = vtrunc.f32 %v597_v1 }
 0x207   : > { %v3453_v15 = vpop.f32.mrb[36].mxu0  ;;  %v4842_v18 = vadd.f32 %v3516_v10, %v1481_v7  ;;  %3573 = vmatpush3.bf16.msra.mxu0 %v4855_v26 }
 0x208   : > { %v3454_v16 = vpop.f32.mrb[37].mxu0  ;;  %3574 = vmatprep.subr.bf16.mxu0 %v4862_v34 }
 0x209   : > { %v3455_v19 = vadd.f32 %v3454_v16, %v3453_v15  ;;  %v3456_v20 = vpop.f32.mrb[38].mxu0  ;;  %v3517_v21 = vpop.f32.mrb[36].mxu1  ;;  %v4901_v15 = vcvt.f32.s32 %v3679_v50  ;;  %v3683_v16 = vtrunc.f32 %v600_v57 }
 0x20a   : > { %v3457_v22 = vpop.f32.mrb[39].mxu0  ;;  %v3518_v30 = vpop.f32.mrb[37].mxu1 }
 0x20b   : > { %v1486_v28 = vadd.f32 %v3455_v19, %v4768_v8  ;;  %v3458_v29 = vadd.f32 %v3457_v22, %v3456_v20  ;;  %v3519_v36 = vadd.f32 %v3518_v30, %v3517_v21  ;;  %v3520_v37 = vpop.f32.mrb[38].mxu1  ;;  %v593_v8 = vld [vmem:[%s4847_s14] sm:$0xff]  ;;  %3575 = vmatpush3.bf16.msra.mxu0 %v4876_v48  ;;  %v602_v21 = vld [vmem:[%s4847_s14 + $0x48] sm:$0xff]  ;;  %v4906_v22 = vcvt.f32.s32 %v3671_v61 }
 0x20c   : > { %v3521_v42 = vpop.f32.mrb[39].mxu1  ;;  %v3669_v60 = vtrunc.f32 %v593_v8  ;;  %3576 = vmatprep.subr.bf16.mxu0 %v4885_v52 }
 0x20d   : > { %v1489_v39 = vadd.f32 %v3458_v29, %v4770_v11  ;;  %v3522_v46 = vadd.f32 %v3521_v42, %v3520_v37  ;;  %v4870_v47 = vadd.f32 %v3519_v36, %v1486_v28  ;;  %v4879_v11 = vcvt.f32.s32 %v3675_v33  ;;  %v599_v28 = vld [vmem:[%s4847_s14 + $0x30] sm:$0xff] }
 0x20e   : > { %v4891_v53 = vcvt.f32.s32 %v3669_v60  ;;  %v4914_v33 = vcvt.f32.s32 %v3683_v16  ;;  %v3687_v36 = vtrunc.f32 %v602_v21  ;;  %v3681_v42 = vtrunc.f32 %v599_v28  ;;  %v608_v28 = vld [vmem:[%s4847_s14 + $0x78] sm:$0xff] }
 0x20f   : > { %v3459_v49 = vpop.f32.mrb[40].mxu0  ;;  %v4887_v56 = vadd.f32 %v3522_v46, %v1489_v39  ;;  %2119 = vperm.xlu1 %3860, %v4879_v11   ;;  %3577 = vmatpush3.bf16.msra.mxu0 %v4897_v6  ;;  %v604_v39 = vld [vmem:[%s4847_s14 + $0x58] sm:$0xff]  ;;  %v601_v46 = vld [vmem:[%s4847_s14 + $0x40] sm:$0xff] }
 0x210   : > { %v3460_v54 = vpop.f32.mrb[41].mxu0  ;;  %2110 = vperm.xlu0 %3859, %v4891_v53   ;;  %v4925_v61 = vcvt.f32.s32 %v3687_v36 }
 0x211   : > { %v3461_v63 = vadd.f32 %v3460_v54, %v3459_v49  ;;  %v3462_v0 = vpop.f32.mrb[42].mxu0  ;;  %v3523_v2 = vpop.f32.mrb[40].mxu1 }
 0x212   : > { %v3463_v40 = vpop.f32.mrb[43].mxu0  ;;  %v3524_v10 = vpop.f32.mrb[41].mxu1 }
 0x213   : > { %v1494_v7 = vadd.f32 %v3461_v63, %v4774_v24  ;;  %v3464_v9 = vadd.f32 %v3463_v40, %v3462_v0  ;;  %v3525_v19 = vadd.f32 %v3524_v10, %v3523_v2  ;;  %v3526_v20 = vpop.f32.mrb[42].mxu1  ;;  %2125 = vperm.xlu1 %3860, %v4901_v15   ;;  %v3691_v63 = vtrunc.f32 %v604_v39  ;;  %v606_v2 = vld [vmem:[%s4847_s14 + $0x68] sm:$0xff] }
 0x214   : > { %v3527_v25 = vpop.f32.mrb[43].mxu1  ;;  %2113 = vperm.xlu0 %3859, %v4906_v22   ;;  %v4929_v40 = vcvt.f32.s32 %v3681_v42 }
 0x215   : > { %v1497_v24 = vadd.f32 %v3464_v9, %v4776_v27  ;;  %v3528_v29 = vadd.f32 %v3527_v25, %v3526_v20  ;;  %v4910_v30 = vadd.f32 %v3525_v19, %v1494_v7  ;;  %v4920_v27 = vcvt.f32.s32 %v3677_v23 }
 0x216   : > { %v3685_v7 = vtrunc.f32 %v601_v46  ;;  %v4936_v21 = vcvt.f32.s32 %v3691_v63  ;;  %v3695_v23 = vtrunc.f32 %v606_v2  ;;  %v607_v2 = vld [vmem:[%s4847_s14 + $0x70] sm:$0xff] }
 0x217   : > { %v3465_v31 = vpop.f32.mrb[44].mxu0  ;;  %v4916_v38 = vadd.f32 %v3528_v29, %v1497_v24  ;;  %2131 = vperm.xlu1 %3860, %v4914_v33  }
 0x218   : > { %v3466_v37 = vpop.f32.mrb[45].mxu0  ;;  %2122 = vperm.xlu0 %3859, %v4920_v27   ;;  %v4942_v29 = vcvt.f32.s32 %v3685_v7 }
 0x219   : > { %v3467_v8 = vadd.f32 %v3466_v37, %v3465_v31  ;;  %v3468_v45 = vpop.f32.mrb[46].mxu0  ;;  %v3529_v49 = vpop.f32.mrb[44].mxu1  ;;  %v605_v37 = vld [vmem:[%s4847_s14 + $0x60] sm:$0xff] }
 0x21a   : > { %v3469_v50 = vpop.f32.mrb[47].mxu0  ;;  %v3530_v60 = vpop.f32.mrb[45].mxu1  ;;  %v3693_v63 = vtrunc.f32 %v605_v37 }
 0x21b   : > { %v1502_v54 = vadd.f32 %v3467_v8, %v4780_v41  ;;  %v3470_v57 = vadd.f32 %v3469_v50, %v3468_v45  ;;  %v3531_v0 = vadd.f32 %v3530_v60, %v3529_v49  ;;  %v3532_v1 = vpop.f32.mrb[46].mxu1  ;;  %v603_v41 = vld [vmem:[%s4847_s14 + $0x50] sm:$0xff]  ;;  %2137 = vperm.xlu1 %3860, %v4925_v61   ;;  %v4947_v49 = vcvt.f32.s32 %v3695_v23 }
 0x21c   : > { %v3533_v10 = vpop.f32.mrb[47].mxu1  ;;  %2128 = vperm.xlu0 %3859, %v4929_v40   ;;  %v3699_v50 = vtrunc.f32 %v608_v28  ;;  %v3697_v23 = vtrunc.f32 %v607_v2 }
 0x21d   : > { %v1505_v9 = vadd.f32 %v3470_v57, %v4782_v44  ;;  %v3534_v16 = vadd.f32 %v3533_v10, %v3532_v1  ;;  %v4933_v19 = vadd.f32 %v3531_v0, %v1502_v54  ;;  %v3689_v44 = vtrunc.f32 %v603_v41 }
 0x21e   : > { %v4955_v10 = vcvt.f32.s32 %v3699_v50 }
 0x21f   : > { %v3471_v20 = vpop.f32.mrb[48].mxu0  ;;  %v4938_v25 = vadd.f32 %v3534_v16, %v1505_v9  ;;  %2143 = vperm.xlu1 %3860, %v4936_v21   ;;  %v3690_v60 = vcvt.f32.s32 %v3689_v44 }
 0x220   : > { %v3472_v24 = vpop.f32.mrb[49].mxu0  ;;  %2134 = vperm.xlu0 %3859, %v4942_v29  }
 0x221   : > { %v3473_v31 = vadd.f32 %v3472_v24, %v3471_v20  ;;  %v3474_v36 = vpop.f32.mrb[50].mxu0  ;;  %v3535_v39 = vpop.f32.mrb[48].mxu1  ;;  %v3694_v20 = vcvt.f32.s32 %v3693_v63  ;;  %v4311_v63 = vmov 1  }
 0x222   : > { %v3475_v42 = vpop.f32.mrb[51].mxu0  ;;  %v3536_v46 = vpop.f32.mrb[49].mxu1 }
 0x223   : > { %v1510_v8 = vadd.f32 %v3473_v31, %v4786_v59  ;;  %v3476_v45 = vadd.f32 %v3475_v42, %v3474_v36  ;;  %v3537_v54 = vadd.f32 %v3536_v46, %v3535_v39  ;;  %v3538_v57 = vpop.f32.mrb[50].mxu1  ;;  %2149 = vperm.xlu1 %3860, %v4947_v49  }
 0x224   : > { %v3539_v1 = vpop.f32.mrb[51].mxu1  ;;  %2140 = vperm.xlu0 %3859, %v3690_v60  }
 0x225   : > { %v1513_v0 = vadd.f32 %v3476_v45, %v4788_v62  ;;  %v3540_v7 = vadd.f32 %v3539_v1, %v3538_v57  ;;  %v4952_v9 = vadd.f32 %v3537_v54, %v1510_v8  ;;  %v3698_v8 = vcvt.f32.s32 %v3697_v23 }
 0x227   : > { %v3477_v59 = vpop.f32.mrb[52].mxu0  ;;  %v4957_v16 = vadd.f32 %v3540_v7, %v1513_v0  ;;  %2155 = vperm.xlu1 %3860, %v4955_v10  }
 0x228   : > { %v3478_v41 = vpop.f32.mrb[53].mxu0  ;;  %2146 = vperm.xlu0 %3859, %v3694_v20  }
 0x229   : > { %v3479_v24 = vadd.f32 %v3478_v41, %v3477_v59  ;;  %v3480_v28 = vpop.f32.mrb[54].mxu0  ;;  %v3541_v44 = vpop.f32.mrb[52].mxu1 }
 0x22a   : > { %v3481_v62 = vpop.f32.mrb[55].mxu0  ;;  %v3542_v37 = vpop.f32.mrb[53].mxu1 }
 0x22b   : > { %v1518_v31 = vadd.f32 %v3479_v24, %v4792_v14  ;;  %v3482_v36 = vadd.f32 %v3481_v62, %v3480_v28  ;;  %v3543_v39 = vadd.f32 %v3542_v37, %v3541_v44  ;;  %v3544_v42 = vpop.f32.mrb[54].mxu1  ;;  %3861 = vset.pattern.permute.xlu1 %v4311_v63 }
 0x22c   : > { %v3545_v46 = vpop.f32.mrb[55].mxu1  ;;  %2439 = vperm.xlu1 %3861, %v4891_v53   ;;  %2152 = vperm.xlu0 %3859, %v3698_v8  }
 0x22d   : > { %v1521_v45 = vadd.f32 %v3482_v36, %v4794_v17  ;;  %v3546_v50 = vadd.f32 %v3545_v46, %v3544_v42  ;;  %v4962_v54 = vadd.f32 %v3543_v39, %v1518_v31 }
 0x22f   : > { %v3483_v57 = vpop.f32.mrb[56].mxu0  ;;  %v4964_v1 = vadd.f32 %v3546_v50, %v1521_v45 }
 0x230   : > { %v3484_v0 = vpop.f32.mrb[57].mxu0  ;;  %2445 = vperm.xlu1 %3861, %v4866_v43   ;;  %3862 = vset.pattern.permute.xlu0 %v4311_v63 }
 0x231   : > { %v3485_v14 = vadd.f32 %v3484_v0, %v3483_v57  ;;  %v3486_v2 = vpop.f32.mrb[58].mxu0  ;;  %v3547_v7 = vpop.f32.mrb[56].mxu1  ;;  %2442 = vperm.xlu0 %3862, %v4906_v22  }
 0x232   : > { %v3487_v59 = vpop.f32.mrb[59].mxu0  ;;  %v3548_v23 = vpop.f32.mrb[57].mxu1 }
 0x233   : > { %v1526_v41 = vadd.f32 %v3485_v14, %v4798_v32  ;;  %v3488_v17 = vadd.f32 %v3487_v59, %v3486_v2  ;;  %v3549_v24 = vadd.f32 %v3548_v23, %v3547_v7  ;;  %v3550_v28 = vpop.f32.mrb[58].mxu1 }
 0x234   : > { %v3551_v62 = vpop.f32.mrb[59].mxu1  ;;  %2448 = vperm.xlu1 %3861, %v4879_v11  }
 0x235   : > { %v1529_v44 = vadd.f32 %v3488_v17, %v4800_v35  ;;  %v3552_v53 = vadd.f32 %v3551_v62, %v3550_v28  ;;  %v4971_v31 = vadd.f32 %v3549_v24, %v1526_v41  ;;  %2469 = vperm.xlu0 %3862, %v3690_v60  }
 0x237   : > { %v3489_v36 = vpop.f32.mrb[60].mxu0  ;;  %v4973_v39 = vadd.f32 %v3552_v53, %v1529_v44 }
 0x238   : > { %v3490_v37 = vpop.f32.mrb[61].mxu0  ;;  %2451 = vperm.xlu1 %3861, %v4920_v27  }
 0x239   : > { %v3491_v32 = vadd.f32 %v3490_v37, %v3489_v36  ;;  %v3492_v42 = vpop.f32.mrb[62].mxu0  ;;  %v3553_v45 = vpop.f32.mrb[60].mxu1  ;;  %2475 = vperm.xlu0 %3862, %v3694_v20  }
 0x23a   : > { %v3493_v43 = vpop.f32.mrb[63].mxu0  ;;  %v3554_v50 = vpop.f32.mrb[61].mxu1 }
 0x23b   : > { %v1534_v46 = vadd.f32 %v3491_v32, %v4804_v51  ;;  %v3494_v35 = vadd.f32 %v3493_v43, %v3492_v42  ;;  %v3555_v57 = vadd.f32 %v3554_v50, %v3553_v45  ;;  %v3556_v22 = vpop.f32.mrb[62].mxu1 }
 0x23c   : > { %v3557_v0 = vpop.f32.mrb[63].mxu1  ;;  %2454 = vperm.xlu1 %3861, %v4901_v15  }
 0x23d   : > { %v1537_v63 = vadd.f32 %v3494_v35, %v4806_v55  ;;  %v3558_v14 = vadd.f32 %v3557_v0, %v3556_v22  ;;  %v4979_v2 = vadd.f32 %v3555_v57, %v1534_v46  ;;  %2481 = vperm.xlu0 %3862, %v3698_v8  }
 0x23f   : > { %v3636_v11 = vpop.f32.mrb[64].mxu0  ;;  %v4982_v59 = vadd.f32 %v3558_v14, %v1537_v63 }
 0x240   : > { %v1680_v60 = vadd.f32 %v3636_v11, %v4870_v47  ;;  %v1671_v7 = vpop.f32.mrb[65].mxu0  ;;  %2457 = vperm.xlu1 %3861, %v4929_v40  }
 0x241   : > { %v1672_v51 = vadd.f32 %v1671_v7, %v4827_v12  ;;  %v3637_v41 = vpop.f32.mrb[66].mxu0 }
 0x242   : > { %v1736_v27 = vmax.f32 %v1680_v60, 0.0  ;;  %v1683_v55 = vadd.f32 %v3637_v41, %v4887_v56  ;;  %v1674_v17 = vpop.f32.mrb[67].mxu0 }
 0x243   : > { %v1734_v20 = vmax.f32 %v1672_v51, 0.0  ;;  %v1675_v23 = vadd.f32 %v1674_v17, %v4842_v18 }
 0x244   : > { %v1737_v24 = vmax.f32 %v1683_v55, 0.0  ;;  %v1752_v28 = vmin.f32 %v1736_v27, 1.0  ;;  %2460 = vperm.xlu1 %3861, %v4914_v33  }
 0x245   : > { %v1735_v47 = vmax.f32 %v1675_v23, 0.0  ;;  %v1750_v62 = vmin.f32 %v1734_v20, 1.0 }
 0x246   : > { %v1753_v44 = vmin.f32 %v1737_v24, 1.0 }
 0x247   : > { %v1751_v53 = vmin.f32 %v1735_v47, 1.0  ;;  %v3640_v15 = vpop.f32.mrb[68].mxu0 }
 0x248   : > { %v1767_v36 = vpack.c.bf16 %v1753_v44, %v1752_v28  ;;  %v1696_v12 = vadd.f32 %v3640_v15, %v4933_v19  ;;  %v1687_v8 = vpop.f32.mrb[69].mxu0  ;;  %2463 = vperm.xlu1 %3861, %v4942_v29   ;;  %v3969_v44 = vld [vmem:[%s5525_s6 + $0x38] sm:$0xff]  }
 0x249   : > { %v1766_v56 = vpack.c.bf16 %v1751_v53, %v1750_v62  ;;  %v1688_v37 = vadd.f32 %v1687_v8, %v4910_v30  ;;  %v3641_v32 = vpop.f32.mrb[70].mxu0  ;;  %v3970_v62 = vld [vmem:[%s4585_s13 + $0x88] sm:$0xff]  ;;  %v3971_v53 = vld [vmem:[%s4585_s13 + $0x40] sm:$0xff]  ;;  %v3972_v15 = vld [vmem:[%s4585_s13 + $0x118] sm:$0xff] }
 0x24a   : > { %v1740_v18 = vmax.f32 %v1696_v12, 0.0  ;;  %v1699_v42 = vadd.f32 %v3641_v32, %v4938_v25  ;;  %v1690_v40 = vpop.f32.mrb[71].mxu0  ;;  %2518 = vrot.lane.b32.xlu0 %v3971_v53, %s4312_s19  ;;  %v3974_v12 = vld [vmem:[%s4585_s13 + $0x1a8] sm:$0xff]  ;;  %v3975_v8 = vld [vmem:[%s4585_s13 + $0x160] sm:$0xff] }
 0x24b   : > { %v1738_v45 = vmax.f32 %v1688_v37, 0.0  ;;  %v1691_v43 = vadd.f32 %v1690_v40, %v4916_v38  ;;  %1915 = vmatmul.mubr.bf16.vlgmr.msra.gmra.mrb[64].mxu1 %v1766_v56  ;;  %v3976_v56 = vld [vmem:[%s4585_s13 + $0x238] sm:$0xff]  ;;  %v3977_v37 = vld [vmem:[%s4585_s13 + $0x1f0] sm:$0xff]  ;;  %v3978_v32 = vld [vmem:[%s4585_s13 + $0x2c8] sm:$0xff] }
 0x24c   : > { %v1741_v46 = vmax.f32 %v1699_v42, 0.0  ;;  %1924 = vmatprep.mubr.bf16.mxu1 %v4310_v3  ;;  %3658 = vmatpush3.bf16.msra.mxu1 %v4818_v4  ;;  %v1756_v30 = vmin.f32 %v1740_v18, 1.0  ;;  %v3979_v18 = vld [vmem:[%s4585_s13 + $0x280] sm:$0xff]  ;;  %v3980_v42 = vld [vmem:[%s4585_s13 + $0x358] sm:$0xff]  ;;  %v3981_v40 = vld [vmem:[%s4585_s13 + $0x310] sm:$0xff] }
 0x24d   : > { %v1739_v19 = vmax.f32 %v1691_v43, 0.0  ;;  %3651 = vmatprep.subr.bf16.mxu1 %v4823_v5  ;;  %v1754_v35 = vmin.f32 %v1738_v45, 1.0  ;;  %2466 = vperm.xlu1 %3861, %v4925_v61   ;;  %v3982_v45 = vld [vmem:[%s4585_s13 + $0x3e8] sm:$0xff]  ;;  %v3983_v43 = vld [vmem:[%s4585_s13 + $0x3a0] sm:$0xff] }
 0x24e   : > { %v1757_v33 = vmin.f32 %v1741_v46, 1.0  ;;  %v3984_v46 = vld [vmem:[%s4585_s13 + $0x478] sm:$0xff] }
 0x24f   : > { %v1755_v50 = vmin.f32 %v1739_v19, 1.0  ;;  %v3644_v25 = vpop.f32.mrb[72].mxu0  ;;  %v3985_v19 = vld [vmem:[%s4585_s13 + $0x430] sm:$0xff] }
 0x250   : > { %v1769_v57 = vpack.c.bf16 %v1757_v33, %v1756_v30  ;;  %v1712_v22 = vadd.f32 %v3644_v25, %v4962_v54  ;;  %v1703_v38 = vpop.f32.mrb[73].mxu0  ;;  %3659 = vmatpush3.bf16.msra.mxu1 %v4834_v13 }
 0x251   : > { %v1768_v63 = vpack.c.bf16 %v1755_v50, %v1754_v35  ;;  %v1704_v0 = vadd.f32 %v1703_v38, %v4952_v9  ;;  %v3645_v4 = vpop.f32.mrb[74].mxu0  ;;  %3652 = vmatprep.subr.bf16.mxu1 %v4840_v58  ;;  %2472 = vperm.xlu1 %3861, %v4936_v21  }
 0x252   : > { %v1744_v5 = vmax.f32 %v1712_v22, 0.0  ;;  %v1715_v29 = vadd.f32 %v3645_v4, %v4964_v1  ;;  %v1706_v14 = vpop.f32.mrb[75].mxu0 }
 0x253   : > { %v1742_v11 = vmax.f32 %v1704_v0, 0.0  ;;  %v1707_v60 = vadd.f32 %v1706_v14, %v4957_v16  ;;  %1925 = vmatmul.mubr.bf16.gmra.mrb[68].mxu1 %v1767_v36  ;;  %v3973_v36 = vld [vmem:[%s4585_s13 + $0xd0] sm:$0xff] }
 0x254   : > { %v1745_v54 = vmax.f32 %v1715_v29, 0.0  ;;  %1934 = vmatprep.mubr.bf16.mxu1 %v4310_v3  ;;  %3660 = vmatpush3.bf16.msra.mxu1 %v4855_v26  ;;  %v1760_v61 = vmin.f32 %v1744_v5, 1.0 }
 0x255   : > { %v1743_v13 = vmax.f32 %v1707_v60, 0.0  ;;  %3653 = vmatprep.subr.bf16.mxu1 %v4862_v34  ;;  %v1758_v9 = vmin.f32 %v1742_v11, 1.0  ;;  %2478 = vperm.xlu1 %3861, %v4947_v49  }
 0x256   : > { %v1761_v58 = vmin.f32 %v1745_v54, 1.0  ;;  %2522 = vrot.lane.b32.xlu0 %v3973_v36, %s4312_s19 }
 0x257   : > { %v1759_v7 = vmin.f32 %v1743_v13, 1.0  ;;  %v3648_v1 = vpop.f32.mrb[76].mxu0 }
 0x258   : > { %v1771_v51 = vpack.c.bf16 %v1761_v58, %v1760_v61  ;;  %v1728_v41 = vadd.f32 %v3648_v1, %v4979_v2  ;;  %v1719_v16 = vpop.f32.mrb[77].mxu0  ;;  %3661 = vmatpush3.bf16.msra.mxu1 %v4876_v48  ;;  %v1792_v58 = vlaneseq }
 0x259   : > { %v1770_v27 = vpack.c.bf16 %v1759_v7, %v1758_v9  ;;  %v1720_v55 = vadd.f32 %v1719_v16, %v4971_v31  ;;  %v3649_v26 = vpop.f32.mrb[78].mxu0  ;;  %3654 = vmatprep.subr.bf16.mxu1 %v4885_v52  ;;  %2484 = vperm.xlu1 %3861, %v4955_v10   ;;  %v3965_v10 = vld [vmem:[%s5525_s6 + $0x28] sm:$0xff]  }
 0x25a   : > { %v1748_v34 = vmax.f32 %v1728_v41, 0.0  ;;  %v1731_v21 = vadd.f32 %v3649_v26, %v4982_v59  ;;  %v1722_v17 = vpop.f32.mrb[79].mxu0  ;;  %v3968_v59 = vld [vmem:[%s5525_s6 + $0x78] sm:$0xff]   ;;  %2526 = vrot.lane.b32.xlu0 %v3975_v8, %s4312_s19  ;;  %v1793_v7 = vshrl.u32 %v1792_v58, 7  ;;  %v1790_v16 = vld [vmem:[#allocation9] sm:$0x3] }
 0x25b   : > { %v1746_v20 = vmax.f32 %v1720_v55, 0.0  ;;  %v1723_v23 = vadd.f32 %v1722_v17, %v4973_v39  ;;  %1935 = vmatmul.mubr.bf16.gmra.mrb[72].mxu1 %v1768_v63  ;;  %v3966_v39 = vld [vmem:[%s5525_s6 + $0x70] sm:$0xff]  }
 0x25c   : > { %v1749_v2 = vmax.f32 %v1731_v21, 0.0  ;;  %1944 = vmatprep.mubr.bf16.mxu1 %v4310_v3  ;;  %3662 = vmatpush3.bf16.msra.mxu1 %v4897_v6  ;;  %v1764_v31 = vmin.f32 %v1748_v34, 1.0  ;;  %v3964_v6 = vld [vmem:[%s5525_s6 + $0x68] sm:$0xff]   ;;  %v1794_v41 = vsub.s32 0, %v1793_v7 }
 0x25d   : > { %v1747_v48 = vmax.f32 %v1723_v23, 0.0  ;;  %v1762_v24 = vmin.f32 %v1746_v20, 1.0  ;;  %3578 = vmatprep.subr.bf16.mxu0 %v3964_v6  ;;  %3655 = vmatprep.subr.bf16.mxu1 %v3964_v6 }
 0x25e   : > { %v1765_v49 = vmin.f32 %v1749_v2, 1.0  ;;  %3579 = vmatpush3.bf16.msra.mxu0 %v3965_v10  ;;  %2520 = vrot.lane.b32.xlu1 %v3970_v62, %s4312_s19  ;;  %v5121_v34 = vrot.slane %v1790_v16, %v1794_v41 }
 0x25f   : > { %v1763_v52 = vmin.f32 %v1747_v48, 1.0  ;;  %3580 = vmatprep.subr.bf16.mxu0 %v3966_v39  ;;  %2530 = vrot.lane.b32.xlu0 %v3977_v37, %s4312_s19 }
 0x260   : > { %v1773_v47 = vpack.c.bf16 %v1765_v49, %v1764_v31  ;;  %3663 = vmatpush3.bf16.msra.mxu1 %v3965_v10 }
 0x261   : > { %v1772_v28 = vpack.c.bf16 %v1763_v52, %v1762_v24  ;;  %3656 = vmatprep.subr.bf16.mxu1 %v3966_v39 }
 0x262   : > { %2524 = vrot.lane.b32.xlu1 %v3972_v15, %s4312_s19 }
 0x263   : > { %1945 = vmatmul.mubr.bf16.gmra.mrb[76].mxu1 %v1769_v57  ;;  %2534 = vrot.lane.b32.xlu0 %v3979_v18, %s4312_s19 }
 0x264   : > { %1954 = vmatprep.mubr.bf16.mxu1 %v4310_v3 }
 0x266   : > { %2528 = vrot.lane.b32.xlu1 %v3974_v12, %s4312_s19 }
 0x267   : > { %2538 = vrot.lane.b32.xlu0 %v3981_v40, %s4312_s19 }
 0x26a   : > { %2532 = vrot.lane.b32.xlu1 %v3976_v56, %s4312_s19 }
 0x26b   : > { %1955 = vmatmul.mubr.bf16.gmra.mrb[80].mxu1 %v1770_v27  ;;  %2542 = vrot.lane.b32.xlu0 %v3983_v43, %s4312_s19  ;;  %v1798_v27 = vsub.s32 1, %v1793_v7 }
 0x26c   : > { %1964 = vmatprep.mubr.bf16.mxu1 %v4310_v3 }
 0x26d   : > { %v5123_v21 = vrot.slane %v1790_v16, %v1798_v27 }
 0x26e   : > { %2536 = vrot.lane.b32.xlu1 %v3978_v32, %s4312_s19 }
 0x26f   : > { %2546 = vrot.lane.b32.xlu0 %v3985_v19, %s4312_s19 }
 0x272   : > { %2540 = vrot.lane.b32.xlu1 %v3980_v42, %s4312_s19 }
 0x273   : > { %1965 = vmatmul.mubr.bf16.gmra.mrb[84].mxu1 %v1771_v51 }
 0x274   : > { %1974 = vmatprep.mubr.bf16.mxu1 %v4310_v3 }
 0x276   : > { %2544 = vrot.lane.b32.xlu1 %v3982_v45, %s4312_s19 }
 0x27a   : > { %2548 = vrot.lane.b32.xlu1 %v3984_v46, %s4312_s19 }
 0x27b   : > { %1975 = vmatmul.mubr.bf16.gmra.mrb[88].mxu1 %v1772_v28 }
 0x27c   : > { %1984 = vmatprep.mubr.bf16.mxu1 %v4310_v3  ;;  %v3967_v3 = vld [vmem:[%s5525_s6 + $0x30] sm:$0xff]  }
 0x27d   : > { %3581 = vmatpush3.bf16.msra.mxu0 %v3967_v3  ;;  %3664 = vmatpush3.bf16.msra.mxu1 %v3967_v3 }
 0x27e   : > { %3582 = vmatprep.subr.bf16.mxu0 %v3968_v59  ;;  %3657 = vmatprep.subr.bf16.mxu1 %v3968_v59  ;;  %v5073_v30 = vpop.permute.xlu1 %2116 }
 0x281   : > { %3583 = vmatpush3.bf16.msra.mxu0 %v3969_v44  ;;  %3665 = vmatpush3.bf16.msra.mxu1 %v3969_v44 }
 0x283   : > { %1985 = vmatmul.mubr.bf16.gmra.mrb[92].mxu1 %v1773_v47 }
 0x28e   : > { %v5075_v33 = vpop.permute.xlu1 %2119 }
 0x28f   : > { %v5079_v50 = vpop.permute.xlu0 %2110 }
 0x292   : > { %v5077_v35 = vpop.permute.xlu1 %2125 }
 0x293   : > { %v5083_v57 = vpop.permute.xlu0 %2113 }
 0x296   : > { %v5081_v25 = vpop.permute.xlu1 %2131 }
 0x297   : > { %v5089_v63 = vpop.permute.xlu0 %2122 }
 0x29a   : > { %v5085_v22 = vpop.permute.xlu1 %2137 }
 0x29b   : > { %v5093_v4 = vpop.permute.xlu0 %2128 }
 0x29e   : > { %v5087_v38 = vpop.permute.xlu1 %2143 }
 0x29f   : > { %v5099_v14 = vpop.permute.xlu0 %2134 }
 0x2a2   : > { %v5091_v0 = vpop.permute.xlu1 %2149 }
 0x2a3   : > { %v5103_v60 = vpop.permute.xlu0 %2140 }
 0x2a6   : > { %v5095_v5 = vpop.permute.xlu1 %2155 }
 0x2a7   : > { %v5109_v61 = vpop.permute.xlu0 %2146 }
 0x2ab   : > { %v5097_v29 = vpop.permute.xlu1 %2439  ;;  %v5113_v1 = vpop.permute.xlu0 %2152 }
 0x2af   : > { %v5101_v11 = vpop.permute.xlu1 %2445 }
 0x2b0   : > { %v5119_v26 = vpop.permute.xlu0 %2442 }
 0x2b3   : > { %v5105_v54 = vpop.permute.xlu1 %2448 }
 0x2b4   : > { %v5128_v48 = vpop.permute.xlu0 %2469 }
 0x2b7   : > { %v5107_v13 = vpop.permute.xlu1 %2451 }
 0x2b8   : > { %v5137_v12 = vpop.permute.xlu0 %2475 }
 0x2bb   : > { %v5111_v9 = vpop.permute.xlu1 %2454 }
 0x2bf   : > { %v5115_v51 = vpop.permute.xlu1 %2457 }
 0x2c3   : > { %v5117_v55 = vpop.permute.xlu1 %2460 }
 0x2c7   : > { %v5125_v17 = vpop.permute.xlu1 %2463 }
 0x2cc   : > { %v5131_v24 = vpop.permute.xlu1 %2466 }
 0x2d0   : > { %v5135_v59 = vpop.permute.xlu1 %2472 }
 0x2d4   : > { %v5141_v40 = vpop.permute.xlu1 %2478 }
 0x2d8   : > { %v5145_v27 = vpop.permute.xlu1 %2484 }
 0x31e   : > { %v1916_v20 = vpop.f32.mrb[64].mxu1 }
 0x31f   : > { %v1917_v23 = vadd.f32 %v1916_v20, %v5121_v34  ;;  %v1918_v2 = vpop.f32.mrb[65].mxu1  ;;  %v5147_v20 = vpop.permute.xlu0 %2481 }
 0x320   : > { %v1919_v31 = vadd.f32 %v1918_v2, %v5123_v21  ;;  %v1920_v49 = vpop.f32.mrb[66].mxu1 }
 0x321   : > { %v1995_v52 = vmax.f32 %v1917_v23, 0.0  ;;  %v1921_v47 = vadd.f32 %v1920_v49, %v5121_v34  ;;  %v1922_v28 = vpop.f32.mrb[67].mxu1 }
 0x322   : > { %v1996_v6 = vmax.f32 %v1919_v31, 0.0  ;;  %v1923_v10 = vadd.f32 %v1922_v28, %v5123_v21 }
 0x323   : > { %v1997_v39 = vmax.f32 %v1921_v47, 0.0  ;;  %v2027_v44 = vmin.f32 %v1995_v52, 1.0  ;;  %v5149_v47 = vand.u32 127, %v1792_v58 }
 0x324   : > { %v1998_v3 = vmax.f32 %v1923_v10, 0.0  ;;  %v2028_v53 = vmin.f32 %v1996_v6, 1.0 }
 0x325   : > { %v2029_v62 = vmin.f32 %v1997_v39, 1.0  ;;  %vm2487_vm1 = vcmp.eq.s32.totalorder %v5149_v47, %v5119_v26  ;;  %vm2486_vm2 = vcmp.eq.s32.totalorder %v5149_v47, %v5097_v29  ;;  %vm2488_vm4 = vcmp.eq.s32.totalorder %v5149_v47, %v5101_v11  ;;  %v3991_v11 = vld [vmem:[%s4585_s13 + $0x140] sm:$0xff] }
 0x326   : > { %v2030_v15 = vmin.f32 %v1998_v3, 1.0  ;;  %v1926_v36 = vpop.f32.mrb[68].mxu1  ;;  %vm2489_vm5 = vcmp.eq.s32.totalorder %v5149_v47, %v5105_v54  ;;  %vm2490_vm6 = vcmp.eq.s32.totalorder %v5149_v47, %v5107_v13  ;;  %vm2491_vm7 = vcmp.eq.s32.totalorder %v5149_v47, %v5111_v9 }
 0x327   : > { %v2059_v8 = vpack.c.bf16 %v2029_v62, %v2027_v44  ;;  %v1927_v56 = vadd.f32 %v1926_v36, %v5121_v34  ;;  %v1928_v37 = vpop.f32.mrb[69].mxu1  ;;  %v2521_v36 = vpop.permute.xlu1 %2520  ;;  %vm2492_vm8 = vcmp.eq.s32.totalorder %v5149_v47, %v5115_v51  ;;  %vm2493_vm9 = vcmp.eq.s32.totalorder %v5149_v47, %v5117_v55 }
 0x328   : > { %v2060_v32 = vpack.c.bf16 %v2030_v15, %v2028_v53  ;;  %v1929_v18 = vadd.f32 %v1928_v37, %v5123_v21  ;;  %v1930_v42 = vpop.f32.mrb[70].mxu1  ;;  %vm2494_vm10 = vcmp.eq.s32.totalorder %v5149_v47, %v5125_v17  ;;  %vm2495_vm11 = vcmp.eq.s32.totalorder %v5149_v47, %v5131_v24  ;;  %v3997_v24 = vld [vmem:[%s4585_s13 + $0x2f0] sm:$0xff] }
 0x329   : > { %v1999_v45 = vmax.f32 %v1927_v56, 0.0  ;;  %v1931_v43 = vadd.f32 %v1930_v42, %v5121_v34  ;;  %v1932_v46 = vpop.f32.mrb[71].mxu1  ;;  %v3986_v56 = vld [vmem:[%s4585_s13 + $0x68] sm:$0xff]  ;;  %v3987_v42 = vld [vmem:[%s4585_s13 + $0x20] sm:$0xff]  ;;  %vm2497_vm12 = vcmp.eq.s32.totalorder %v5149_v47, %v5135_v59  ;;  %vm2496_vm13 = vcmp.eq.s32.totalorder %v5149_v47, %v5128_v48 }
 0x32a   : > { %v2000_v19 = vmax.f32 %v1929_v18, 0.0  ;;  %v1933_v7 = vadd.f32 %v1932_v46, %v5123_v21  ;;  %2308 = vmatprep.mubr.bf16.mxu0 %v2060_v32  ;;  %v2567_v37 = vsub.f32 %v3986_v56, %v2521_v36  ;;  %v2519_v32 = vpop.permute.xlu0 %2518  ;;  %vm2498_vm14 = vcmp.eq.s32.totalorder %v5149_v47, %v5137_v12 }
 0x32b   : > { %v2001_v41 = vmax.f32 %v1931_v43, 0.0  ;;  %2309 = vmatmul.mubr.bf16.vlgmr.msra.gmra.mrb[80].mxu0 %v2059_v8  ;;  %v2031_v23 = vmin.f32 %v1999_v45, 1.0  ;;  %v2566_v45 = vsub.f32 %v3987_v42, %v2519_v32  ;;  %vm2499_vm15 = vcmp.eq.s32.totalorder %v5149_v47, %v5141_v40  ;;  %v4000_v40 = vld [vmem:[%s4585_s13 + $0x410] sm:$0xff] }
 0x32c   : > { %v2002_v16 = vmax.f32 %v1933_v7, 0.0  ;;  %v2032_v31 = vmin.f32 %v2000_v19, 1.0  ;;  %v2583_v46 = vsel %vm2487_vm1, %v2567_v37, 0.0  ;;  %vm2500_vm0 = vcmp.eq.s32.totalorder %v5149_v47, %v5147_v20 }
 0x32d   : > { %v2033_v2 = vmin.f32 %v2001_v41, 1.0  ;;  %v2525_v41 = vpop.permute.xlu1 %2524  ;;  %vm2157_vm1 = vcmp.eq.s32.totalorder %v5149_v47, %v5079_v50 }
 0x32e   : > { %v2034_v49 = vmin.f32 %v2002_v16, 1.0  ;;  %v1936_v52 = vpop.f32.mrb[72].mxu1  ;;  %v2582_v16 = vsel %vm2486_vm2, %v2566_v45, 0.0  ;;  %v3990_v45 = vld [vmem:[%s4585_s13 + $0x188] sm:$0xff]  ;;  %vm2158_vm2 = vcmp.eq.s32.totalorder %v5149_v47, %v5083_v57 }
 0x32f   : > { %v2061_v28 = vpack.c.bf16 %v2033_v2, %v2031_v23  ;;  %v1937_v6 = vadd.f32 %v1936_v52, %v5121_v34  ;;  %v1938_v10 = vpop.f32.mrb[73].mxu1  ;;  %v2601_v23 = vsel %vm2389_vm3, %v2583_v46, 0.0  ;;  %v3988_v52 = vld [vmem:[%s4585_s13 + $0xf8] sm:$0xff] }
 0x330   : > { %v2062_v39 = vpack.c.bf16 %v2034_v49, %v2032_v31  ;;  %v1939_v3 = vadd.f32 %v1938_v10, %v5123_v21  ;;  %v1940_v44 = vpop.f32.mrb[74].mxu1  ;;  %v2598_v10 = vsel %vm2389_vm3, %v2582_v16, 0.0  ;;  %2602 = vadd.xlane.f32.xlu1 %v2601_v23 }
 0x331   : > { %v2003_v62 = vmax.f32 %v1937_v6, 0.0  ;;  %v1941_v53 = vadd.f32 %v1940_v44, %v5121_v34  ;;  %v1942_v15 = vpop.f32.mrb[75].mxu1  ;;  %v2523_v6 = vpop.permute.xlu0 %2522  ;;  %v3989_v44 = vld [vmem:[%s4585_s13 + $0xb0] sm:$0xff]  ;;  %2599 = vadd.xlane.f32.xlu0 %v2598_v10 }
 0x332   : > { %v2004_v58 = vmax.f32 %v1939_v3, 0.0  ;;  %v1943_v8 = vadd.f32 %v1942_v15, %v5123_v21  ;;  %2316 = vmatprep.mubr.bf16.mxu0 %v2062_v39  ;;  %v2529_v56 = vpop.permute.xlu1 %2528 }
 0x333   : > { %v2005_v18 = vmax.f32 %v1941_v53, 0.0  ;;  %2317 = vmatmul.mubr.bf16.gmra.mrb[84].mxu0 %v2061_v28  ;;  %v2035_v19 = vmin.f32 %v2003_v62, 1.0  ;;  %v2569_v28 = vsub.f32 %v3988_v52, %v2525_v41  ;;  %v2568_v62 = vsub.f32 %v3989_v44, %v2523_v6 }
 0x334   : > { %v2006_v43 = vmax.f32 %v1943_v8, 0.0  ;;  %v2036_v2 = vmin.f32 %v2004_v58, 1.0 }
 0x335   : > { %v2037_v7 = vmin.f32 %v2005_v18, 1.0  ;;  %v2584_v37 = vsel %vm2488_vm4, %v2568_v62, 0.0  ;;  %v2585_v32 = vsel %vm2489_vm5, %v2569_v28, 0.0  ;;  %vm2159_vm4 = vcmp.eq.s32.totalorder %v5149_v47, %v5073_v30 }
 0x336   : > { %v2038_v31 = vmin.f32 %v2006_v43, 1.0  ;;  %v1946_v49 = vpop.f32.mrb[76].mxu1  ;;  %v2571_v43 = vsub.f32 %v3990_v45, %v2529_v56  ;;  %v2604_v46 = vsel %vm2389_vm3, %v2584_v37, 0.0  ;;  %v2607_v16 = vsel %vm2389_vm3, %v2585_v32, 0.0 }
 0x337   : > { %v2063_v26 = vpack.c.bf16 %v2037_v7, %v2035_v19  ;;  %v1947_v39 = vadd.f32 %v1946_v49, %v5121_v34  ;;  %v1948_v3 = vpop.f32.mrb[77].mxu1  ;;  %v2527_v19 = vpop.permute.xlu0 %2526  ;;  %2605 = vadd.xlane.f32.xlu0 %v2604_v46  ;;  %vm2160_vm5 = vcmp.eq.s32.totalorder %v5149_v47, %v5075_v33 }
 0x338   : > { %v2064_v29 = vpack.c.bf16 %v2038_v31, %v2036_v2  ;;  %v1949_v53 = vadd.f32 %v1948_v3, %v5123_v21  ;;  %v1950_v15 = vpop.f32.mrb[78].mxu1  ;;  %v2570_v41 = vsub.f32 %v3991_v11, %v2527_v19  ;;  %v2533_v31 = vpop.permute.xlu1 %2532  ;;  %v2587_v49 = vsel %vm2491_vm7, %v2571_v43, 0.0  ;;  %v3994_v19 = vld [vmem:[%s4585_s13 + $0x2a8] sm:$0xff] }
 0x339   : > { %v2007_v36 = vmax.f32 %v1947_v39, 0.0  ;;  %v1951_v58 = vadd.f32 %v1950_v15, %v5121_v34  ;;  %v1952_v8 = vpop.f32.mrb[79].mxu1  ;;  %v3993_v15 = vld [vmem:[%s4585_s13 + $0x1d0] sm:$0xff]  ;;  %vm2162_vm7 = vcmp.eq.s32.totalorder %v5149_v47, %v5077_v35 }
 0x33a   : > { %v2008_v18 = vmax.f32 %v1949_v53, 0.0  ;;  %v1953_v42 = vadd.f32 %v1952_v8, %v5123_v21  ;;  %2324 = vmatprep.mubr.bf16.mxu0 %v2064_v29  ;;  %v2586_v52 = vsel %vm2490_vm6, %v2570_v41, 0.0  ;;  %v2613_v8 = vsel %vm2389_vm3, %v2587_v49, 0.0 }
 0x33b   : > { %v2009_v7 = vmax.f32 %v1951_v58, 0.0  ;;  %2325 = vmatmul.mubr.bf16.gmra.mrb[88].mxu0 %v2063_v26  ;;  %v2039_v23 = vmin.f32 %v2007_v36, 1.0  ;;  %v3992_v26 = vld [vmem:[%s4585_s13 + $0x218] sm:$0xff]  ;;  %v2531_v3 = vpop.permute.xlu0 %2530  ;;  %v2610_v44 = vsel %vm2389_vm3, %v2586_v52, 0.0  ;;  %2608 = vadd.xlane.f32.xlu0 %v2607_v16  ;;  %v3995_v16 = vld [vmem:[%s4585_s13 + $0x260] sm:$0xff]  ;;  %vm2161_vm6 = vcmp.eq.s32.totalorder %v5149_v47, %v5089_v63 }
 0x33c   : > { %v2010_v54 = vmax.f32 %v1953_v42, 0.0  ;;  %v2040_v28 = vmin.f32 %v2008_v18, 1.0  ;;  %v2573_v39 = vsub.f32 %v3992_v26, %v2533_v31  ;;  %v2572_v9 = vsub.f32 %v3993_v15, %v2531_v3  ;;  %2611 = vadd.xlane.f32.xlu1 %v2610_v44  ;;  %v2537_v18 = vpop.permute.xlu1 %2536 }
 0x33d   : > { %v2041_v2 = vmin.f32 %v2009_v7, 1.0  ;;  %v2575_v7 = vsub.f32 %v3994_v19, %v2537_v18 }
 0x33e   : > { %v2042_v6 = vmin.f32 %v2010_v54, 1.0  ;;  %v1956_v10 = vpop.f32.mrb[80].mxu1  ;;  %v2589_v42 = vsel %vm2493_vm9, %v2573_v39, 0.0  ;;  %v2588_v45 = vsel %vm2492_vm8, %v2572_v9, 0.0  ;;  %v3996_v39 = vld [vmem:[%s4585_s13 + $0x338] sm:$0xff]  ;;  %vm2163_vm8 = vcmp.eq.s32.totalorder %v5149_v47, %v5093_v4 }
 0x33f   : > { %v2065_v62 = vpack.c.bf16 %v2041_v2, %v2039_v23  ;;  %v1957_v29 = vadd.f32 %v1956_v10, %v5121_v34  ;;  %v1958_v53 = vpop.f32.mrb[81].mxu1  ;;  %v2535_v11 = vpop.permute.xlu0 %2534  ;;  %v2616_v41 = vsel %vm2389_vm3, %v2588_v45, 0.0  ;;  %2614 = vadd.xlane.f32.xlu0 %v2613_v8  ;;  %v2619_v51 = vsel %vm2389_vm3, %v2589_v42, 0.0 }
 0x340   : > { %v2066_v36 = vpack.c.bf16 %v2042_v6, %v2040_v28  ;;  %v1959_v13 = vadd.f32 %v1958_v53, %v5123_v21  ;;  %v1960_v58 = vpop.f32.mrb[82].mxu1  ;;  %v2574_v55 = vsub.f32 %v3995_v16, %v2535_v11  ;;  %2617 = vadd.xlane.f32.xlu1 %v2616_v41  ;;  %v2541_v49 = vpop.permute.xlu1 %2540  ;;  %v2591_v52 = vsel %vm2495_vm11, %v2575_v7, 0.0 }
 0x341   : > { %v2011_v56 = vmax.f32 %v1957_v29, 0.0  ;;  %v1961_v37 = vadd.f32 %v1960_v58, %v5121_v34  ;;  %v1962_v32 = vpop.f32.mrb[83].mxu1  ;;  %v2577_v3 = vsub.f32 %v3996_v39, %v2541_v49  ;;  %v2625_v58 = vsel %vm2389_vm3, %v2591_v52, 0.0 }
 0x342   : > { %v2012_v43 = vmax.f32 %v1959_v13, 0.0  ;;  %v1963_v46 = vadd.f32 %v1962_v32, %v5123_v21  ;;  %2332 = vmatprep.mubr.bf16.mxu0 %v2066_v36  ;;  %v2590_v28 = vsel %vm2494_vm10, %v2574_v55, 0.0  ;;  %vm2164_vm9 = vcmp.eq.s32.totalorder %v5149_v47, %v5081_v25 }
 0x343   : > { %v2013_v54 = vmax.f32 %v1961_v37, 0.0  ;;  %2333 = vmatmul.mubr.bf16.gmra.mrb[92].mxu0 %v2065_v62  ;;  %v2043_v2 = vmin.f32 %v2011_v56, 1.0  ;;  %v2622_v44 = vsel %vm2389_vm3, %v2590_v28, 0.0  ;;  %v2539_v62 = vpop.permute.xlu0 %2538  ;;  %2620 = vadd.xlane.f32.xlu0 %v2619_v51  ;;  %v2593_v18 = vsel %vm2497_vm12, %v2577_v3, 0.0 }
 0x344   : > { %v2014_v23 = vmax.f32 %v1963_v46, 0.0  ;;  %v2044_v6 = vmin.f32 %v2012_v43, 1.0  ;;  %v2576_v9 = vsub.f32 %v3997_v24, %v2539_v62  ;;  %2623 = vadd.xlane.f32.xlu1 %v2622_v44  ;;  %v2545_v32 = vpop.permute.xlu1 %2544  ;;  %v3998_v46 = vld [vmem:[%s4585_s13 + $0x3c8] sm:$0xff]  ;;  %v2631_v55 = vsel %vm2389_vm3, %v2593_v18, 0.0 }
 0x345   : > { %v2045_v31 = vmin.f32 %v2013_v54, 1.0  ;;  %v2579_v19 = vsub.f32 %v3998_v46, %v2545_v32  ;;  %v3999_v54 = vld [vmem:[%s4585_s13 + $0x380] sm:$0xff]  ;;  %vm2165_vm10 = vcmp.eq.s32.totalorder %v5149_v47, %v5099_v14  ;;  %vm2166_vm11 = vcmp.eq.s32.totalorder %v5149_v47, %v5085_v22 }
 0x346   : > { %v2046_v10 = vmin.f32 %v2014_v23, 1.0  ;;  %v1966_v26 = vpop.f32.mrb[84].mxu1  ;;  %v2592_v42 = vsel %vm2496_vm13, %v2576_v9, 0.0  ;;  %vm2167_vm12 = vcmp.eq.s32.totalorder %v5149_v47, %v5103_v60  ;;  %vm2168_vm13 = vcmp.eq.s32.totalorder %v5149_v47, %v5087_v38 }
 0x347   : > { %v2067_v29 = vpack.c.bf16 %v2045_v31, %v2043_v2  ;;  %v1967_v53 = vadd.f32 %v1966_v26, %v5121_v34  ;;  %v1968_v15 = vpop.f32.mrb[85].mxu1  ;;  %v2543_v7 = vpop.permute.xlu0 %2542  ;;  %v2628_v11 = vsel %vm2389_vm3, %v2592_v42, 0.0  ;;  %2626 = vadd.xlane.f32.xlu0 %v2625_v58  ;;  %v2595_v51 = vsel %vm2499_vm15, %v2579_v19, 0.0 }
 0x348   : > { %v2068_v17 = vpack.c.bf16 %v2046_v10, %v2044_v6  ;;  %v1969_v36 = vadd.f32 %v1968_v15, %v5123_v21  ;;  %v1970_v13 = vpop.f32.mrb[86].mxu1  ;;  %v2578_v16 = vsub.f32 %v3999_v54, %v2543_v7  ;;  %2629 = vadd.xlane.f32.xlu1 %v2628_v11  ;;  %vm2170_vm15 = vcmp.eq.s32.totalorder %v5149_v47, %v5091_v0  ;;  %v4001_v0 = vld [vmem:[%s4585_s13 + $0x458] sm:$0xff]  ;;  %s3157_s13 = sshll.u32 %s4581_s18, 7  ;;  %s2798_s18 = ssub.s32 (%p5553_p5), 38, %s4810_s15 }
 0x349   : > { %v2015_v8 = vmax.f32 %v1967_v53, 0.0  ;;  %v1971_v56 = vadd.f32 %v1970_v13, %v5121_v34  ;;  %v1972_v37 = vpop.f32.mrb[87].mxu1  ;;  %s5382_s26 = scalar_lea.vmem [#allocation12], %s3157_s13   ;;  %p2799_p1 = scmp.lt.s32.totalorder (%p5553_p5), %s2798_s18, 16 }
 0x34a   : > { %v2016_v45 = vmax.f32 %v1969_v36, 0.0  ;;  %v1973_v43 = vadd.f32 %v1972_v37, %v5123_v21  ;;  %2340 = vmatprep.mubr.bf16.mxu0 %v2068_v17  ;;  %v2594_v2 = vsel %vm2498_vm14, %v2578_v16, 0.0  ;;  %vm2169_vm14 = vcmp.eq.s32.totalorder %v5149_v47, %v5109_v61 }
 0x34b   : > { %v2017_v41 = vmax.f32 %v1971_v56, 0.0  ;;  %2341 = vmatmul.mubr.bf16.gmra.mrb[96].mxu0 %v2067_v29  ;;  %v2047_v48 = vmin.f32 %v2015_v8, 1.0  ;;  %v2547_v28 = vpop.permute.xlu0 %2546  ;;  %v2634_v6 = vsel %vm2389_vm3, %v2594_v2, 0.0  ;;  %2632 = vadd.xlane.f32.xlu0 %v2631_v55  ;;  %v2637_v29 = vsel %vm2389_vm3, %v2595_v51, 0.0 }
 0x34c   : > { %v2018_v59 = vmax.f32 %v1973_v43, 0.0  ;;  %v2048_v31 = vmin.f32 %v2016_v45, 1.0  ;;  %v2580_v3 = vsub.f32 %v4000_v40, %v2547_v28  ;;  %2635 = vadd.xlane.f32.xlu1 %v2634_v6  ;;  %v5280_v6 = vld [vmem:[#allocation10] ss:$0 sm:$0xff] }
 0x34d   : > { %v2049_v23 = vmin.f32 %v2017_v41, 1.0 }
 0x34e   : > { %v2050_v49 = vmin.f32 %v2018_v59, 1.0  ;;  %v1976_v52 = vpop.f32.mrb[88].mxu1  ;;  %v2596_v9 = vsel %vm2500_vm0, %v2580_v3, 0.0  ;;  %vm2171_vm0 = vcmp.eq.s32.totalorder %v5149_v47, %v5113_v1 }
 0x34f   : > { %v2069_v10 = vpack.c.bf16 %v2049_v23, %v2047_v48  ;;  %v1977_v26 = vadd.f32 %v1976_v52, %v5121_v34  ;;  %v1978_v39 = vpop.f32.mrb[89].mxu1  ;;  %v2640_v13 = vsel %vm2389_vm3, %v2596_v9, 0.0  ;;  %2638 = vadd.xlane.f32.xlu0 %v2637_v29 }
 0x350   : > { %v2070_v44 = vpack.c.bf16 %v2050_v49, %v2048_v31  ;;  %v1979_v12 = vadd.f32 %v1978_v39, %v5123_v21  ;;  %v1980_v62 = vpop.f32.mrb[90].mxu1  ;;  %2641 = vadd.xlane.f32.xlu1 %v2640_v13 }
 0x351   : > { %v2019_v53 = vmax.f32 %v1977_v26, 0.0  ;;  %v1981_v15 = vadd.f32 %v1980_v62, %v5121_v34  ;;  %v1982_v24 = vpop.f32.mrb[91].mxu1 }
 0x352   : > { %v2020_v17 = vmax.f32 %v1979_v12, 0.0  ;;  %v1983_v36 = vadd.f32 %v1982_v24, %v5123_v21  ;;  %2348 = vmatprep.mubr.bf16.mxu0 %v2070_v44 }
 0x353   : > { %v2021_v58 = vmax.f32 %v1981_v15, 0.0  ;;  %2349 = vmatmul.mubr.bf16.gmra.mrb[100].mxu0 %v2069_v10  ;;  %v2051_v56 = vmin.f32 %v2019_v53, 1.0 }
 0x354   : > { %v2022_v8 = vmax.f32 %v1983_v36, 0.0  ;;  %v2052_v32 = vmin.f32 %v2020_v17, 1.0 }
 0x355   : > { %v2053_v37 = vmin.f32 %v2021_v58, 1.0 }
 0x356   : > { %v2054_v18 = vmin.f32 %v2022_v8, 1.0  ;;  %v1986_v42 = vpop.f32.mrb[92].mxu1 }
 0x357   : > { %v2071_v45 = vpack.c.bf16 %v2053_v37, %v2051_v56  ;;  %v1987_v20 = vadd.f32 %v1986_v42, %v5121_v34  ;;  %v1988_v43 = vpop.f32.mrb[93].mxu1 }
 0x358   : > { %v2072_v46 = vpack.c.bf16 %v2054_v18, %v2052_v32  ;;  %v1989_v19 = vadd.f32 %v1988_v43, %v5123_v21  ;;  %v1990_v7 = vpop.f32.mrb[94].mxu1 }
 0x359   : > { %v2023_v11 = vmax.f32 %v1987_v20, 0.0  ;;  %v1991_v41 = vadd.f32 %v1990_v7, %v5121_v34  ;;  %v1992_v54 = vpop.f32.mrb[95].mxu1 }
 0x35a   : > { %v2024_v16 = vmax.f32 %v1989_v19, 0.0  ;;  %v1993_v59 = vadd.f32 %v1992_v54, %v5123_v21  ;;  %2356 = vmatprep.mubr.bf16.mxu1 %v2072_v46  ;;  %v4313_v19 = vmov 2  }
 0x35b   : > { %v2025_v55 = vmax.f32 %v1991_v41, 0.0  ;;  %2357 = vmatmul.mubr.bf16.vlgmr.msra.gmra.mrb[96].mxu1 %v2071_v45  ;;  %v2055_v23 = vmin.f32 %v2023_v11, 1.0  ;;  %3863 = vset.pattern.permute.xlu1 %v4313_v19 }
 0x35c   : > { %v2026_v48 = vmax.f32 %v1993_v59, 0.0  ;;  %v2056_v2 = vmin.f32 %v2024_v16, 1.0  ;;  %3864 = vset.pattern.permute.xlu0 %v4313_v19 }
 0x35d   : > { %v2057_v51 = vmin.f32 %v2025_v55, 1.0 }
 0x35e   : > { %v2058_v31 = vmin.f32 %v2026_v48, 1.0 }
 0x35f   : > { %v2073_v49 = vpack.c.bf16 %v2057_v51, %v2055_v23 }
 0x360   : > { %v2074_v52 = vpack.c.bf16 %v2058_v31, %v2056_v2 }
 0x362   : > { %2364 = vmatprep.mubr.bf16.mxu1 %v2074_v52 }
 0x363   : > { %2365 = vmatmul.mubr.bf16.gmra.mrb[100].mxu1 %v2073_v49 }
 0x3fe   : > { %v3584_v28 = vpop.f32.mrb[80].mxu0 }
 0x3ff   : > { %v3585_v34 = vpop.f32.mrb[81].mxu0 }
 0x400   : > { %v3586_v10 = vadd.f32 %v3585_v34, %v3584_v28  ;;  %v3587_v26 = vpop.f32.mrb[82].mxu0 }
 0x401   : > { %v3588_v39 = vpop.f32.mrb[83].mxu0 }
 0x402   : > { %v2311_v21 = vadd.f32 %v3586_v10, %v5280_v6  ;;  %v3589_v40 = vadd.f32 %v3588_v39, %v3587_v26 }
 0x404   : > { %v2314_v3 = vadd.f32 %v3589_v40, %v5280_v6  ;;  %v2373_v44 = vsel %vm2157_vm1, %v2311_v21, 0.0  ;;  %vm2172_vm1 = vcmp.eq.s32.totalorder %v5149_v47, %v5095_v5 }
 0x405   : > { %v2390_v12 = vsel %vm2389_vm3, %v2373_v44, 0.0 }
 0x406   : > { %v3590_v62 = vpop.f32.mrb[84].mxu0  ;;  %2391 = vadd.xlane.f32.xlu0 %v2390_v12  ;;  %v2374_v29 = vsel %vm2158_vm2, %v2314_v3, 0.0  ;;  %vm2501_vm2 = vcmp.eq.s32.totalorder %v5149_v47, %v5145_v27 }
 0x407   : > { %v3591_v53 = vpop.f32.mrb[85].mxu0  ;;  %v2393_v15 = vsel %vm2389_vm3, %v2374_v29, 0.0 }
 0x408   : > { %v3592_v24 = vadd.f32 %v3591_v53, %v3590_v62  ;;  %v3593_v9 = vpop.f32.mrb[86].mxu0  ;;  %2394 = vadd.xlane.f32.xlu1 %v2393_v15 }
 0x409   : > { %v3594_v17 = vpop.f32.mrb[87].mxu0 }
 0x40a   : > { %v2319_v50 = vadd.f32 %v3592_v24, %v5280_v6  ;;  %v3595_v36 = vadd.f32 %v3594_v17, %v3593_v9 }
 0x40c   : > { %v2322_v57 = vadd.f32 %v3595_v36, %v5280_v6  ;;  %v2375_v13 = vsel %vm2159_vm4, %v2319_v50, 0.0 }
 0x40d   : > { %v2396_v58 = vsel %vm2389_vm3, %v2375_v13, 0.0 }
 0x40e   : > { %v3596_v8 = vpop.f32.mrb[88].mxu0  ;;  %2397 = vadd.xlane.f32.xlu0 %v2396_v58  ;;  %v2376_v56 = vsel %vm2160_vm5, %v2322_v57, 0.0 }
 0x40f   : > { %v3597_v37 = vpop.f32.mrb[89].mxu0  ;;  %v2399_v45 = vsel %vm2389_vm3, %v2376_v56, 0.0 }
 0x410   : > { %v3598_v32 = vadd.f32 %v3597_v37, %v3596_v8  ;;  %v3599_v18 = vpop.f32.mrb[90].mxu0 }
 0x411   : > { %v3600_v42 = vpop.f32.mrb[91].mxu0 }
 0x412   : > { %v2327_v20 = vadd.f32 %v3598_v32, %v5280_v6  ;;  %v3601_v30 = vadd.f32 %v3600_v42, %v3599_v18  ;;  %2400 = vadd.xlane.f32.xlu0 %v2399_v45 }
 0x414   : > { %v2330_v33 = vadd.f32 %v3601_v30, %v5280_v6  ;;  %v2377_v43 = vsel %vm2161_vm6, %v2327_v20, 0.0 }
 0x415   : > { %v2402_v46 = vsel %vm2389_vm3, %v2377_v43, 0.0  ;;  %v2549_v43 = vpop.permute.xlu1 %2548 }
 0x416   : > { %v3602_v7 = vpop.f32.mrb[92].mxu0  ;;  %2403 = vadd.xlane.f32.xlu1 %v2402_v46  ;;  %v2378_v11 = vsel %vm2162_vm7, %v2330_v33, 0.0 }
 0x417   : > { %v3603_v41 = vpop.f32.mrb[93].mxu0  ;;  %v2405_v54 = vsel %vm2389_vm3, %v2378_v11, 0.0 }
 0x418   : > { %v3604_v16 = vadd.f32 %v3603_v41, %v3602_v7  ;;  %v3605_v59 = vpop.f32.mrb[94].mxu0  ;;  %2406 = vadd.xlane.f32.xlu0 %v2405_v54  ;;  %v2581_v7 = vsub.f32 %v4001_v0, %v2549_v43 }
 0x419   : > { %v3606_v63 = vpop.f32.mrb[95].mxu0 }
 0x41a   : > { %v2335_v55 = vadd.f32 %v3604_v16, %v5280_v6  ;;  %v3607_v48 = vadd.f32 %v3606_v63, %v3605_v59  ;;  %v2597_v63 = vsel %vm2501_vm2, %v2581_v7, 0.0  ;;  %v4011_v7 = vld [vmem:[%s4847_s14 + $0x48] sm:$0xff] }
 0x41b   : > { %v2643_v1 = vsel %vm2389_vm3, %v2597_v63, 0.0 }
 0x41c   : > { %v2338_v35 = vadd.f32 %v3607_v48, %v5280_v6  ;;  %v2379_v23 = vsel %vm2163_vm8, %v2335_v55, 0.0  ;;  %v2603_v48 = vpop.xlane.xlu1 %2602 }
 0x41d   : > { %v2408_v51 = vsel %vm2389_vm3, %v2379_v23, 0.0 }
 0x41e   : > { %v3608_v2 = vpop.f32.mrb[96].mxu0  ;;  %2409 = vadd.xlane.f32.xlu1 %v2408_v51  ;;  %v2380_v31 = vsel %vm2164_vm9, %v2338_v35, 0.0 }
 0x41f   : > { %v3609_v49 = vpop.f32.mrb[97].mxu0  ;;  %v2411_v52 = vsel %vm2389_vm3, %v2380_v31, 0.0 }
 0x420   : > { %v3610_v28 = vadd.f32 %v3609_v49, %v3608_v2  ;;  %v3611_v34 = vpop.f32.mrb[98].mxu0  ;;  %2412 = vadd.xlane.f32.xlu0 %v2411_v52  ;;  %v2612_v35 = vpop.xlane.xlu1 %2611 }
 0x421   : > { %v3612_v10 = vpop.f32.mrb[99].mxu0 }
 0x422   : > { %v2343_v4 = vadd.f32 %v3610_v28, %v5280_v6  ;;  %v3613_v26 = vadd.f32 %v3612_v10, %v3611_v34  ;;  %v4002_v28 = vld [vmem:[%s4847_s14] sm:$0xff] }
 0x423   : > { %v3267_v34 = vadd.f32 -0.5, %v4002_v28 }
 0x424   : > { %v2346_v25 = vadd.f32 %v3613_v26, %v5280_v6  ;;  %v2381_v39 = vsel %vm2165_vm10, %v2343_v4, 0.0  ;;  %v2618_v27 = vpop.xlane.xlu1 %2617  ;;  %v4003_v4 = vld [vmem:[%s4847_s14 + $0x8] sm:$0xff] }
 0x425   : > { %v2414_v21 = vsel %vm2389_vm3, %v2381_v39, 0.0  ;;  %v3268_v26 = vadd.f32 -0.5, %v4003_v4 }
 0x426   : > { %v3614_v40 = vpop.f32.mrb[100].mxu0  ;;  %2415 = vadd.xlane.f32.xlu1 %v2414_v21  ;;  %v2382_v3 = vsel %vm2166_vm11, %v2346_v25, 0.0 }
 0x427   : > { %v3615_v44 = vpop.f32.mrb[101].mxu0  ;;  %v2417_v12 = vsel %vm2389_vm3, %v2382_v3, 0.0 }
 0x428   : > { %v3616_v62 = vadd.f32 %v3615_v44, %v3614_v40  ;;  %v3617_v29 = vpop.f32.mrb[102].mxu0  ;;  %2418 = vadd.xlane.f32.xlu0 %v2417_v12  ;;  %v2624_v51 = vpop.xlane.xlu1 %2623  ;;  %v2663_v40 = vmul.f32 %v3268_v26, %v2603_v48  ;;  %v4004_v12 = vld [vmem:[%s4847_s14 + $0x10] sm:$0xff]  ;;  %v4015_v26 = vld [vmem:[%s4847_s14 + $0x68] sm:$0xff] }
 0x429   : > { %v3618_v53 = vpop.f32.mrb[103].mxu0 }
 0x42a   : > { %v2351_v14 = vadd.f32 %v3616_v62, %v5280_v6  ;;  %v3619_v15 = vadd.f32 %v3618_v53, %v3617_v29  ;;  %v3269_v62 = vadd.f32 -0.5, %v4004_v12  ;;  %v4016_v12 = vld [vmem:[%s4847_s14 + $0x70] sm:$0xff] }
 0x42c   : > { %v2354_v22 = vadd.f32 %v3619_v15, %v5280_v6  ;;  %v2383_v24 = vsel %vm2167_vm12, %v2351_v14, 0.0  ;;  %v5350_v31 = vpop.xlane.xlu1 %2629  ;;  %v4005_v14 = vld [vmem:[%s4847_s14 + $0x18] sm:$0xff] }
 0x42d   : > { %v2420_v9 = vsel %vm2389_vm3, %v2383_v24, 0.0  ;;  %v3270_v15 = vadd.f32 -0.5, %v4005_v14 }
 0x42e   : > { %v3620_v17 = vpop.f32.mrb[96].mxu1  ;;  %2421 = vadd.xlane.f32.xlu1 %v2420_v9  ;;  %v2384_v50 = vsel %vm2168_vm13, %v2354_v22, 0.0 }
 0x42f   : > { %v3621_v36 = vpop.f32.mrb[97].mxu1  ;;  %v2423_v57 = vsel %vm2389_vm3, %v2384_v50, 0.0 }
 0x430   : > { %v3622_v13 = vadd.f32 %v3621_v36, %v3620_v17  ;;  %v3623_v58 = vpop.f32.mrb[98].mxu1  ;;  %2424 = vadd.xlane.f32.xlu0 %v2423_v57  ;;  %v5354_v52 = vpop.xlane.xlu1 %2635  ;;  %v4006_v17 = vld [vmem:[%s4847_s14 + $0x20] sm:$0xff] }
 0x431   : > { %v3624_v8 = vpop.f32.mrb[99].mxu1  ;;  %v3271_v50 = vadd.f32 -0.5, %v4006_v17 }
 0x432   : > { %v2359_v60 = vadd.f32 %v3622_v13, %v5280_v6  ;;  %v3625_v56 = vadd.f32 %v3624_v8, %v3623_v58  ;;  %v4007_v13 = vld [vmem:[%s4847_s14 + $0x28] sm:$0xff] }
 0x433   : > { %v3272_v58 = vadd.f32 -0.5, %v4007_v13  ;;  %v2666_v8 = vmul.f32 %v3271_v50, %v2612_v35 }
 0x434   : > { %v2362_v38 = vadd.f32 %v3625_v56, %v5280_v6  ;;  %v2385_v37 = vsel %vm2169_vm14, %v2359_v60, 0.0  ;;  %v5360_v25 = vpop.xlane.xlu1 %2641 }
 0x435   : > { %v2426_v32 = vsel %vm2389_vm3, %v2385_v37, 0.0 }
 0x436   : > { %v3626_v18 = vpop.f32.mrb[100].mxu1  ;;  %2427 = vadd.xlane.f32.xlu1 %v2426_v32  ;;  %v2386_v42 = vsel %vm2170_vm15, %v2362_v38, 0.0  ;;  %v4008_v32 = vld [vmem:[%s4847_s14 + $0x30] sm:$0xff] }
 0x437   : > { %v3627_v45 = vpop.f32.mrb[101].mxu1  ;;  %v2429_v20 = vsel %vm2389_vm3, %v2386_v42, 0.0 }
 0x438   : > { %v3628_v30 = vadd.f32 %v3627_v45, %v3626_v18  ;;  %v3629_v33 = vpop.f32.mrb[102].mxu1  ;;  %2430 = vadd.xlane.f32.xlu0 %v2429_v20  ;;  %v3273_v18 = vadd.f32 -0.5, %v4008_v32  ;;  %v4009_v45 = vld [vmem:[%s4847_s14 + $0x38] sm:$0xff] }
 0x439   : > { %v3630_v61 = vpop.f32.mrb[103].mxu1  ;;  %v3274_v20 = vadd.f32 -0.5, %v4009_v45 }
 0x43a   : > { %v2367_v46 = vadd.f32 %v3628_v30, %v5280_v6  ;;  %v3631_v19 = vadd.f32 %v3630_v61, %v3629_v33  ;;  %v2668_v30 = vmul.f32 %v3273_v18, %v2618_v27 }
 0x43c   : > { %v2370_v11 = vadd.f32 %v3631_v19, %v5280_v6  ;;  %v2387_v41 = vsel %vm2171_vm0, %v2367_v46, 0.0  ;;  %v2600_v6 = vpop.xlane.xlu0 %2599  ;;  %v4010_v19 = vld [vmem:[%s4847_s14 + $0x40] sm:$0xff] }
 0x43d   : > { %v2432_v54 = vsel %vm2389_vm3, %v2387_v41, 0.0  ;;  %v2662_v39 = vmul.f32 %v3267_v34, %v2600_v6  ;;  %v3275_v0 = vadd.f32 -0.5, %v4010_v19  ;;  %v4012_v6 = vld [vmem:[%s4847_s14 + $0x50] sm:$0xff]  ;;  %v4014_v34 = vld [vmem:[%s4847_s14 + $0x60] sm:$0xff] }
 0x43e   : > { %2433 = vadd.xlane.f32.xlu1 %v2432_v54  ;;  %v2388_v16 = vsel %vm2172_vm1, %v2370_v11, 0.0  ;;  %v3276_v11 = vadd.f32 -0.5, %v4011_v7 }
 0x43f   : > { %v2435_v59 = vsel %vm2389_vm3, %v2388_v16, 0.0  ;;  %v2670_v54 = vmul.f32 %v3275_v0, %v2624_v51 }
 0x440   : > { %2436 = vadd.xlane.f32.xlu0 %v2435_v59  ;;  %v2606_v55 = vpop.xlane.xlu0 %2605 }
 0x441   : > { %v2664_v53 = vmul.f32 %v3269_v62, %v2606_v55  ;;  %v3277_v55 = vadd.f32 -0.5, %v4012_v6 }
 0x444   : > { %2644 = vadd.xlane.f32.xlu0 %v2643_v1  ;;  %v2609_v5 = vpop.xlane.xlu0 %2608 }
 0x445   : > { %v2665_v9 = vmul.f32 %v3270_v15, %v2609_v5  ;;  %v4013_v5 = vld [vmem:[%s4847_s14 + $0x58] sm:$0xff] }
 0x446   : > { %v3278_v35 = vadd.f32 -0.5, %v4013_v5 }
 0x448   : > { %v2615_v23 = vpop.xlane.xlu0 %2614 }
 0x449   : > { %v2667_v37 = vmul.f32 %v3272_v58, %v2615_v23  ;;  %v2672_v23 = vmul.f32 %v3277_v55, %v5350_v31 }
 0x44c   : > { %v2621_v47 = vpop.xlane.xlu0 %2620 }
 0x44d   : > { %v2669_v46 = vmul.f32 %v3274_v20, %v2621_v47 }
 0x450   : > { %v2627_v2 = vpop.xlane.xlu0 %2626 }
 0x451   : > { %v2671_v59 = vmul.f32 %v3276_v11, %v2627_v2  ;;  %v3279_v2 = vadd.f32 -0.5, %v4014_v34 }
 0x454   : > { %v5352_v49 = vpop.xlane.xlu0 %2632 }
 0x455   : > { %v2673_v47 = vmul.f32 %v3278_v35, %v5352_v49  ;;  %v3281_v49 = vadd.f32 -0.5, %v4016_v12 }
 0x458   : > { %v5357_v10 = vpop.xlane.xlu0 %2638 }
 0x493   : > { %v2392_v21 = vpop.xlane.xlu0 %2391 }
 0x494   : > { %v2678_v3 = vadd.f32 %v2662_v39, %v2392_v21  ;;  %v3280_v39 = vadd.f32 -0.5, %v4015_v26  ;;  %v2674_v21 = vmul.f32 %v3279_v2, %v5354_v52 }
 0x495   : > { %v2395_v44 = vpop.xlane.xlu1 %2394 }
 0x496   : > { %v2679_v29 = vadd.f32 %v2663_v40, %v2395_v44  ;;  %2696 = vperm.xlu1 %3863, %v2678_v3   ;;  %v2675_v3 = vmul.f32 %v3280_v39, %v5357_v10 }
 0x498   : > { %2701 = vperm.xlu0 %3864, %v2679_v29   ;;  %v2676_v29 = vmul.f32 %v3281_v49, %v5360_v25 }
 0x49b   : > { %v2398_v22 = vpop.xlane.xlu0 %2397 }
 0x49c   : > { %v2680_v24 = vadd.f32 %v2664_v53, %v2398_v22  ;;  %v4017_v22 = vld [vmem:[%s4847_s14 + $0x78] sm:$0xff]  ;;  %s3300_s14 = sshll.u32 (%p5553_p5), %s4378_s9, 7 }
 0x49d   : > { %s5423_s10 = scalar_lea.vmem (%p5553_p5), %s5554_s11, %s3300_s14  }
 0x49e   : > { %2706 = vperm.xlu1 %3863, %v2680_v24   ;;  %v3282_v24 = vadd.f32 -0.5, %v4017_v22 }
 0x49f   : > { %v2401_v36 = vpop.xlane.xlu0 %2400 }
 0x4a0   : > { %v2681_v57 = vadd.f32 %v2665_v9, %v2401_v36 }
 0x4a2   : > { %2711 = vperm.xlu1 %3863, %v2681_v57  }
 0x4a3   : > { %v2404_v60 = vpop.xlane.xlu1 %2403 }
 0x4a4   : > { %v2682_v56 = vadd.f32 %v2666_v8, %v2404_v60 }
 0x4a5   : > { %v2407_v38 = vpop.xlane.xlu0 %2406 }
 0x4a6   : > { %2716 = vperm.xlu1 %3863, %v2682_v56   ;;  %v2683_v42 = vadd.f32 %v2667_v37, %v2407_v38 }
 0x4aa   : > { %2721 = vperm.xlu1 %3863, %v2683_v42  }
 0x4ab   : > { %v2410_v33 = vpop.xlane.xlu1 %2409 }
 0x4ac   : > { %v2684_v43 = vadd.f32 %v2668_v30, %v2410_v33 }
 0x4ad   : > { %v2413_v61 = vpop.xlane.xlu0 %2412 }
 0x4ae   : > { %2726 = vperm.xlu1 %3863, %v2684_v43   ;;  %v2685_v41 = vadd.f32 %v2669_v46, %v2413_v61 }
 0x4b2   : > { %2731 = vperm.xlu1 %3863, %v2685_v41  }
 0x4b3   : > { %v2416_v16 = vpop.xlane.xlu1 %2415 }
 0x4b4   : > { %v2686_v63 = vadd.f32 %v2670_v54, %v2416_v16 }
 0x4b5   : > { %v2419_v1 = vpop.xlane.xlu0 %2418 }
 0x4b6   : > { %v2687_v48 = vadd.f32 %v2671_v59, %v2419_v1  ;;  %2736 = vperm.xlu1 %3863, %v2686_v63  }
 0x4b8   : > { %2741 = vperm.xlu0 %3864, %v2687_v48  }
 0x4bb   : > { %v2422_v27 = vpop.xlane.xlu1 %2421 }
 0x4bc   : > { %v2688_v51 = vadd.f32 %v2672_v23, %v2422_v27 }
 0x4bd   : > { %v2425_v28 = vpop.xlane.xlu0 %2424 }
 0x4be   : > { %v2689_v4 = vadd.f32 %v2673_v47, %v2425_v28  ;;  %2746 = vperm.xlu1 %3863, %v2688_v51  }
 0x4c0   : > { %2751 = vperm.xlu0 %3864, %v2689_v4  }
 0x4c3   : > { %v2428_v40 = vpop.xlane.xlu1 %2427 }
 0x4c4   : > { %v2690_v31 = vadd.f32 %v2674_v21, %v2428_v40 }
 0x4c5   : > { %v2431_v44 = vpop.xlane.xlu0 %2430 }
 0x4c6   : > { %v2691_v62 = vadd.f32 %v2675_v3, %v2431_v44  ;;  %2756 = vperm.xlu1 %3863, %v2690_v31  }
 0x4c8   : > { %2761 = vperm.xlu0 %3864, %v2691_v62  }
 0x4cb   : > { %v2434_v53 = vpop.xlane.xlu1 %2433 }
 0x4cc   : > { %v2692_v14 = vadd.f32 %v2676_v29, %v2434_v53 }
 0x4cd   : > { %v2437_v15 = vpop.xlane.xlu0 %2436 }
 0x4ce   : > { %2766 = vperm.xlu1 %3863, %v2692_v14  }
 0x4d1   : > { %v2645_v52 = vpop.xlane.xlu0 %2644 }
 0x4d2   : > { %v2677_v9 = vmul.f32 %v3282_v24, %v2645_v52 }
 0x4d4   : > { %v2693_v17 = vadd.f32 %v2677_v9, %v2437_v15 }
 0x4d6   : > { %2771 = vperm.xlu0 %3864, %v2693_v17  }
 0x515   : > { %v2697_v10 = vpop.permute.xlu1 %2696 }
 0x516   : > { %2774 = vst.msk [vmem:[%s5382_s26] sm:$0xff] %vm2389_vm3, %v2697_v10 }
 0x517   : > { %v2702_v25 = vpop.permute.xlu0 %2701 }
 0x518   : > { %2775 = vst.msk [vmem:[%s5382_s26 + $0x8] sm:$0xff] %vm2389_vm3, %v2702_v25 }
 0x51d   : > { %v2707_v50 = vpop.permute.xlu1 %2706 }
 0x51e   : > { %2776 = vst.msk [vmem:[%s5382_s26 + $0x10] sm:$0xff] %vm2389_vm3, %v2707_v50 }
 0x521   : > { %v2712_v36 = vpop.permute.xlu1 %2711 }
 0x522   : > { %2777 = vst.msk [vmem:[%s5382_s26 + $0x18] sm:$0xff] %vm2389_vm3, %v2712_v36 }
 0x525   : > { %v2717_v57 = vpop.permute.xlu1 %2716 }
 0x526   : > { %2778 = vst.msk [vmem:[%s5382_s26 + $0x20] sm:$0xff] %vm2389_vm3, %v2717_v57 }
 0x529   : > { %v2722_v13 = vpop.permute.xlu1 %2721 }
 0x52a   : > { %2779 = vst.msk [vmem:[%s5382_s26 + $0x28] sm:$0xff] %vm2389_vm3, %v2722_v13 }
 0x52d   : > { %v2727_v58 = vpop.permute.xlu1 %2726 }
 0x52e   : > { %2780 = vst.msk [vmem:[%s5382_s26 + $0x30] sm:$0xff] %vm2389_vm3, %v2727_v58 }
 0x531   : > { %v2732_v8 = vpop.permute.xlu1 %2731 }
 0x532   : > { %2781 = vst.msk [vmem:[%s5382_s26 + $0x38] sm:$0xff] %vm2389_vm3, %v2732_v8 }
 0x535   : > { %v2737_v60 = vpop.permute.xlu1 %2736 }
 0x536   : > { %2782 = vst.msk [vmem:[%s5382_s26 + $0x40] sm:$0xff] %vm2389_vm3, %v2737_v60 }
 0x537   : > { %v2742_v56 = vpop.permute.xlu0 %2741 }
 0x538   : > { %2783 = vst.msk [vmem:[%s5382_s26 + $0x48] sm:$0xff] %vm2389_vm3, %v2742_v56 }
 0x53d   : > { %v2747_v38 = vpop.permute.xlu1 %2746 }
 0x53e   : > { %2784 = vst.msk [vmem:[%s5382_s26 + $0x50] sm:$0xff] %vm2389_vm3, %v2747_v38 }
 0x53f   : > { %v2752_v37 = vpop.permute.xlu0 %2751 }
 0x540   : > { %2785 = vst.msk [vmem:[%s5382_s26 + $0x58] sm:$0xff] %vm2389_vm3, %v2752_v37 }
 0x545   : > { %v2757_v32 = vpop.permute.xlu1 %2756 }
 0x546   : > { %2786 = vst.msk [vmem:[%s5382_s26 + $0x60] sm:$0xff] %vm2389_vm3, %v2757_v32 }
 0x547   : > { %v2762_v18 = vpop.permute.xlu0 %2761 }
 0x548   : > { %2787 = vst.msk [vmem:[%s5382_s26 + $0x68] sm:$0xff] %vm2389_vm3, %v2762_v18 }
 0x54d   : > { %v2767_v42 = vpop.permute.xlu1 %2766 }
 0x54e   : > { %2788 = vst.msk [vmem:[%s5382_s26 + $0x70] sm:$0xff] %vm2389_vm3, %v2767_v42 }
 0x550   : > { %2796 = sbr.rel (!%p5553_p5) target bundleno = 1416 (0x588), region = 80 }
 0x555   : > { %v2772_v45 = vpop.permute.xlu0 %2771 }
 0x556   : > { %2789 = vst.msk [vmem:[%s5382_s26 + $0x78] sm:$0xff] %vm2389_vm3, %v2772_v45 }
 0x557   : > { %s5566_s18 = smov (!%p2799_p1, %s2798_s18), 16 }
 0x558   : > { %s3285_s8 = sshll.u32 %s5566_s18, 7 }
 0x559   : > { %p3288_p4 = scmp.eq.s32.totalorder %s3285_s8, 0 }
 0x55a   : > { %s5429_s23 = sshrl.u32 (!%p3288_p4), %s5566_s18, 4 }
 0x55b   : > { %2807 = sbr.rel (%p3288_p4) target bundleno = 1416 (0x588), region = 84  ;;  %p3289_p8 = scmp.le.s32.totalorder (!%p3288_p4), %s5429_s23, 0 }
 0x562   : > { %3038 = sbr.rel (%p3289_p8) target bundleno = 1395 (0x573), region = 169  ;;  %s5555_s9 = smov (!%p3289_p8), %s5423_s10 }
 0x563   : > { %s5556_s16 = smov (!%p3289_p8), %s5382_s26  ;;  %s5438_s15 = smov (!%p3289_p8), 0  }
 0x564   : > { %s5440_s20 = smov (!%p3289_p8), 0  }
 0x569 LB: >> { %v2899_v20 = vld [vmem:[%s4272_s16] sm:$0xff]  ;;  %v2901_v30 = vld [vmem:[%s4272_s16 + $0x8] sm:$0xff]  ;;  %v2903_v33 = vld [vmem:[%s4272_s16 + $0x10] sm:$0xff]  ;;  %s2931_s2 = sadd.s32 1, %s4276_s15  ;;  %s2893_s20 = sadd.s32 1, %s4280_s20   ;;  %s4280_s20 = sphi %s5440_s20, %s2893_s20   ;;  %s4276_s15 = sphi %s5438_s15, %s5557_s15   ;;  %s4272_s16 = sphi %s5556_s16, %s2936_s16   ;;  %s4268_s9 = sphi %s5555_s9, %s2937_s9  }
 0x56a   : >> { %2900 = vst [vmem:[%s4268_s9] sm:$0xff] %v2899_v20  ;;  %2902 = vst [vmem:[%s4268_s9 + $0x8] sm:$0xff] %v2901_v30  ;;  %v2905_v43 = vld [vmem:[%s4272_s16 + $0x18] sm:$0xff]  ;;  %v2907_v61 = vld [vmem:[%s4272_s16 + $0x20] sm:$0xff]  ;;  %p2932_p11 = scmp.ge.s32.totalorder %s2931_s2, %s5429_s23  ;;  %p2892_p10 = scmp.ge.s32.totalorder %s2893_s20, %s5429_s23 }
 0x56b   : >> { %2904 = vst [vmem:[%s4268_s9 + $0x10] sm:$0xff] %v2903_v33  ;;  %v2909_v46 = vld [vmem:[%s4272_s16 + $0x28] sm:$0xff]  ;;  %2906 = vst [vmem:[%s4268_s9 + $0x18] sm:$0xff] %v2905_v43  ;;  %v2911_v19 = vld [vmem:[%s4272_s16 + $0x30] sm:$0xff] }
 0x56c   : >> { %2908 = vst [vmem:[%s4268_s9 + $0x20] sm:$0xff] %v2907_v61  ;;  %2910 = vst [vmem:[%s4268_s9 + $0x28] sm:$0xff] %v2909_v46  ;;  %v2913_v0 = vld [vmem:[%s4272_s16 + $0x38] sm:$0xff]  ;;  %v2915_v7 = vld [vmem:[%s4272_s16 + $0x40] sm:$0xff]  ;;  %s5568_s2 = smov (%p2932_p11, %s2931_s2), 0  ;;  %2895 = sbr.rel (!%p2892_p10) target bundleno = 1385 (0x569), region = 175 }
 0x56d   : >> { %2912 = vst [vmem:[%s4268_s9 + $0x30] sm:$0xff] %v2911_v19  ;;  %2914 = vst [vmem:[%s4268_s9 + $0x38] sm:$0xff] %v2913_v0  ;;  %v2917_v11 = vld [vmem:[%s4272_s16 + $0x48] sm:$0xff]  ;;  %v2919_v41 = vld [vmem:[%s4272_s16 + $0x50] sm:$0xff]  ;;  %s3290_s21 = sshll.u32 %s5568_s2, 7  ;;  %s5557_s15 = smov %s5568_s2 }
 0x56e   : >> { %2916 = vst [vmem:[%s4268_s9 + $0x40] sm:$0xff] %v2915_v7  ;;  %v2921_v54 = vld [vmem:[%s4272_s16 + $0x58] sm:$0xff]  ;;  %2918 = vst [vmem:[%s4268_s9 + $0x48] sm:$0xff] %v2917_v11  ;;  %v2923_v16 = vld [vmem:[%s4272_s16 + $0x60] sm:$0xff] }
 0x56f   : >> { %2920 = vst [vmem:[%s4268_s9 + $0x50] sm:$0xff] %v2919_v41  ;;  %2922 = vst [vmem:[%s4268_s9 + $0x58] sm:$0xff] %v2921_v54  ;;  %v2925_v59 = vld [vmem:[%s4272_s16 + $0x68] sm:$0xff]  ;;  %v2927_v63 = vld [vmem:[%s4272_s16 + $0x70] sm:$0xff] }
 0x570   : >> { %2924 = vst [vmem:[%s4268_s9 + $0x60] sm:$0xff] %v2923_v16  ;;  %2926 = vst [vmem:[%s4268_s9 + $0x68] sm:$0xff] %v2925_v59  ;;  %v2929_v1 = vld [vmem:[%s4272_s16 + $0x78] sm:$0xff]  ;;  %s2936_s16 = scalar_lea.vmem %s5382_s26, %s3290_s21 [#allocation12]  }
 0x571   : >> { %2928 = vst [vmem:[%s4268_s9 + $0x70] sm:$0xff] %v2927_v63  ;;  %2930 = vst [vmem:[%s4268_s9 + $0x78] sm:$0xff] %v2929_v1  ;;  %s2937_s9 = scalar_lea.vmem %s5423_s10, %s3290_s21  }
 0x573 PF: > { %s5498_s27 = sand.u32 15, %s5566_s18   ;;  %s3301_s17 = sshll.u32 %s5429_s23, 7 }
 0x574   : > { %s2942_s24 = scalar_lea.vmem %s5382_s26, %s3301_s17 [#allocation12]   ;;  %s2944_s25 = scalar_lea.vmem %s5423_s10, %s3301_s17  }
 0x575   : > { %p3295_p2 = scmp.le.s32.totalorder %s5498_s27, 0 }
 0x576   : > { %s4282_s12 = smov (!%p3295_p2), %s2944_s25   ;;  %s4286_s19 = smov (!%p3295_p2), %s2942_s24  }
 0x577   : > { %3052 = sbr.rel (%p3295_p2) target bundleno = 1416 (0x588), region = 180  ;;  %s4290_s13 = smov (!%p3295_p2), 0  }
 0x578   : > { %s4294_s14 = smov (!%p3295_p2), 0  }
 0x57e LB: >> { %v2954_v6 = vld [vmem:[%s4288_s19] sm:$0xff]  ;;  %s2956_s18 = sadd.s32 1, %s4292_s13  ;;  %s2948_s14 = sadd.s32 1, %s4296_s14   ;;  %s4296_s14 = sphi %s4294_s14, %s2948_s14   ;;  %s4292_s13 = sphi %s4290_s13, %s4291_s13   ;;  %s4288_s19 = sphi %s4286_s19, %s2961_s19   ;;  %s4284_s12 = sphi %s4282_s12, %s2962_s12  }
 0x57f   : >> { %2955 = vst [vmem:[%s4284_s12] sm:$0xff] %v2954_v6  ;;  %p2957_p13 = scmp.ge.s32.totalorder %s2956_s18, %s5498_s27  ;;  %p2947_p3 = scmp.ge.s32.totalorder %s2948_s14, %s5498_s27 }
 0x581   : >> { %s5570_s18 = smov (%p2957_p13, %s2956_s18), 0  ;;  %2950 = sbr.rel (!%p2947_p3) target bundleno = 1406 (0x57e), region = 186 }
 0x582   : >> { %s3296_s26 = sshll.u32 %s5570_s18, 3  ;;  %s4291_s13 = smov %s5570_s18  }
 0x583   : >> { %s2961_s19 = scalar_lea.vmem %s2942_s24, %s3296_s26 [#allocation12]   ;;  %s2962_s12 = scalar_lea.vmem %s2944_s25, %s3296_s26  }
 0x588 PF: > { %s5558_s30 = sld [smem:[#allocation17_spill]]  ;;  %s5559_s22 = sld [smem:[#allocation18_spill]] }
 0x589   : > { %s5560_s27 = smov %s4256_s28  ;;  %s5561_s28 = smov %s4260_s29 }
 0x58e   : > { %p21_p6 = scmp.ge.s32.totalorder %s5558_s30, 5   ;;  %s5562_s29 = smov %s5559_s22 }
 0x590   :  { %23 = sbr.rel (!%p21_p6) target bundleno = 9 (0x9), region = 197 }
 0x597   :  { %2978 = vsyncpa [#allocation3], 1 }
 0x598   :  { %2980 = vsyncpa [#allocation3 + $0x1], 1 }
 0x599   :  { %2981 = vsyncpa [#allocation5], 1 }
 0x59a   :  { %2982 = vsyncpa [#allocation8], 1 }
 0x59b   :  { %2983 = vsyncpa [#allocation11], 1 }

</bundles_post_ra>
